<compile_context>
chip_gen: v7x
topology: tpu7x:2x2x1
jax: 0.10.0
libtpu: 0.0.40
codegen_flags: <defaults>
</compile_context>

<pallas_src>
import functools
import numpy as np
import jax
import jax.numpy as jnp
from jax import lax
from jax.experimental import pallas as pl
from jax.experimental.pallas import tpu as pltpu

# ----------------------------- toy "Llama" config -----------------------------
VOCAB = 256
HIDDEN = 64
N_HEADS = 4
HEAD_DIM = HIDDEN // N_HEADS
INTERMEDIATE = 128
N_LAYERS = 2
MODEL_MAX_LENGTH = 32
EOS_ID = 2            # tokenizer.eos_token_id; also used as pad token (pad_token = eos_token)
RMS_EPS = 1e-6
ROPE_THETA = 10000.0
QKV_OUT = 256         # q|k|v = 192 columns, padded to 256 for lane density
GU_OUT = 2 * INTERMEDIATE   # gate|up = 256, already lane dense


# ----------------------------- fused Pallas kernel -----------------------------
def _fused_llama_kernel(ids_ref, cos_ref, sin_ref, rot_ref, embed_ref,
                        ln1_ref, wqkv_ref, wo_ref, ln2_ref, wgu_ref, wd_ref,
                        fln_ref, lmh_ref, logits_ref, *, B, S):
    f32, bf16 = jnp.float32, jnp.bfloat16
    T = B * S

    def rms(x, w):  # x: (T, D) f32, w: (1, D) f32  — all normalization math stays f32
        var = jnp.mean(x * x, axis=-1, keepdims=True)
        return x * lax.rsqrt(var + RMS_EPS) * w

    # ---- embedding lookup fused as one-hot(ids) @ embed on the MXU ----
    ids = ids_ref[...]                                                    # (T, 1) int32
    onehot = jnp.where(ids == lax.broadcasted_iota(jnp.int32, (T, VOCAB), 1),
                       1.0, 0.0).astype(bf16)                             # (T, V)
    x = jnp.dot(onehot, embed_ref[...], preferred_element_type=f32)       # (T, D) f32

    cos = cos_ref[...]          # (T, D) f32, RoPE tables tiled per head along lanes
    sin = sin_ref[...]
    rot = rot_ref[...]          # (D, D) bf16 block-diagonal rotate-half matrix

    scale = 1.0 / (HEAD_DIM ** 0.5)
    q_pos = lax.broadcasted_iota(jnp.int32, (B, S, S), 1)
    k_pos = lax.broadcasted_iota(jnp.int32, (B, S, S), 2)

    for l in range(N_LAYERS):
        # ------------------------- attention block -------------------------
        h = rms(x, ln1_ref[l]).astype(bf16)                               # (T, D)
        qkv = jnp.dot(h, wqkv_ref[l], preferred_element_type=f32)         # (T, 256) [q|k|v|pad]
        q = qkv[:, 0:HIDDEN]
        k = qkv[:, HIDDEN:2 * HIDDEN]
        v = qkv[:, 2 * HIDDEN:3 * HIDDEN]
        # RoPE rotate-half as a block-diagonal +/-1 permutation matmul (MXU, no lane shuffles)
        q = q * cos + jnp.dot(q.astype(bf16), rot, preferred_element_type=f32) * sin
        k = k * cos + jnp.dot(k.astype(bf16), rot, preferred_element_type=f32) * sin
        q3 = q.reshape(B, S, HIDDEN)
        k3 = k.reshape(B, S, HIDDEN)
        v3 = v.reshape(B, S, HIDDEN)
        wo_l = wo_ref[l]                                                  # (D, D) bf16
        attn_proj = jnp.zeros((T, HIDDEN), f32)
        for hd in range(N_HEADS):                                         # unrolled, single grid step
            lo, hi = hd * HEAD_DIM, (hd + 1) * HEAD_DIM
            qh = q3[..., lo:hi].astype(bf16)                              # (B, S, Dh)
            kh = k3[..., lo:hi].astype(bf16)
            vh = v3[..., lo:hi].astype(bf16)
            s = jnp.einsum("bqd,bkd->bqk", qh, kh,
                           preferred_element_type=f32) * scale            # (B, S, S) f32
            # causal mask only (matches model(inputs_embeds=...) without attention_mask;
            # right padding means real queries never see pad keys)
            s = jnp.where(k_pos <= q_pos, s, -1e30)
            m = jnp.max(s, axis=-1, keepdims=True)
            p = jnp.exp(s - m)
            denom = jnp.sum(p, axis=-1, keepdims=True)
            p = p * pl.reciprocal(denom, approx=True)                     # EUP, frees VALU
            oh = jnp.einsum("bqk,bkd->bqd", p.astype(bf16), vh,
                            preferred_element_type=f32)                   # (B, S, Dh) f32
            oh2 = oh.reshape(T, HEAD_DIM).astype(bf16)
            # o-projection split per head row-block => no lane-axis concat needed
            attn_proj = attn_proj + jnp.dot(oh2, wo_l[lo:hi, :],
                                            preferred_element_type=f32)
        x = x + attn_proj

        # ------------------------- SwiGLU MLP block -------------------------
        h = rms(x, ln2_ref[l]).astype(bf16)
        gu = jnp.dot(h, wgu_ref[l], preferred_element_type=f32)           # (T, 2I) [gate|up]
        g = gu[:, :INTERMEDIATE]
        u = gu[:, INTERMEDIATE:]
        act = (g * jax.nn.sigmoid(g) * u).astype(bf16)                    # SwiGLU in f32, cast for dot
        x = x + jnp.dot(act, wd_ref[l], preferred_element_type=f32)

    # ------------------------- final norm + lm_head -------------------------
    h = rms(x, fln_ref[...]).astype(bf16)
    logits_ref[...] = jnp.dot(h, lmh_ref[...], preferred_element_type=f32)   # (T, V) lane-dense


# ----------------------------- host-side helpers --------------------------------
def _rope_tables(S):
    inv_freq = 1.0 / (ROPE_THETA ** (np.arange(0, HEAD_DIM, 2, dtype=np.float64) / HEAD_DIM))
    pos = np.arange(S, dtype=np.float64)
    freqs = np.outer(pos, inv_freq)                       # (S, Dh/2)
    emb = np.concatenate([freqs, freqs], axis=-1)         # (S, Dh)
    return np.cos(emb).astype(np.float32), np.sin(emb).astype(np.float32)


def _rotate_half_matrix():
    # rotate_half(x) == x @ R ; block-diagonal over heads so it applies to the packed [T, H*Dh].
    half = HEAD_DIM // 2
    r = np.zeros((HEAD_DIM, HEAD_DIM), np.float32)
    for c in range(half):
        r[c + half, c] = -1.0
    for c in range(half, HEAD_DIM):
        r[c - half, c] = 1.0
    return np.kron(np.eye(N_HEADS, dtype=np.float32), r)  # (D, D)


def llama_logits(token_ids, params):
    B, S = token_ids.shape
    T = B * S
    cos, sin = _rope_tables(S)
    cos_t = jnp.asarray(np.tile(np.tile(cos, (1, N_HEADS)), (B, 1)))   # (T, D) f32
    sin_t = jnp.asarray(np.tile(np.tile(sin, (1, N_HEADS)), (B, 1)))
    rot = jnp.asarray(_rotate_half_matrix(), jnp.bfloat16)             # (D, D) bf16 (+/-1 exact)
    ids = token_ids.reshape(T, 1).astype(jnp.int32)

    kernel = functools.partial(_fused_llama_kernel, B=B, S=S)
    inputs = (ids, cos_t, sin_t, rot, params["embed"],
              params["ln1"], params["wqkv"], params["wo"],
              params["ln2"], params["wgu"], params["wd"],
              params["final_ln"], params["lm_head"])

    def full(shape):
        return pl.BlockSpec(shape, lambda i, n=len(shape): (0,) * n)

    logits = pl.pallas_call(
        kernel,
        out_shape=jax.ShapeDtypeStruct((T, VOCAB), jnp.float32),
        grid=(1,),
        in_specs=[full(a.shape) for a in inputs],
        out_specs=full((T, VOCAB)),
        compiler_params=pltpu.CompilerParams(dimension_semantics=("arbitrary",)),
    )(*inputs)
    return logits.reshape(B, S, VOCAB)


# ----------------------------- parameters --------------------------------------
def init_params(key):
    def nrm(k, shape, scale=0.02):
        return scale * jax.random.normal(k, shape, dtype=jnp.float32)

    keys = jax.random.split(key, 3 + N_LAYERS)
    embed = nrm(keys[0], (VOCAB, HIDDEN))
    lm_head = nrm(keys[1], (HIDDEN, VOCAB))
    wqkv, wo, wgu, wd = [], [], [], []
    for l in range(N_LAYERS):
        lk = jax.random.split(keys[3 + l], 7)
        wq = nrm(lk[0], (HIDDEN, HIDDEN))
        wk = nrm(lk[1], (HIDDEN, HIDDEN))
        wv = nrm(lk[2], (HIDDEN, HIDDEN))
        pad = jnp.zeros((HIDDEN, QKV_OUT - 3 * HIDDEN), jnp.float32)
        wqkv.append(jnp.concatenate([wq, wk, wv, pad], axis=1))            # (D, 256)
        wo.append(nrm(lk[3], (HIDDEN, HIDDEN)))
        wgu.append(jnp.concatenate([nrm(lk[4], (HIDDEN, INTERMEDIATE)),
                                    nrm(lk[5], (HIDDEN, INTERMEDIATE))], axis=1))  # (D, 256)
        wd.append(nrm(lk[6], (INTERMEDIATE, HIDDEN)))
    return {
        "embed": embed.astype(jnp.bfloat16),
        "lm_head": lm_head.astype(jnp.bfloat16),
        "final_ln": jnp.ones((1, HIDDEN), jnp.float32),
        "ln1": jnp.ones((N_LAYERS, 1, HIDDEN), jnp.float32),
        "ln2": jnp.ones((N_LAYERS, 1, HIDDEN), jnp.float32),
        "wqkv": jnp.stack(wqkv).astype(jnp.bfloat16),   # (L, D, 256)
        "wo": jnp.stack(wo).astype(jnp.bfloat16),       # (L, D, D)
        "wgu": jnp.stack(wgu).astype(jnp.bfloat16),     # (L, D, 256)
        "wd": jnp.stack(wd).astype(jnp.bfloat16),       # (L, I, D)
    }


# ----------------------------- toy tokenizer (host side) -----------------------
# TODO(synk): the real module uses a HuggingFace LlamaTokenizer + PEFT LoRA wrapper;
#             emulated here with a deterministic byte-level tokenizer.
def toy_tokenize(text):
    return [(ord(c) % (VOCAB - 8)) + 3 for c in text][:MODEL_MAX_LENGTH]


def llama_helper_forward(data, input_, params, prompt=None):
    """Mirrors LlamaHelper.forward(data, input, prompt) -> (logits, answer_prompt, target_mask)."""
    prompt_output = [toy_tokenize(d) for d in data]
    input_tokens = [toy_tokenize(s) for s in input_]
    prompt_output = [p + [EOS_ID] for p in prompt_output]          # answers + eos
    if prompt is None:
        prompt = [""] * len(data)
    prompt_input = [toy_tokenize(p) for p in prompt]

    prompt_ids = [a + b + c for a, b, c in zip(input_tokens, prompt_input, prompt_output)]
    prompt_mask = [[False] * (len(a) + len(b) - 1) + [True] * len(c) + [False]
                   for a, b, c in zip(input_tokens, prompt_input, prompt_output)]
    answer_prompt = jnp.asarray(np.concatenate([np.asarray(p, np.int32) for p in prompt_output]))

    # tokenizer.pad(padding=True): right-pad to batch max, pad token = eos.  The padded length
    # is rounded up to a multiple of 8 so every (sublane, lane) tile in the kernel is aligned;
    # the extra positions are ordinary eos pads excluded by target_mask (same as HF padding).
    B = len(prompt_ids)
    S = max(len(p) for p in prompt_ids)
    S = ((S + 7) // 8) * 8
    ids = np.full((B, S), EOS_ID, np.int32)
    msk = np.zeros((B, S), bool)
    for i, (p, m) in enumerate(zip(prompt_ids, prompt_mask)):
        ids[i, :len(p)] = p
        msk[i, :len(m)] = m
    prompt_answer_ids = jnp.asarray(ids)
    target_mask = jnp.asarray(msk)

    # embed_tokens + transformer + lm_head -> logits  (single fused Pallas kernel)
    logits = llama_logits(prompt_answer_ids, params)
    return logits, answer_prompt, target_mask


# ----------------------------- main ---------------------------------------------
if __name__ == "__main__":
    key = jax.random.PRNGKey(0)
    params = init_params(key)

    data = ["yes", "no"]                                   # target answers
    input_ = ["the sky is blue", "cats have four legs"]    # input contexts
    logits, answer_prompt, target_mask = llama_helper_forward(data, input_, params)

    logits = jax.block_until_ready(logits)
    answer_prompt = jax.block_until_ready(answer_prompt)
    target_mask = jax.block_until_ready(target_mask)

    assert logits.shape == (2, target_mask.shape[1], VOCAB)
    assert answer_prompt.shape[0] == (len("yes") + 1) + (len("no") + 1)
    assert target_mask.dtype == jnp.bool_
    assert bool(jnp.all(jnp.isfinite(logits)))
    print("KERNEL_OK")
</pallas_src>

<mosaic_0001>
module attributes {stable_mosaic.version = 11 : i64} {
  func.func @_fused_llama_kernel(%arg0: i32, %arg1: memref<48x1xi32, #tpu.memory_space<vmem>>, %arg2: memref<48x64xf32, #tpu.memory_space<vmem>>, %arg3: memref<48x64xf32, #tpu.memory_space<vmem>>, %arg4: memref<64x64xbf16, #tpu.memory_space<vmem>>, %arg5: memref<256x64xbf16, #tpu.memory_space<vmem>>, %arg6: memref<2x1x64xf32, #tpu.memory_space<vmem>>, %arg7: memref<2x64x256xbf16, #tpu.memory_space<vmem>>, %arg8: memref<2x64x64xbf16, #tpu.memory_space<vmem>>, %arg9: memref<2x1x64xf32, #tpu.memory_space<vmem>>, %arg10: memref<2x64x256xbf16, #tpu.memory_space<vmem>>, %arg11: memref<2x128x64xbf16, #tpu.memory_space<vmem>>, %arg12: memref<1x64xf32, #tpu.memory_space<vmem>>, %arg13: memref<64x256xbf16, #tpu.memory_space<vmem>>, %arg14: memref<48x256xf32, #tpu.memory_space<vmem>>) attributes {dimension_semantics = [#tpu.dimension_semantics<arbitrary>], iteration_bounds = array<i64: 1>, scalar_prefetch = 0 : i64, scratch_operands = 0 : i64, tpu.core_type = #tpu.core_type<tc>, window_params = [{pipeline_mode = #tpu.pipeline_mode<synchronous>, transform_indices = @transform_0, window_bounds = array<i64: 48, 1>}, {pipeline_mode = #tpu.pipeline_mode<synchronous>, transform_indices = @transform_1, window_bounds = array<i64: 48, 64>}, {pipeline_mode = #tpu.pipeline_mode<synchronous>, transform_indices = @transform_2, window_bounds = array<i64: 48, 64>}, {pipeline_mode = #tpu.pipeline_mode<synchronous>, transform_indices = @transform_3, window_bounds = array<i64: 64, 64>}, {pipeline_mode = #tpu.pipeline_mode<synchronous>, transform_indices = @transform_4, window_bounds = array<i64: 256, 64>}, {pipeline_mode = #tpu.pipeline_mode<synchronous>, transform_indices = @transform_5, window_bounds = array<i64: 2, 1, 64>}, {pipeline_mode = #tpu.pipeline_mode<synchronous>, transform_indices = @transform_6, window_bounds = array<i64: 2, 64, 256>}, {pipeline_mode = #tpu.pipeline_mode<synchronous>, transform_indices = @transform_7, window_bounds = array<i64: 2, 64, 64>}, {pipeline_mode = #tpu.pipeline_mode<synchronous>, transform_indices = @transform_8, window_bounds = array<i64: 2, 1, 64>}, {pipeline_mode = #tpu.pipeline_mode<synchronous>, transform_indices = @transform_9, window_bounds = array<i64: 2, 64, 256>}, {pipeline_mode = #tpu.pipeline_mode<synchronous>, transform_indices = @transform_10, window_bounds = array<i64: 2, 128, 64>}, {pipeline_mode = #tpu.pipeline_mode<synchronous>, transform_indices = @transform_11, window_bounds = array<i64: 1, 64>}, {pipeline_mode = #tpu.pipeline_mode<synchronous>, transform_indices = @transform_12, window_bounds = array<i64: 64, 256>}, {pipeline_mode = #tpu.pipeline_mode<synchronous>, transform_indices = @transform_13, window_bounds = array<i64: 48, 256>}]} {
    %c0 = arith.constant 0 : index
    %c0_0 = arith.constant 0 : index
    %0 = vector.load %arg1[%c0, %c0_0] : memref<48x1xi32, #tpu.memory_space<vmem>>, vector<48x1xi32>
    %1 = tpu.iota {dimensions = array<i32: 1>} : vector<48x256xi32>
    %2 = vector.broadcast %0 : vector<48x1xi32> to vector<48x256xi32>
    %3 = arith.cmpi eq, %2, %1 : vector<48x256xi32>
    %cst = arith.constant 1.000000e+00 : f32
    %cst_1 = arith.constant 0.000000e+00 : f32
    %4 = vector.broadcast %cst : f32 to vector<48x256xf32>
    %5 = vector.broadcast %cst_1 : f32 to vector<48x256xf32>
    %6 = arith.select %3, %4, %5 : vector<48x256xi1>, vector<48x256xf32>
    %7 = arith.truncf %6 : vector<48x256xf32> to vector<48x256xbf16>
    %c0_2 = arith.constant 0 : index
    %c0_3 = arith.constant 0 : index
    %8 = vector.load %arg5[%c0_2, %c0_3] : memref<256x64xbf16, #tpu.memory_space<vmem>>, vector<256x64xbf16>
    %cst_4 = arith.constant dense<0.000000e+00> : vector<48x64xf32>
    %9 = tpu.matmul %7, %8, %cst_4 {dimension_numbers = #tpu.dot_dimension_numbers<[1], [0], [0], [1], [0, 0, 1, 1], [], []>} : vector<48x256xbf16>, vector<256x64xbf16>, vector<48x64xf32> -> vector<48x64xf32>
    %c0_5 = arith.constant 0 : index
    %c0_6 = arith.constant 0 : index
    %10 = vector.load %arg2[%c0_5, %c0_6] : memref<48x64xf32, #tpu.memory_space<vmem>>, vector<48x64xf32>
    %c0_7 = arith.constant 0 : index
    %c0_8 = arith.constant 0 : index
    %11 = vector.load %arg3[%c0_7, %c0_8] : memref<48x64xf32, #tpu.memory_space<vmem>>, vector<48x64xf32>
    %c0_9 = arith.constant 0 : index
    %c0_10 = arith.constant 0 : index
    %12 = vector.load %arg4[%c0_9, %c0_10] : memref<64x64xbf16, #tpu.memory_space<vmem>>, vector<64x64xbf16>
    %13 = tpu.iota {dimensions = array<i32: 1>} : vector<2x24x24xi32>
    %14 = tpu.iota {dimensions = array<i32: 2>} : vector<2x24x24xi32>
    %c0_11 = arith.constant 0 : index
    %c0_12 = arith.constant 0 : index
    %c0_13 = arith.constant 0 : index
    %15 = vector.load %arg6[%c0_11, %c0_12, %c0_13] : memref<2x1x64xf32, #tpu.memory_space<vmem>>, vector<1x1x64xf32>
    %16 = vector.shape_cast %15 : vector<1x1x64xf32> to vector<1x64xf32>
    %17 = arith.mulf %9, %9 : vector<48x64xf32>
    %cst_14 = arith.constant dense<0.000000e+00> : vector<48xf32>
    %18 = vector.multi_reduction <add>, %17, %cst_14 [1] : vector<48x64xf32> to vector<48xf32>
    %19 = vector.shape_cast %18 : vector<48xf32> to vector<48x1xf32>
    %cst_15 = arith.constant 6.400000e+01 : f32
    %20 = vector.broadcast %cst_15 : f32 to vector<48x1xf32>
    %21 = arith.divf %19, %20 : vector<48x1xf32>
    %cst_16 = arith.constant 9.99999997E-7 : f32
    %22 = vector.broadcast %cst_16 : f32 to vector<48x1xf32>
    %23 = arith.addf %21, %22 : vector<48x1xf32>
    %24 = math.rsqrt %23 : vector<48x1xf32>
    %25 = vector.broadcast %24 : vector<48x1xf32> to vector<48x64xf32>
    %26 = arith.mulf %9, %25 : vector<48x64xf32>
    %27 = vector.broadcast %16 : vector<1x64xf32> to vector<48x64xf32>
    %28 = arith.mulf %26, %27 : vector<48x64xf32>
    %29 = arith.truncf %28 : vector<48x64xf32> to vector<48x64xbf16>
    %c0_17 = arith.constant 0 : index
    %c0_18 = arith.constant 0 : index
    %c0_19 = arith.constant 0 : index
    %30 = vector.load %arg7[%c0_17, %c0_18, %c0_19] : memref<2x64x256xbf16, #tpu.memory_space<vmem>>, vector<1x64x256xbf16>
    %31 = vector.shape_cast %30 : vector<1x64x256xbf16> to vector<64x256xbf16>
    %cst_20 = arith.constant dense<0.000000e+00> : vector<48x256xf32>
    %32 = tpu.matmul %29, %31, %cst_20 {dimension_numbers = #tpu.dot_dimension_numbers<[1], [0], [0], [1], [0, 0, 1, 1], [], []>} : vector<48x64xbf16>, vector<64x256xbf16>, vector<48x256xf32> -> vector<48x256xf32>
    %33 = vector.extract_strided_slice %32 {offsets = [0, 0], sizes = [48, 64], strides = [1, 1]} : vector<48x256xf32> to vector<48x64xf32>
    %34 = vector.extract_strided_slice %32 {offsets = [0, 64], sizes = [48, 64], strides = [1, 1]} : vector<48x256xf32> to vector<48x64xf32>
    %35 = vector.extract_strided_slice %32 {offsets = [0, 128], sizes = [48, 64], strides = [1, 1]} : vector<48x256xf32> to vector<48x64xf32>
    %36 = arith.mulf %33, %10 : vector<48x64xf32>
    %37 = arith.truncf %33 : vector<48x64xf32> to vector<48x64xbf16>
    %cst_21 = arith.constant dense<0.000000e+00> : vector<48x64xf32>
    %38 = tpu.matmul %37, %12, %cst_21 {dimension_numbers = #tpu.dot_dimension_numbers<[1], [0], [0], [1], [0, 0, 1, 1], [], []>} : vector<48x64xbf16>, vector<64x64xbf16>, vector<48x64xf32> -> vector<48x64xf32>
    %39 = arith.mulf %38, %11 : vector<48x64xf32>
    %40 = arith.addf %36, %39 : vector<48x64xf32>
    %41 = arith.mulf %34, %10 : vector<48x64xf32>
    %42 = arith.truncf %34 : vector<48x64xf32> to vector<48x64xbf16>
    %cst_22 = arith.constant dense<0.000000e+00> : vector<48x64xf32>
    %43 = tpu.matmul %42, %12, %cst_22 {dimension_numbers = #tpu.dot_dimension_numbers<[1], [0], [0], [1], [0, 0, 1, 1], [], []>} : vector<48x64xbf16>, vector<64x64xbf16>, vector<48x64xf32> -> vector<48x64xf32>
    %44 = arith.mulf %43, %11 : vector<48x64xf32>
    %45 = arith.addf %41, %44 : vector<48x64xf32>
    %46 = vector.shape_cast %40 : vector<48x64xf32> to vector<2x24x64xf32>
    %47 = vector.shape_cast %45 : vector<48x64xf32> to vector<2x24x64xf32>
    %48 = vector.shape_cast %35 : vector<48x64xf32> to vector<2x24x64xf32>
    %c0_23 = arith.constant 0 : index
    %c0_24 = arith.constant 0 : index
    %c0_25 = arith.constant 0 : index
    %49 = vector.load %arg8[%c0_23, %c0_24, %c0_25] : memref<2x64x64xbf16, #tpu.memory_space<vmem>>, vector<1x64x64xbf16>
    %50 = vector.shape_cast %49 : vector<1x64x64xbf16> to vector<64x64xbf16>
    %cst_26 = arith.constant 0.000000e+00 : f32
    %51 = vector.broadcast %cst_26 : f32 to vector<48x64xf32>
    %52 = vector.extract_strided_slice %46 {offsets = [0, 0, 0], sizes = [2, 24, 16], strides = [1, 1, 1]} : vector<2x24x64xf32> to vector<2x24x16xf32>
    %53 = arith.truncf %52 : vector<2x24x16xf32> to vector<2x24x16xbf16>
    %54 = vector.extract_strided_slice %47 {offsets = [0, 0, 0], sizes = [2, 24, 16], strides = [1, 1, 1]} : vector<2x24x64xf32> to vector<2x24x16xf32>
    %55 = arith.truncf %54 : vector<2x24x16xf32> to vector<2x24x16xbf16>
    %56 = vector.extract_strided_slice %48 {offsets = [0, 0, 0], sizes = [2, 24, 16], strides = [1, 1, 1]} : vector<2x24x64xf32> to vector<2x24x16xf32>
    %57 = arith.truncf %56 : vector<2x24x16xf32> to vector<2x24x16xbf16>
    "tpu.trace_start"() <{level = 10 : i32, message = "bqd,bkd->bqk"}> : () -> ()
    %cst_27 = arith.constant dense<0.000000e+00> : vector<2x24x24xf32>
    %58 = tpu.matmul %53, %55, %cst_27 {dimension_numbers = #tpu.dot_dimension_numbers<[2], [2], [1], [1], [0, 0, 0, 1, 1, 1], [0], [0]>} : vector<2x24x16xbf16>, vector<2x24x16xbf16>, vector<2x24x24xf32> -> vector<2x24x24xf32>
    "tpu.trace_stop"() : () -> ()
    %cst_28 = arith.constant 2.500000e-01 : f32
    %59 = vector.broadcast %cst_28 : f32 to vector<2x24x24xf32>
    %60 = arith.mulf %58, %59 : vector<2x24x24xf32>
    %61 = arith.cmpi sle, %14, %13 : vector<2x24x24xi32>
    %cst_29 = arith.constant -1.000000e+30 : f32
    %62 = vector.broadcast %cst_29 : f32 to vector<2x24x24xf32>
    %63 = arith.select %61, %60, %62 : vector<2x24x24xi1>, vector<2x24x24xf32>
    %cst_30 = arith.constant dense<0xFF800000> : vector<2x24xf32>
    %64 = vector.multi_reduction <maximumf>, %63, %cst_30 [2] : vector<2x24x24xf32> to vector<2x24xf32>
    %65 = vector.shape_cast %64 : vector<2x24xf32> to vector<2x24x1xf32>
    %66 = vector.broadcast %65 : vector<2x24x1xf32> to vector<2x24x24xf32>
    %67 = arith.subf %63, %66 : vector<2x24x24xf32>
    %68 = math.exp %67 : vector<2x24x24xf32>
    %cst_31 = arith.constant dense<0.000000e+00> : vector<2x24xf32>
    %69 = vector.multi_reduction <add>, %68, %cst_31 [2] : vector<2x24x24xf32> to vector<2x24xf32>
    %70 = vector.shape_cast %69 : vector<2x24xf32> to vector<2x24x1xf32>
    %71 = tpu.reciprocal %70 {approx = true} : vector<2x24x1xf32> -> vector<2x24x1xf32>
    %72 = vector.broadcast %71 : vector<2x24x1xf32> to vector<2x24x24xf32>
    %73 = arith.mulf %68, %72 : vector<2x24x24xf32>
    %74 = arith.truncf %73 : vector<2x24x24xf32> to vector<2x24x24xbf16>
    "tpu.trace_start"() <{level = 10 : i32, message = "bqk,bkd->bqd"}> : () -> ()
    %cst_32 = arith.constant dense<0.000000e+00> : vector<2x24x16xf32>
    %75 = tpu.matmul %74, %57, %cst_32 {dimension_numbers = #tpu.dot_dimension_numbers<[2], [1], [1], [2], [0, 0, 0, 1, 1, 2], [0], [0]>} : vector<2x24x24xbf16>, vector<2x24x16xbf16>, vector<2x24x16xf32> -> vector<2x24x16xf32>
    "tpu.trace_stop"() : () -> ()
    %76 = vector.shape_cast %75 : vector<2x24x16xf32> to vector<48x16xf32>
    %77 = arith.truncf %76 : vector<48x16xf32> to vector<48x16xbf16>
    %78 = vector.extract_strided_slice %50 {offsets = [0, 0], sizes = [16, 64], strides = [1, 1]} : vector<64x64xbf16> to vector<16x64xbf16>
    %cst_33 = arith.constant dense<0.000000e+00> : vector<48x64xf32>
    %79 = tpu.matmul %77, %78, %cst_33 {dimension_numbers = #tpu.dot_dimension_numbers<[1], [0], [0], [1], [0, 0, 1, 1], [], []>} : vector<48x16xbf16>, vector<16x64xbf16>, vector<48x64xf32> -> vector<48x64xf32>
    %80 = arith.addf %51, %79 : vector<48x64xf32>
    %81 = vector.extract_strided_slice %46 {offsets = [0, 0, 16], sizes = [2, 24, 16], strides = [1, 1, 1]} : vector<2x24x64xf32> to vector<2x24x16xf32>
    %82 = arith.truncf %81 : vector<2x24x16xf32> to vector<2x24x16xbf16>
    %83 = vector.extract_strided_slice %47 {offsets = [0, 0, 16], sizes = [2, 24, 16], strides = [1, 1, 1]} : vector<2x24x64xf32> to vector<2x24x16xf32>
    %84 = arith.truncf %83 : vector<2x24x16xf32> to vector<2x24x16xbf16>
    %85 = vector.extract_strided_slice %48 {offsets = [0, 0, 16], sizes = [2, 24, 16], strides = [1, 1, 1]} : vector<2x24x64xf32> to vector<2x24x16xf32>
    %86 = arith.truncf %85 : vector<2x24x16xf32> to vector<2x24x16xbf16>
    "tpu.trace_start"() <{level = 10 : i32, message = "bqd,bkd->bqk"}> : () -> ()
    %cst_34 = arith.constant dense<0.000000e+00> : vector<2x24x24xf32>
    %87 = tpu.matmul %82, %84, %cst_34 {dimension_numbers = #tpu.dot_dimension_numbers<[2], [2], [1], [1], [0, 0, 0, 1, 1, 1], [0], [0]>} : vector<2x24x16xbf16>, vector<2x24x16xbf16>, vector<2x24x24xf32> -> vector<2x24x24xf32>
    "tpu.trace_stop"() : () -> ()
    %cst_35 = arith.constant 2.500000e-01 : f32
    %88 = vector.broadcast %cst_35 : f32 to vector<2x24x24xf32>
    %89 = arith.mulf %87, %88 : vector<2x24x24xf32>
    %90 = arith.cmpi sle, %14, %13 : vector<2x24x24xi32>
    %cst_36 = arith.constant -1.000000e+30 : f32
    %91 = vector.broadcast %cst_36 : f32 to vector<2x24x24xf32>
    %92 = arith.select %90, %89, %91 : vector<2x24x24xi1>, vector<2x24x24xf32>
    %cst_37 = arith.constant dense<0xFF800000> : vector<2x24xf32>
    %93 = vector.multi_reduction <maximumf>, %92, %cst_37 [2] : vector<2x24x24xf32> to vector<2x24xf32>
    %94 = vector.shape_cast %93 : vector<2x24xf32> to vector<2x24x1xf32>
    %95 = vector.broadcast %94 : vector<2x24x1xf32> to vector<2x24x24xf32>
    %96 = arith.subf %92, %95 : vector<2x24x24xf32>
    %97 = math.exp %96 : vector<2x24x24xf32>
    %cst_38 = arith.constant dense<0.000000e+00> : vector<2x24xf32>
    %98 = vector.multi_reduction <add>, %97, %cst_38 [2] : vector<2x24x24xf32> to vector<2x24xf32>
    %99 = vector.shape_cast %98 : vector<2x24xf32> to vector<2x24x1xf32>
    %100 = tpu.reciprocal %99 {approx = true} : vector<2x24x1xf32> -> vector<2x24x1xf32>
    %101 = vector.broadcast %100 : vector<2x24x1xf32> to vector<2x24x24xf32>
    %102 = arith.mulf %97, %101 : vector<2x24x24xf32>
    %103 = arith.truncf %102 : vector<2x24x24xf32> to vector<2x24x24xbf16>
    "tpu.trace_start"() <{level = 10 : i32, message = "bqk,bkd->bqd"}> : () -> ()
    %cst_39 = arith.constant dense<0.000000e+00> : vector<2x24x16xf32>
    %104 = tpu.matmul %103, %86, %cst_39 {dimension_numbers = #tpu.dot_dimension_numbers<[2], [1], [1], [2], [0, 0, 0, 1, 1, 2], [0], [0]>} : vector<2x24x24xbf16>, vector<2x24x16xbf16>, vector<2x24x16xf32> -> vector<2x24x16xf32>
    "tpu.trace_stop"() : () -> ()
    %105 = vector.shape_cast %104 : vector<2x24x16xf32> to vector<48x16xf32>
    %106 = arith.truncf %105 : vector<48x16xf32> to vector<48x16xbf16>
    %107 = vector.extract_strided_slice %50 {offsets = [16, 0], sizes = [16, 64], strides = [1, 1]} : vector<64x64xbf16> to vector<16x64xbf16>
    %cst_40 = arith.constant dense<0.000000e+00> : vector<48x64xf32>
    %108 = tpu.matmul %106, %107, %cst_40 {dimension_numbers = #tpu.dot_dimension_numbers<[1], [0], [0], [1], [0, 0, 1, 1], [], []>} : vector<48x16xbf16>, vector<16x64xbf16>, vector<48x64xf32> -> vector<48x64xf32>
    %109 = arith.addf %80, %108 : vector<48x64xf32>
    %110 = vector.extract_strided_slice %46 {offsets = [0, 0, 32], sizes = [2, 24, 16], strides = [1, 1, 1]} : vector<2x24x64xf32> to vector<2x24x16xf32>
    %111 = arith.truncf %110 : vector<2x24x16xf32> to vector<2x24x16xbf16>
    %112 = vector.extract_strided_slice %47 {offsets = [0, 0, 32], sizes = [2, 24, 16], strides = [1, 1, 1]} : vector<2x24x64xf32> to vector<2x24x16xf32>
    %113 = arith.truncf %112 : vector<2x24x16xf32> to vector<2x24x16xbf16>
    %114 = vector.extract_strided_slice %48 {offsets = [0, 0, 32], sizes = [2, 24, 16], strides = [1, 1, 1]} : vector<2x24x64xf32> to vector<2x24x16xf32>
    %115 = arith.truncf %114 : vector<2x24x16xf32> to vector<2x24x16xbf16>
    "tpu.trace_start"() <{level = 10 : i32, message = "bqd,bkd->bqk"}> : () -> ()
    %cst_41 = arith.constant dense<0.000000e+00> : vector<2x24x24xf32>
    %116 = tpu.matmul %111, %113, %cst_41 {dimension_numbers = #tpu.dot_dimension_numbers<[2], [2], [1], [1], [0, 0, 0, 1, 1, 1], [0], [0]>} : vector<2x24x16xbf16>, vector<2x24x16xbf16>, vector<2x24x24xf32> -> vector<2x24x24xf32>
    "tpu.trace_stop"() : () -> ()
    %cst_42 = arith.constant 2.500000e-01 : f32
    %117 = vector.broadcast %cst_42 : f32 to vector<2x24x24xf32>
    %118 = arith.mulf %116, %117 : vector<2x24x24xf32>
    %119 = arith.cmpi sle, %14, %13 : vector<2x24x24xi32>
    %cst_43 = arith.constant -1.000000e+30 : f32
    %120 = vector.broadcast %cst_43 : f32 to vector<2x24x24xf32>
    %121 = arith.select %119, %118, %120 : vector<2x24x24xi1>, vector<2x24x24xf32>
    %cst_44 = arith.constant dense<0xFF800000> : vector<2x24xf32>
    %122 = vector.multi_reduction <maximumf>, %121, %cst_44 [2] : vector<2x24x24xf32> to vector<2x24xf32>
    %123 = vector.shape_cast %122 : vector<2x24xf32> to vector<2x24x1xf32>
    %124 = vector.broadcast %123 : vector<2x24x1xf32> to vector<2x24x24xf32>
    %125 = arith.subf %121, %124 : vector<2x24x24xf32>
    %126 = math.exp %125 : vector<2x24x24xf32>
    %cst_45 = arith.constant dense<0.000000e+00> : vector<2x24xf32>
    %127 = vector.multi_reduction <add>, %126, %cst_45 [2] : vector<2x24x24xf32> to vector<2x24xf32>
    %128 = vector.shape_cast %127 : vector<2x24xf32> to vector<2x24x1xf32>
    %129 = tpu.reciprocal %128 {approx = true} : vector<2x24x1xf32> -> vector<2x24x1xf32>
    %130 = vector.broadcast %129 : vector<2x24x1xf32> to vector<2x24x24xf32>
    %131 = arith.mulf %126, %130 : vector<2x24x24xf32>
    %132 = arith.truncf %131 : vector<2x24x24xf32> to vector<2x24x24xbf16>
    "tpu.trace_start"() <{level = 10 : i32, message = "bqk,bkd->bqd"}> : () -> ()
    %cst_46 = arith.constant dense<0.000000e+00> : vector<2x24x16xf32>
    %133 = tpu.matmul %132, %115, %cst_46 {dimension_numbers = #tpu.dot_dimension_numbers<[2], [1], [1], [2], [0, 0, 0, 1, 1, 2], [0], [0]>} : vector<2x24x24xbf16>, vector<2x24x16xbf16>, vector<2x24x16xf32> -> vector<2x24x16xf32>
    "tpu.trace_stop"() : () -> ()
    %134 = vector.shape_cast %133 : vector<2x24x16xf32> to vector<48x16xf32>
    %135 = arith.truncf %134 : vector<48x16xf32> to vector<48x16xbf16>
    %136 = vector.extract_strided_slice %50 {offsets = [32, 0], sizes = [16, 64], strides = [1, 1]} : vector<64x64xbf16> to vector<16x64xbf16>
    %cst_47 = arith.constant dense<0.000000e+00> : vector<48x64xf32>
    %137 = tpu.matmul %135, %136, %cst_47 {dimension_numbers = #tpu.dot_dimension_numbers<[1], [0], [0], [1], [0, 0, 1, 1], [], []>} : vector<48x16xbf16>, vector<16x64xbf16>, vector<48x64xf32> -> vector<48x64xf32>
    %138 = arith.addf %109, %137 : vector<48x64xf32>
    %139 = vector.extract_strided_slice %46 {offsets = [0, 0, 48], sizes = [2, 24, 16], strides = [1, 1, 1]} : vector<2x24x64xf32> to vector<2x24x16xf32>
    %140 = arith.truncf %139 : vector<2x24x16xf32> to vector<2x24x16xbf16>
    %141 = vector.extract_strided_slice %47 {offsets = [0, 0, 48], sizes = [2, 24, 16], strides = [1, 1, 1]} : vector<2x24x64xf32> to vector<2x24x16xf32>
    %142 = arith.truncf %141 : vector<2x24x16xf32> to vector<2x24x16xbf16>
    %143 = vector.extract_strided_slice %48 {offsets = [0, 0, 48], sizes = [2, 24, 16], strides = [1, 1, 1]} : vector<2x24x64xf32> to vector<2x24x16xf32>
    %144 = arith.truncf %143 : vector<2x24x16xf32> to vector<2x24x16xbf16>
    "tpu.trace_start"() <{level = 10 : i32, message = "bqd,bkd->bqk"}> : () -> ()
    %cst_48 = arith.constant dense<0.000000e+00> : vector<2x24x24xf32>
    %145 = tpu.matmul %140, %142, %cst_48 {dimension_numbers = #tpu.dot_dimension_numbers<[2], [2], [1], [1], [0, 0, 0, 1, 1, 1], [0], [0]>} : vector<2x24x16xbf16>, vector<2x24x16xbf16>, vector<2x24x24xf32> -> vector<2x24x24xf32>
    "tpu.trace_stop"() : () -> ()
    %cst_49 = arith.constant 2.500000e-01 : f32
    %146 = vector.broadcast %cst_49 : f32 to vector<2x24x24xf32>
    %147 = arith.mulf %145, %146 : vector<2x24x24xf32>
    %148 = arith.cmpi sle, %14, %13 : vector<2x24x24xi32>
    %cst_50 = arith.constant -1.000000e+30 : f32
    %149 = vector.broadcast %cst_50 : f32 to vector<2x24x24xf32>
    %150 = arith.select %148, %147, %149 : vector<2x24x24xi1>, vector<2x24x24xf32>
    %cst_51 = arith.constant dense<0xFF800000> : vector<2x24xf32>
    %151 = vector.multi_reduction <maximumf>, %150, %cst_51 [2] : vector<2x24x24xf32> to vector<2x24xf32>
    %152 = vector.shape_cast %151 : vector<2x24xf32> to vector<2x24x1xf32>
    %153 = vector.broadcast %152 : vector<2x24x1xf32> to vector<2x24x24xf32>
    %154 = arith.subf %150, %153 : vector<2x24x24xf32>
    %155 = math.exp %154 : vector<2x24x24xf32>
    %cst_52 = arith.constant dense<0.000000e+00> : vector<2x24xf32>
    %156 = vector.multi_reduction <add>, %155, %cst_52 [2] : vector<2x24x24xf32> to vector<2x24xf32>
    %157 = vector.shape_cast %156 : vector<2x24xf32> to vector<2x24x1xf32>
    %158 = tpu.reciprocal %157 {approx = true} : vector<2x24x1xf32> -> vector<2x24x1xf32>
    %159 = vector.broadcast %158 : vector<2x24x1xf32> to vector<2x24x24xf32>
    %160 = arith.mulf %155, %159 : vector<2x24x24xf32>
    %161 = arith.truncf %160 : vector<2x24x24xf32> to vector<2x24x24xbf16>
    "tpu.trace_start"() <{level = 10 : i32, message = "bqk,bkd->bqd"}> : () -> ()
    %cst_53 = arith.constant dense<0.000000e+00> : vector<2x24x16xf32>
    %162 = tpu.matmul %161, %144, %cst_53 {dimension_numbers = #tpu.dot_dimension_numbers<[2], [1], [1], [2], [0, 0, 0, 1, 1, 2], [0], [0]>} : vector<2x24x24xbf16>, vector<2x24x16xbf16>, vector<2x24x16xf32> -> vector<2x24x16xf32>
    "tpu.trace_stop"() : () -> ()
    %163 = vector.shape_cast %162 : vector<2x24x16xf32> to vector<48x16xf32>
    %164 = arith.truncf %163 : vector<48x16xf32> to vector<48x16xbf16>
    %165 = vector.extract_strided_slice %50 {offsets = [48, 0], sizes = [16, 64], strides = [1, 1]} : vector<64x64xbf16> to vector<16x64xbf16>
    %cst_54 = arith.constant dense<0.000000e+00> : vector<48x64xf32>
    %166 = tpu.matmul %164, %165, %cst_54 {dimension_numbers = #tpu.dot_dimension_numbers<[1], [0], [0], [1], [0, 0, 1, 1], [], []>} : vector<48x16xbf16>, vector<16x64xbf16>, vector<48x64xf32> -> vector<48x64xf32>
    %167 = arith.addf %138, %166 : vector<48x64xf32>
    %168 = arith.addf %9, %167 : vector<48x64xf32>
    %c0_55 = arith.constant 0 : index
    %c0_56 = arith.constant 0 : index
    %c0_57 = arith.constant 0 : index
    %169 = vector.load %arg9[%c0_55, %c0_56, %c0_57] : memref<2x1x64xf32, #tpu.memory_space<vmem>>, vector<1x1x64xf32>
    %170 = vector.shape_cast %169 : vector<1x1x64xf32> to vector<1x64xf32>
    %171 = arith.mulf %168, %168 : vector<48x64xf32>
    %cst_58 = arith.constant dense<0.000000e+00> : vector<48xf32>
    %172 = vector.multi_reduction <add>, %171, %cst_58 [1] : vector<48x64xf32> to vector<48xf32>
    %173 = vector.shape_cast %172 : vector<48xf32> to vector<48x1xf32>
    %cst_59 = arith.constant 6.400000e+01 : f32
    %174 = vector.broadcast %cst_59 : f32 to vector<48x1xf32>
    %175 = arith.divf %173, %174 : vector<48x1xf32>
    %cst_60 = arith.constant 9.99999997E-7 : f32
    %176 = vector.broadcast %cst_60 : f32 to vector<48x1xf32>
    %177 = arith.addf %175, %176 : vector<48x1xf32>
    %178 = math.rsqrt %177 : vector<48x1xf32>
    %179 = vector.broadcast %178 : vector<48x1xf32> to vector<48x64xf32>
    %180 = arith.mulf %168, %179 : vector<48x64xf32>
    %181 = vector.broadcast %170 : vector<1x64xf32> to vector<48x64xf32>
    %182 = arith.mulf %180, %181 : vector<48x64xf32>
    %183 = arith.truncf %182 : vector<48x64xf32> to vector<48x64xbf16>
    %c0_61 = arith.constant 0 : index
    %c0_62 = arith.constant 0 : index
    %c0_63 = arith.constant 0 : index
    %184 = vector.load %arg10[%c0_61, %c0_62, %c0_63] : memref<2x64x256xbf16, #tpu.memory_space<vmem>>, vector<1x64x256xbf16>
    %185 = vector.shape_cast %184 : vector<1x64x256xbf16> to vector<64x256xbf16>
    %cst_64 = arith.constant dense<0.000000e+00> : vector<48x256xf32>
    %186 = tpu.matmul %183, %185, %cst_64 {dimension_numbers = #tpu.dot_dimension_numbers<[1], [0], [0], [1], [0, 0, 1, 1], [], []>} : vector<48x64xbf16>, vector<64x256xbf16>, vector<48x256xf32> -> vector<48x256xf32>
    %187 = vector.extract_strided_slice %186 {offsets = [0, 0], sizes = [48, 128], strides = [1, 1]} : vector<48x256xf32> to vector<48x128xf32>
    %188 = vector.extract_strided_slice %186 {offsets = [0, 128], sizes = [48, 128], strides = [1, 1]} : vector<48x256xf32> to vector<48x128xf32>
    %189 = arith.negf %187 : vector<48x128xf32>
    %190 = math.exp %189 : vector<48x128xf32>
    %cst_65 = arith.constant 1.000000e+00 : f32
    %191 = vector.broadcast %cst_65 : f32 to vector<48x128xf32>
    %192 = arith.addf %191, %190 : vector<48x128xf32>
    %193 = arith.divf %191, %192 : vector<48x128xf32>
    %194 = arith.mulf %187, %193 : vector<48x128xf32>
    %195 = arith.mulf %194, %188 : vector<48x128xf32>
    %196 = arith.truncf %195 : vector<48x128xf32> to vector<48x128xbf16>
    %c0_66 = arith.constant 0 : index
    %c0_67 = arith.constant 0 : index
    %c0_68 = arith.constant 0 : index
    %197 = vector.load %arg11[%c0_66, %c0_67, %c0_68] : memref<2x128x64xbf16, #tpu.memory_space<vmem>>, vector<1x128x64xbf16>
    %198 = vector.shape_cast %197 : vector<1x128x64xbf16> to vector<128x64xbf16>
    %cst_69 = arith.constant dense<0.000000e+00> : vector<48x64xf32>
    %199 = tpu.matmul %196, %198, %cst_69 {dimension_numbers = #tpu.dot_dimension_numbers<[1], [0], [0], [1], [0, 0, 1, 1], [], []>} : vector<48x128xbf16>, vector<128x64xbf16>, vector<48x64xf32> -> vector<48x64xf32>
    %200 = arith.addf %168, %199 : vector<48x64xf32>
    %c1 = arith.constant 1 : index
    %c0_70 = arith.constant 0 : index
    %c0_71 = arith.constant 0 : index
    %201 = vector.load %arg6[%c1, %c0_70, %c0_71] : memref<2x1x64xf32, #tpu.memory_space<vmem>>, vector<1x1x64xf32>
    %202 = vector.shape_cast %201 : vector<1x1x64xf32> to vector<1x64xf32>
    %203 = arith.mulf %200, %200 : vector<48x64xf32>
    %cst_72 = arith.constant dense<0.000000e+00> : vector<48xf32>
    %204 = vector.multi_reduction <add>, %203, %cst_72 [1] : vector<48x64xf32> to vector<48xf32>
    %205 = vector.shape_cast %204 : vector<48xf32> to vector<48x1xf32>
    %cst_73 = arith.constant 6.400000e+01 : f32
    %206 = vector.broadcast %cst_73 : f32 to vector<48x1xf32>
    %207 = arith.divf %205, %206 : vector<48x1xf32>
    %cst_74 = arith.constant 9.99999997E-7 : f32
    %208 = vector.broadcast %cst_74 : f32 to vector<48x1xf32>
    %209 = arith.addf %207, %208 : vector<48x1xf32>
    %210 = math.rsqrt %209 : vector<48x1xf32>
    %211 = vector.broadcast %210 : vector<48x1xf32> to vector<48x64xf32>
    %212 = arith.mulf %200, %211 : vector<48x64xf32>
    %213 = vector.broadcast %202 : vector<1x64xf32> to vector<48x64xf32>
    %214 = arith.mulf %212, %213 : vector<48x64xf32>
    %215 = arith.truncf %214 : vector<48x64xf32> to vector<48x64xbf16>
    %c1_75 = arith.constant 1 : index
    %c0_76 = arith.constant 0 : index
    %c0_77 = arith.constant 0 : index
    %216 = vector.load %arg7[%c1_75, %c0_76, %c0_77] : memref<2x64x256xbf16, #tpu.memory_space<vmem>>, vector<1x64x256xbf16>
    %217 = vector.shape_cast %216 : vector<1x64x256xbf16> to vector<64x256xbf16>
    %cst_78 = arith.constant dense<0.000000e+00> : vector<48x256xf32>
    %218 = tpu.matmul %215, %217, %cst_78 {dimension_numbers = #tpu.dot_dimension_numbers<[1], [0], [0], [1], [0, 0, 1, 1], [], []>} : vector<48x64xbf16>, vector<64x256xbf16>, vector<48x256xf32> -> vector<48x256xf32>
    %219 = vector.extract_strided_slice %218 {offsets = [0, 0], sizes = [48, 64], strides = [1, 1]} : vector<48x256xf32> to vector<48x64xf32>
    %220 = vector.extract_strided_slice %218 {offsets = [0, 64], sizes = [48, 64], strides = [1, 1]} : vector<48x256xf32> to vector<48x64xf32>
    %221 = vector.extract_strided_slice %218 {offsets = [0, 128], sizes = [48, 64], strides = [1, 1]} : vector<48x256xf32> to vector<48x64xf32>
    %222 = arith.mulf %219, %10 : vector<48x64xf32>
    %223 = arith.truncf %219 : vector<48x64xf32> to vector<48x64xbf16>
    %cst_79 = arith.constant dense<0.000000e+00> : vector<48x64xf32>
    %224 = tpu.matmul %223, %12, %cst_79 {dimension_numbers = #tpu.dot_dimension_numbers<[1], [0], [0], [1], [0, 0, 1, 1], [], []>} : vector<48x64xbf16>, vector<64x64xbf16>, vector<48x64xf32> -> vector<48x64xf32>
    %225 = arith.mulf %224, %11 : vector<48x64xf32>
    %226 = arith.addf %222, %225 : vector<48x64xf32>
    %227 = arith.mulf %220, %10 : vector<48x64xf32>
    %228 = arith.truncf %220 : vector<48x64xf32> to vector<48x64xbf16>
    %cst_80 = arith.constant dense<0.000000e+00> : vector<48x64xf32>
    %229 = tpu.matmul %228, %12, %cst_80 {dimension_numbers = #tpu.dot_dimension_numbers<[1], [0], [0], [1], [0, 0, 1, 1], [], []>} : vector<48x64xbf16>, vector<64x64xbf16>, vector<48x64xf32> -> vector<48x64xf32>
    %230 = arith.mulf %229, %11 : vector<48x64xf32>
    %231 = arith.addf %227, %230 : vector<48x64xf32>
    %232 = vector.shape_cast %226 : vector<48x64xf32> to vector<2x24x64xf32>
    %233 = vector.shape_cast %231 : vector<48x64xf32> to vector<2x24x64xf32>
    %234 = vector.shape_cast %221 : vector<48x64xf32> to vector<2x24x64xf32>
    %c1_81 = arith.constant 1 : index
    %c0_82 = arith.constant 0 : index
    %c0_83 = arith.constant 0 : index
    %235 = vector.load %arg8[%c1_81, %c0_82, %c0_83] : memref<2x64x64xbf16, #tpu.memory_space<vmem>>, vector<1x64x64xbf16>
    %236 = vector.shape_cast %235 : vector<1x64x64xbf16> to vector<64x64xbf16>
    %cst_84 = arith.constant 0.000000e+00 : f32
    %237 = vector.broadcast %cst_84 : f32 to vector<48x64xf32>
    %238 = vector.extract_strided_slice %232 {offsets = [0, 0, 0], sizes = [2, 24, 16], strides = [1, 1, 1]} : vector<2x24x64xf32> to vector<2x24x16xf32>
    %239 = arith.truncf %238 : vector<2x24x16xf32> to vector<2x24x16xbf16>
    %240 = vector.extract_strided_slice %233 {offsets = [0, 0, 0], sizes = [2, 24, 16], strides = [1, 1, 1]} : vector<2x24x64xf32> to vector<2x24x16xf32>
    %241 = arith.truncf %240 : vector<2x24x16xf32> to vector<2x24x16xbf16>
    %242 = vector.extract_strided_slice %234 {offsets = [0, 0, 0], sizes = [2, 24, 16], strides = [1, 1, 1]} : vector<2x24x64xf32> to vector<2x24x16xf32>
    %243 = arith.truncf %242 : vector<2x24x16xf32> to vector<2x24x16xbf16>
    "tpu.trace_start"() <{level = 10 : i32, message = "bqd,bkd->bqk"}> : () -> ()
    %cst_85 = arith.constant dense<0.000000e+00> : vector<2x24x24xf32>
    %244 = tpu.matmul %239, %241, %cst_85 {dimension_numbers = #tpu.dot_dimension_numbers<[2], [2], [1], [1], [0, 0, 0, 1, 1, 1], [0], [0]>} : vector<2x24x16xbf16>, vector<2x24x16xbf16>, vector<2x24x24xf32> -> vector<2x24x24xf32>
    "tpu.trace_stop"() : () -> ()
    %cst_86 = arith.constant 2.500000e-01 : f32
    %245 = vector.broadcast %cst_86 : f32 to vector<2x24x24xf32>
    %246 = arith.mulf %244, %245 : vector<2x24x24xf32>
    %247 = arith.cmpi sle, %14, %13 : vector<2x24x24xi32>
    %cst_87 = arith.constant -1.000000e+30 : f32
    %248 = vector.broadcast %cst_87 : f32 to vector<2x24x24xf32>
    %249 = arith.select %247, %246, %248 : vector<2x24x24xi1>, vector<2x24x24xf32>
    %cst_88 = arith.constant dense<0xFF800000> : vector<2x24xf32>
    %250 = vector.multi_reduction <maximumf>, %249, %cst_88 [2] : vector<2x24x24xf32> to vector<2x24xf32>
    %251 = vector.shape_cast %250 : vector<2x24xf32> to vector<2x24x1xf32>
    %252 = vector.broadcast %251 : vector<2x24x1xf32> to vector<2x24x24xf32>
    %253 = arith.subf %249, %252 : vector<2x24x24xf32>
    %254 = math.exp %253 : vector<2x24x24xf32>
    %cst_89 = arith.constant dense<0.000000e+00> : vector<2x24xf32>
    %255 = vector.multi_reduction <add>, %254, %cst_89 [2] : vector<2x24x24xf32> to vector<2x24xf32>
    %256 = vector.shape_cast %255 : vector<2x24xf32> to vector<2x24x1xf32>
    %257 = tpu.reciprocal %256 {approx = true} : vector<2x24x1xf32> -> vector<2x24x1xf32>
    %258 = vector.broadcast %257 : vector<2x24x1xf32> to vector<2x24x24xf32>
    %259 = arith.mulf %254, %258 : vector<2x24x24xf32>
    %260 = arith.truncf %259 : vector<2x24x24xf32> to vector<2x24x24xbf16>
    "tpu.trace_start"() <{level = 10 : i32, message = "bqk,bkd->bqd"}> : () -> ()
    %cst_90 = arith.constant dense<0.000000e+00> : vector<2x24x16xf32>
    %261 = tpu.matmul %260, %243, %cst_90 {dimension_numbers = #tpu.dot_dimension_numbers<[2], [1], [1], [2], [0, 0, 0, 1, 1, 2], [0], [0]>} : vector<2x24x24xbf16>, vector<2x24x16xbf16>, vector<2x24x16xf32> -> vector<2x24x16xf32>
    "tpu.trace_stop"() : () -> ()
    %262 = vector.shape_cast %261 : vector<2x24x16xf32> to vector<48x16xf32>
    %263 = arith.truncf %262 : vector<48x16xf32> to vector<48x16xbf16>
    %264 = vector.extract_strided_slice %236 {offsets = [0, 0], sizes = [16, 64], strides = [1, 1]} : vector<64x64xbf16> to vector<16x64xbf16>
    %cst_91 = arith.constant dense<0.000000e+00> : vector<48x64xf32>
    %265 = tpu.matmul %263, %264, %cst_91 {dimension_numbers = #tpu.dot_dimension_numbers<[1], [0], [0], [1], [0, 0, 1, 1], [], []>} : vector<48x16xbf16>, vector<16x64xbf16>, vector<48x64xf32> -> vector<48x64xf32>
    %266 = arith.addf %237, %265 : vector<48x64xf32>
    %267 = vector.extract_strided_slice %232 {offsets = [0, 0, 16], sizes = [2, 24, 16], strides = [1, 1, 1]} : vector<2x24x64xf32> to vector<2x24x16xf32>
    %268 = arith.truncf %267 : vector<2x24x16xf32> to vector<2x24x16xbf16>
    %269 = vector.extract_strided_slice %233 {offsets = [0, 0, 16], sizes = [2, 24, 16], strides = [1, 1, 1]} : vector<2x24x64xf32> to vector<2x24x16xf32>
    %270 = arith.truncf %269 : vector<2x24x16xf32> to vector<2x24x16xbf16>
    %271 = vector.extract_strided_slice %234 {offsets = [0, 0, 16], sizes = [2, 24, 16], strides = [1, 1, 1]} : vector<2x24x64xf32> to vector<2x24x16xf32>
    %272 = arith.truncf %271 : vector<2x24x16xf32> to vector<2x24x16xbf16>
    "tpu.trace_start"() <{level = 10 : i32, message = "bqd,bkd->bqk"}> : () -> ()
    %cst_92 = arith.constant dense<0.000000e+00> : vector<2x24x24xf32>
    %273 = tpu.matmul %268, %270, %cst_92 {dimension_numbers = #tpu.dot_dimension_numbers<[2], [2], [1], [1], [0, 0, 0, 1, 1, 1], [0], [0]>} : vector<2x24x16xbf16>, vector<2x24x16xbf16>, vector<2x24x24xf32> -> vector<2x24x24xf32>
    "tpu.trace_stop"() : () -> ()
    %cst_93 = arith.constant 2.500000e-01 : f32
    %274 = vector.broadcast %cst_93 : f32 to vector<2x24x24xf32>
    %275 = arith.mulf %273, %274 : vector<2x24x24xf32>
    %276 = arith.cmpi sle, %14, %13 : vector<2x24x24xi32>
    %cst_94 = arith.constant -1.000000e+30 : f32
    %277 = vector.broadcast %cst_94 : f32 to vector<2x24x24xf32>
    %278 = arith.select %276, %275, %277 : vector<2x24x24xi1>, vector<2x24x24xf32>
    %cst_95 = arith.constant dense<0xFF800000> : vector<2x24xf32>
    %279 = vector.multi_reduction <maximumf>, %278, %cst_95 [2] : vector<2x24x24xf32> to vector<2x24xf32>
    %280 = vector.shape_cast %279 : vector<2x24xf32> to vector<2x24x1xf32>
    %281 = vector.broadcast %280 : vector<2x24x1xf32> to vector<2x24x24xf32>
    %282 = arith.subf %278, %281 : vector<2x24x24xf32>
    %283 = math.exp %282 : vector<2x24x24xf32>
    %cst_96 = arith.constant dense<0.000000e+00> : vector<2x24xf32>
    %284 = vector.multi_reduction <add>, %283, %cst_96 [2] : vector<2x24x24xf32> to vector<2x24xf32>
    %285 = vector.shape_cast %284 : vector<2x24xf32> to vector<2x24x1xf32>
    %286 = tpu.reciprocal %285 {approx = true} : vector<2x24x1xf32> -> vector<2x24x1xf32>
    %287 = vector.broadcast %286 : vector<2x24x1xf32> to vector<2x24x24xf32>
    %288 = arith.mulf %283, %287 : vector<2x24x24xf32>
    %289 = arith.truncf %288 : vector<2x24x24xf32> to vector<2x24x24xbf16>
    "tpu.trace_start"() <{level = 10 : i32, message = "bqk,bkd->bqd"}> : () -> ()
    %cst_97 = arith.constant dense<0.000000e+00> : vector<2x24x16xf32>
    %290 = tpu.matmul %289, %272, %cst_97 {dimension_numbers = #tpu.dot_dimension_numbers<[2], [1], [1], [2], [0, 0, 0, 1, 1, 2], [0], [0]>} : vector<2x24x24xbf16>, vector<2x24x16xbf16>, vector<2x24x16xf32> -> vector<2x24x16xf32>
    "tpu.trace_stop"() : () -> ()
    %291 = vector.shape_cast %290 : vector<2x24x16xf32> to vector<48x16xf32>
    %292 = arith.truncf %291 : vector<48x16xf32> to vector<48x16xbf16>
    %293 = vector.extract_strided_slice %236 {offsets = [16, 0], sizes = [16, 64], strides = [1, 1]} : vector<64x64xbf16> to vector<16x64xbf16>
    %cst_98 = arith.constant dense<0.000000e+00> : vector<48x64xf32>
    %294 = tpu.matmul %292, %293, %cst_98 {dimension_numbers = #tpu.dot_dimension_numbers<[1], [0], [0], [1], [0, 0, 1, 1], [], []>} : vector<48x16xbf16>, vector<16x64xbf16>, vector<48x64xf32> -> vector<48x64xf32>
    %295 = arith.addf %266, %294 : vector<48x64xf32>
    %296 = vector.extract_strided_slice %232 {offsets = [0, 0, 32], sizes = [2, 24, 16], strides = [1, 1, 1]} : vector<2x24x64xf32> to vector<2x24x16xf32>
    %297 = arith.truncf %296 : vector<2x24x16xf32> to vector<2x24x16xbf16>
    %298 = vector.extract_strided_slice %233 {offsets = [0, 0, 32], sizes = [2, 24, 16], strides = [1, 1, 1]} : vector<2x24x64xf32> to vector<2x24x16xf32>
    %299 = arith.truncf %298 : vector<2x24x16xf32> to vector<2x24x16xbf16>
    %300 = vector.extract_strided_slice %234 {offsets = [0, 0, 32], sizes = [2, 24, 16], strides = [1, 1, 1]} : vector<2x24x64xf32> to vector<2x24x16xf32>
    %301 = arith.truncf %300 : vector<2x24x16xf32> to vector<2x24x16xbf16>
    "tpu.trace_start"() <{level = 10 : i32, message = "bqd,bkd->bqk"}> : () -> ()
    %cst_99 = arith.constant dense<0.000000e+00> : vector<2x24x24xf32>
    %302 = tpu.matmul %297, %299, %cst_99 {dimension_numbers = #tpu.dot_dimension_numbers<[2], [2], [1], [1], [0, 0, 0, 1, 1, 1], [0], [0]>} : vector<2x24x16xbf16>, vector<2x24x16xbf16>, vector<2x24x24xf32> -> vector<2x24x24xf32>
    "tpu.trace_stop"() : () -> ()
    %cst_100 = arith.constant 2.500000e-01 : f32
    %303 = vector.broadcast %cst_100 : f32 to vector<2x24x24xf32>
    %304 = arith.mulf %302, %303 : vector<2x24x24xf32>
    %305 = arith.cmpi sle, %14, %13 : vector<2x24x24xi32>
    %cst_101 = arith.constant -1.000000e+30 : f32
    %306 = vector.broadcast %cst_101 : f32 to vector<2x24x24xf32>
    %307 = arith.select %305, %304, %306 : vector<2x24x24xi1>, vector<2x24x24xf32>
    %cst_102 = arith.constant dense<0xFF800000> : vector<2x24xf32>
    %308 = vector.multi_reduction <maximumf>, %307, %cst_102 [2] : vector<2x24x24xf32> to vector<2x24xf32>
    %309 = vector.shape_cast %308 : vector<2x24xf32> to vector<2x24x1xf32>
    %310 = vector.broadcast %309 : vector<2x24x1xf32> to vector<2x24x24xf32>
    %311 = arith.subf %307, %310 : vector<2x24x24xf32>
    %312 = math.exp %311 : vector<2x24x24xf32>
    %cst_103 = arith.constant dense<0.000000e+00> : vector<2x24xf32>
    %313 = vector.multi_reduction <add>, %312, %cst_103 [2] : vector<2x24x24xf32> to vector<2x24xf32>
    %314 = vector.shape_cast %313 : vector<2x24xf32> to vector<2x24x1xf32>
    %315 = tpu.reciprocal %314 {approx = true} : vector<2x24x1xf32> -> vector<2x24x1xf32>
    %316 = vector.broadcast %315 : vector<2x24x1xf32> to vector<2x24x24xf32>
    %317 = arith.mulf %312, %316 : vector<2x24x24xf32>
    %318 = arith.truncf %317 : vector<2x24x24xf32> to vector<2x24x24xbf16>
    "tpu.trace_start"() <{level = 10 : i32, message = "bqk,bkd->bqd"}> : () -> ()
    %cst_104 = arith.constant dense<0.000000e+00> : vector<2x24x16xf32>
    %319 = tpu.matmul %318, %301, %cst_104 {dimension_numbers = #tpu.dot_dimension_numbers<[2], [1], [1], [2], [0, 0, 0, 1, 1, 2], [0], [0]>} : vector<2x24x24xbf16>, vector<2x24x16xbf16>, vector<2x24x16xf32> -> vector<2x24x16xf32>
    "tpu.trace_stop"() : () -> ()
    %320 = vector.shape_cast %319 : vector<2x24x16xf32> to vector<48x16xf32>
    %321 = arith.truncf %320 : vector<48x16xf32> to vector<48x16xbf16>
    %322 = vector.extract_strided_slice %236 {offsets = [32, 0], sizes = [16, 64], strides = [1, 1]} : vector<64x64xbf16> to vector<16x64xbf16>
    %cst_105 = arith.constant dense<0.000000e+00> : vector<48x64xf32>
    %323 = tpu.matmul %321, %322, %cst_105 {dimension_numbers = #tpu.dot_dimension_numbers<[1], [0], [0], [1], [0, 0, 1, 1], [], []>} : vector<48x16xbf16>, vector<16x64xbf16>, vector<48x64xf32> -> vector<48x64xf32>
    %324 = arith.addf %295, %323 : vector<48x64xf32>
    %325 = vector.extract_strided_slice %232 {offsets = [0, 0, 48], sizes = [2, 24, 16], strides = [1, 1, 1]} : vector<2x24x64xf32> to vector<2x24x16xf32>
    %326 = arith.truncf %325 : vector<2x24x16xf32> to vector<2x24x16xbf16>
    %327 = vector.extract_strided_slice %233 {offsets = [0, 0, 48], sizes = [2, 24, 16], strides = [1, 1, 1]} : vector<2x24x64xf32> to vector<2x24x16xf32>
    %328 = arith.truncf %327 : vector<2x24x16xf32> to vector<2x24x16xbf16>
    %329 = vector.extract_strided_slice %234 {offsets = [0, 0, 48], sizes = [2, 24, 16], strides = [1, 1, 1]} : vector<2x24x64xf32> to vector<2x24x16xf32>
    %330 = arith.truncf %329 : vector<2x24x16xf32> to vector<2x24x16xbf16>
    "tpu.trace_start"() <{level = 10 : i32, message = "bqd,bkd->bqk"}> : () -> ()
    %cst_106 = arith.constant dense<0.000000e+00> : vector<2x24x24xf32>
    %331 = tpu.matmul %326, %328, %cst_106 {dimension_numbers = #tpu.dot_dimension_numbers<[2], [2], [1], [1], [0, 0, 0, 1, 1, 1], [0], [0]>} : vector<2x24x16xbf16>, vector<2x24x16xbf16>, vector<2x24x24xf32> -> vector<2x24x24xf32>
    "tpu.trace_stop"() : () -> ()
    %cst_107 = arith.constant 2.500000e-01 : f32
    %332 = vector.broadcast %cst_107 : f32 to vector<2x24x24xf32>
    %333 = arith.mulf %331, %332 : vector<2x24x24xf32>
    %334 = arith.cmpi sle, %14, %13 : vector<2x24x24xi32>
    %cst_108 = arith.constant -1.000000e+30 : f32
    %335 = vector.broadcast %cst_108 : f32 to vector<2x24x24xf32>
    %336 = arith.select %334, %333, %335 : vector<2x24x24xi1>, vector<2x24x24xf32>
    %cst_109 = arith.constant dense<0xFF800000> : vector<2x24xf32>
    %337 = vector.multi_reduction <maximumf>, %336, %cst_109 [2] : vector<2x24x24xf32> to vector<2x24xf32>
    %338 = vector.shape_cast %337 : vector<2x24xf32> to vector<2x24x1xf32>
    %339 = vector.broadcast %338 : vector<2x24x1xf32> to vector<2x24x24xf32>
    %340 = arith.subf %336, %339 : vector<2x24x24xf32>
    %341 = math.exp %340 : vector<2x24x24xf32>
    %cst_110 = arith.constant dense<0.000000e+00> : vector<2x24xf32>
    %342 = vector.multi_reduction <add>, %341, %cst_110 [2] : vector<2x24x24xf32> to vector<2x24xf32>
    %343 = vector.shape_cast %342 : vector<2x24xf32> to vector<2x24x1xf32>
    %344 = tpu.reciprocal %343 {approx = true} : vector<2x24x1xf32> -> vector<2x24x1xf32>
    %345 = vector.broadcast %344 : vector<2x24x1xf32> to vector<2x24x24xf32>
    %346 = arith.mulf %341, %345 : vector<2x24x24xf32>
    %347 = arith.truncf %346 : vector<2x24x24xf32> to vector<2x24x24xbf16>
    "tpu.trace_start"() <{level = 10 : i32, message = "bqk,bkd->bqd"}> : () -> ()
    %cst_111 = arith.constant dense<0.000000e+00> : vector<2x24x16xf32>
    %348 = tpu.matmul %347, %330, %cst_111 {dimension_numbers = #tpu.dot_dimension_numbers<[2], [1], [1], [2], [0, 0, 0, 1, 1, 2], [0], [0]>} : vector<2x24x24xbf16>, vector<2x24x16xbf16>, vector<2x24x16xf32> -> vector<2x24x16xf32>
    "tpu.trace_stop"() : () -> ()
    %349 = vector.shape_cast %348 : vector<2x24x16xf32> to vector<48x16xf32>
    %350 = arith.truncf %349 : vector<48x16xf32> to vector<48x16xbf16>
    %351 = vector.extract_strided_slice %236 {offsets = [48, 0], sizes = [16, 64], strides = [1, 1]} : vector<64x64xbf16> to vector<16x64xbf16>
    %cst_112 = arith.constant dense<0.000000e+00> : vector<48x64xf32>
    %352 = tpu.matmul %350, %351, %cst_112 {dimension_numbers = #tpu.dot_dimension_numbers<[1], [0], [0], [1], [0, 0, 1, 1], [], []>} : vector<48x16xbf16>, vector<16x64xbf16>, vector<48x64xf32> -> vector<48x64xf32>
    %353 = arith.addf %324, %352 : vector<48x64xf32>
    %354 = arith.addf %200, %353 : vector<48x64xf32>
    %c1_113 = arith.constant 1 : index
    %c0_114 = arith.constant 0 : index
    %c0_115 = arith.constant 0 : index
    %355 = vector.load %arg9[%c1_113, %c0_114, %c0_115] : memref<2x1x64xf32, #tpu.memory_space<vmem>>, vector<1x1x64xf32>
    %356 = vector.shape_cast %355 : vector<1x1x64xf32> to vector<1x64xf32>
    %357 = arith.mulf %354, %354 : vector<48x64xf32>
    %cst_116 = arith.constant dense<0.000000e+00> : vector<48xf32>
    %358 = vector.multi_reduction <add>, %357, %cst_116 [1] : vector<48x64xf32> to vector<48xf32>
    %359 = vector.shape_cast %358 : vector<48xf32> to vector<48x1xf32>
    %cst_117 = arith.constant 6.400000e+01 : f32
    %360 = vector.broadcast %cst_117 : f32 to vector<48x1xf32>
    %361 = arith.divf %359, %360 : vector<48x1xf32>
    %cst_118 = arith.constant 9.99999997E-7 : f32
    %362 = vector.broadcast %cst_118 : f32 to vector<48x1xf32>
    %363 = arith.addf %361, %362 : vector<48x1xf32>
    %364 = math.rsqrt %363 : vector<48x1xf32>
    %365 = vector.broadcast %364 : vector<48x1xf32> to vector<48x64xf32>
    %366 = arith.mulf %354, %365 : vector<48x64xf32>
    %367 = vector.broadcast %356 : vector<1x64xf32> to vector<48x64xf32>
    %368 = arith.mulf %366, %367 : vector<48x64xf32>
    %369 = arith.truncf %368 : vector<48x64xf32> to vector<48x64xbf16>
    %c1_119 = arith.constant 1 : index
    %c0_120 = arith.constant 0 : index
    %c0_121 = arith.constant 0 : index
    %370 = vector.load %arg10[%c1_119, %c0_120, %c0_121] : memref<2x64x256xbf16, #tpu.memory_space<vmem>>, vector<1x64x256xbf16>
    %371 = vector.shape_cast %370 : vector<1x64x256xbf16> to vector<64x256xbf16>
    %cst_122 = arith.constant dense<0.000000e+00> : vector<48x256xf32>
    %372 = tpu.matmul %369, %371, %cst_122 {dimension_numbers = #tpu.dot_dimension_numbers<[1], [0], [0], [1], [0, 0, 1, 1], [], []>} : vector<48x64xbf16>, vector<64x256xbf16>, vector<48x256xf32> -> vector<48x256xf32>
    %373 = vector.extract_strided_slice %372 {offsets = [0, 0], sizes = [48, 128], strides = [1, 1]} : vector<48x256xf32> to vector<48x128xf32>
    %374 = vector.extract_strided_slice %372 {offsets = [0, 128], sizes = [48, 128], strides = [1, 1]} : vector<48x256xf32> to vector<48x128xf32>
    %375 = arith.negf %373 : vector<48x128xf32>
    %376 = math.exp %375 : vector<48x128xf32>
    %cst_123 = arith.constant 1.000000e+00 : f32
    %377 = vector.broadcast %cst_123 : f32 to vector<48x128xf32>
    %378 = arith.addf %377, %376 : vector<48x128xf32>
    %379 = arith.divf %377, %378 : vector<48x128xf32>
    %380 = arith.mulf %373, %379 : vector<48x128xf32>
    %381 = arith.mulf %380, %374 : vector<48x128xf32>
    %382 = arith.truncf %381 : vector<48x128xf32> to vector<48x128xbf16>
    %c1_124 = arith.constant 1 : index
    %c0_125 = arith.constant 0 : index
    %c0_126 = arith.constant 0 : index
    %383 = vector.load %arg11[%c1_124, %c0_125, %c0_126] : memref<2x128x64xbf16, #tpu.memory_space<vmem>>, vector<1x128x64xbf16>
    %384 = vector.shape_cast %383 : vector<1x128x64xbf16> to vector<128x64xbf16>
    %cst_127 = arith.constant dense<0.000000e+00> : vector<48x64xf32>
    %385 = tpu.matmul %382, %384, %cst_127 {dimension_numbers = #tpu.dot_dimension_numbers<[1], [0], [0], [1], [0, 0, 1, 1], [], []>} : vector<48x128xbf16>, vector<128x64xbf16>, vector<48x64xf32> -> vector<48x64xf32>
    %386 = arith.addf %354, %385 : vector<48x64xf32>
    %c0_128 = arith.constant 0 : index
    %c0_129 = arith.constant 0 : index
    %387 = vector.load %arg12[%c0_128, %c0_129] : memref<1x64xf32, #tpu.memory_space<vmem>>, vector<1x64xf32>
    %388 = arith.mulf %386, %386 : vector<48x64xf32>
    %cst_130 = arith.constant dense<0.000000e+00> : vector<48xf32>
    %389 = vector.multi_reduction <add>, %388, %cst_130 [1] : vector<48x64xf32> to vector<48xf32>
    %390 = vector.shape_cast %389 : vector<48xf32> to vector<48x1xf32>
    %cst_131 = arith.constant 6.400000e+01 : f32
    %391 = vector.broadcast %cst_131 : f32 to vector<48x1xf32>
    %392 = arith.divf %390, %391 : vector<48x1xf32>
    %cst_132 = arith.constant 9.99999997E-7 : f32
    %393 = vector.broadcast %cst_132 : f32 to vector<48x1xf32>
    %394 = arith.addf %392, %393 : vector<48x1xf32>
    %395 = math.rsqrt %394 : vector<48x1xf32>
    %396 = vector.broadcast %395 : vector<48x1xf32> to vector<48x64xf32>
    %397 = arith.mulf %386, %396 : vector<48x64xf32>
    %398 = vector.broadcast %387 : vector<1x64xf32> to vector<48x64xf32>
    %399 = arith.mulf %397, %398 : vector<48x64xf32>
    %400 = arith.truncf %399 : vector<48x64xf32> to vector<48x64xbf16>
    %c0_133 = arith.constant 0 : index
    %c0_134 = arith.constant 0 : index
    %401 = vector.load %arg13[%c0_133, %c0_134] : memref<64x256xbf16, #tpu.memory_space<vmem>>, vector<64x256xbf16>
    %cst_135 = arith.constant dense<0.000000e+00> : vector<48x256xf32>
    %402 = tpu.matmul %400, %401, %cst_135 {dimension_numbers = #tpu.dot_dimension_numbers<[1], [0], [0], [1], [0, 0, 1, 1], [], []>} : vector<48x64xbf16>, vector<64x256xbf16>, vector<48x256xf32> -> vector<48x256xf32>
    %c0_136 = arith.constant 0 : index
    %c0_137 = arith.constant 0 : index
    %403 = vector.load %arg14[%c0_136, %c0_137] : memref<48x256xf32, #tpu.memory_space<vmem>>, vector<48x256xf32>
    tpu.vector_store %arg14[%c0_136, %c0_137], %402 {strides = array<i32>} : memref<48x256xf32, #tpu.memory_space<vmem>>, vector<48x256xf32>,
    return
  }
  func.func @transform_0(%arg0: i32) -> (i32, i32) {
    %c0_i32 = arith.constant 0 : i32
    %c0_i32_0 = arith.constant 0 : i32
    %c0_i32_1 = arith.constant 0 : i32
    return %c0_i32, %c0_i32_0 : i32, i32
  }
  func.func @transform_1(%arg0: i32) -> (i32, i32) {
    %c0_i32 = arith.constant 0 : i32
    %c0_i32_0 = arith.constant 0 : i32
    %c0_i32_1 = arith.constant 0 : i32
    return %c0_i32, %c0_i32_0 : i32, i32
  }
  func.func @transform_2(%arg0: i32) -> (i32, i32) {
    %c0_i32 = arith.constant 0 : i32
    %c0_i32_0 = arith.constant 0 : i32
    %c0_i32_1 = arith.constant 0 : i32
    return %c0_i32, %c0_i32_0 : i32, i32
  }
  func.func @transform_3(%arg0: i32) -> (i32, i32) {
    %c0_i32 = arith.constant 0 : i32
    %c0_i32_0 = arith.constant 0 : i32
    %c0_i32_1 = arith.constant 0 : i32
    return %c0_i32, %c0_i32_0 : i32, i32
  }
  func.func @transform_4(%arg0: i32) -> (i32, i32) {
    %c0_i32 = arith.constant 0 : i32
    %c0_i32_0 = arith.constant 0 : i32
    %c0_i32_1 = arith.constant 0 : i32
    return %c0_i32, %c0_i32_0 : i32, i32
  }
  func.func @transform_5(%arg0: i32) -> (i32, i32, i32) {
    %c0_i32 = arith.constant 0 : i32
    %c0_i32_0 = arith.constant 0 : i32
    %c0_i32_1 = arith.constant 0 : i32
    %c0_i32_2 = arith.constant 0 : i32
    return %c0_i32, %c0_i32_0, %c0_i32_1 : i32, i32, i32
  }
  func.func @transform_6(%arg0: i32) -> (i32, i32, i32) {
    %c0_i32 = arith.constant 0 : i32
    %c0_i32_0 = arith.constant 0 : i32
    %c0_i32_1 = arith.constant 0 : i32
    %c0_i32_2 = arith.constant 0 : i32
    return %c0_i32, %c0_i32_0, %c0_i32_1 : i32, i32, i32
  }
  func.func @transform_7(%arg0: i32) -> (i32, i32, i32) {
    %c0_i32 = arith.constant 0 : i32
    %c0_i32_0 = arith.constant 0 : i32
    %c0_i32_1 = arith.constant 0 : i32
    %c0_i32_2 = arith.constant 0 : i32
    return %c0_i32, %c0_i32_0, %c0_i32_1 : i32, i32, i32
  }
  func.func @transform_8(%arg0: i32) -> (i32, i32, i32) {
    %c0_i32 = arith.constant 0 : i32
    %c0_i32_0 = arith.constant 0 : i32
    %c0_i32_1 = arith.constant 0 : i32
    %c0_i32_2 = arith.constant 0 : i32
    return %c0_i32, %c0_i32_0, %c0_i32_1 : i32, i32, i32
  }
  func.func @transform_9(%arg0: i32) -> (i32, i32, i32) {
    %c0_i32 = arith.constant 0 : i32
    %c0_i32_0 = arith.constant 0 : i32
    %c0_i32_1 = arith.constant 0 : i32
    %c0_i32_2 = arith.constant 0 : i32
    return %c0_i32, %c0_i32_0, %c0_i32_1 : i32, i32, i32
  }
  func.func @transform_10(%arg0: i32) -> (i32, i32, i32) {
    %c0_i32 = arith.constant 0 : i32
    %c0_i32_0 = arith.constant 0 : i32
    %c0_i32_1 = arith.constant 0 : i32
    %c0_i32_2 = arith.constant 0 : i32
    return %c0_i32, %c0_i32_0, %c0_i32_1 : i32, i32, i32
  }
  func.func @transform_11(%arg0: i32) -> (i32, i32) {
    %c0_i32 = arith.constant 0 : i32
    %c0_i32_0 = arith.constant 0 : i32
    %c0_i32_1 = arith.constant 0 : i32
    return %c0_i32, %c0_i32_0 : i32, i32
  }
  func.func @transform_12(%arg0: i32) -> (i32, i32) {
    %c0_i32 = arith.constant 0 : i32
    %c0_i32_0 = arith.constant 0 : i32
    %c0_i32_1 = arith.constant 0 : i32
    return %c0_i32, %c0_i32_0 : i32, i32
  }
  func.func @transform_13(%arg0: i32) -> (i32, i32) {
    %c0_i32 = arith.constant 0 : i32
    %c0_i32_0 = arith.constant 0 : i32
    %c0_i32_1 = arith.constant 0 : i32
    return %c0_i32, %c0_i32_0 : i32, i32
  }
}

</mosaic_0001>

<bundles_post_ra>
// kernel: tpu_custom_call.1
= control target key start
LH: loop header
LB: loop body
LE: loop exit
PB: predicated region body
PF: predicated region fallthrough
CT: control target
= control target key end

     0   :  { %18 = vsyncpa [#allocation3], 0  ;;  %s8977_s0 = inlined_call_operand.vmem [shape: s32[48,1], index: 0, kind: input, shape index: {}]   ;;  %s8978_s1 = inlined_call_operand.hbm [shape: f32[48,64], index: 1, kind: input, shape index: {}]   ;;  %s8979_s2 = inlined_call_operand.hbm [shape: f32[48,64], index: 2, kind: input, shape index: {}]   ;;  %s8980_s3 = inlined_call_operand.hbm [shape: bf16[64,64], index: 3, kind: input, shape index: {}]   ;;  %s8981_s4 = inlined_call_operand.vmem [shape: bf16[256,64], index: 4, kind: input, shape index: {}]   ;;  %s8982_s5 = inlined_call_operand.hbm [shape: f32[2,1,64], index: 5, kind: input, shape index: {}]   ;;  %s8983_s6 = inlined_call_operand.vmem [shape: bf16[2,64,256], index: 6, kind: input, shape index: {}]   ;;  %s8984_s7 = inlined_call_operand.vmem [shape: bf16[2,64,64], index: 7, kind: input, shape index: {}]   ;;  %s8985_s8 = inlined_call_operand.vmem [shape: f32[2,1,64], index: 8, kind: input, shape index: {}]   ;;  %s8986_s9 = inlined_call_operand.vmem [shape: bf16[2,64,256], index: 9, kind: input, shape index: {}]   ;;  %s8987_s10 = inlined_call_operand.vmem [shape: bf16[2,128,64], index: 10, kind: input, shape index: {}]   ;;  %s8988_s11 = inlined_call_operand.vmem [shape: f32[1,64], index: 11, kind: input, shape index: {}]   ;;  %s8989_s12 = inlined_call_operand.hbm [shape: bf16[64,256], index: 12, kind: input, shape index: {}]   ;;  %s8990_s13 = inlined_call_operand.hbm [shape: f32[48,256], index: 13, kind: output, shape index: {}]  }
   0x1   :  { %19 = vsyncpa [#allocation6], 0 }
   0x2   :  { %20 = vsyncpa [#allocation9], 0 }
   0x3   :  { %21 = vsyncpa [#allocation4], 0  ;;  %s7206_s25 = smov [#allocation5]   ;;  %s7207_s27 = smov [#allocation8]  }
   0x4   :  { %s41_s26 = sshll.u32 %s7206_s25, 4  ;;  %s67_s28 = sshll.u32 %s7207_s27, 4  ;;  %s42_s26 = int_to_ptr.vmem [resolvable:$true] %s41_s26  ;;  %s7298_s28 = int_to_ptr.vmem [resolvable:$true] %s67_s28 }
   0x5   :  { %s7066_s14 = scalar_lea.hbm %s8979_s2, 768 }
   0x6   :  { %p7067_p0 = scmp.ne.s32.totalorder %s8979_s2, %s7066_s14  ;;  %p7070_p1 = scmp.lt.u32.totalorder %s7066_s14, %s8979_s2 }
   0x8   :  { %p7072_p2 = pnand %p7070_p1, %p7067_p0 }
   0xa   :  { %7075 = shalt.err (!%p7072_p2)
}
   0xb   :  { %s7076_s19 = scalar_lea.vmem %s42_s26, 768  ;;  %p7081_p4 = scmp.lt.s32.totalorder %s42_s26, %s42_s26 }
   0xc   :  { %p7077_p3 = scmp.ne.s32.totalorder %s42_s26, %s7076_s19  ;;  %p7082_p5 = scmp.lt.s32.totalorder %s7076_s19, %s7076_s19 }
   0xe   :  { %p7083_p6 = por %p7082_p5, %p7081_p4 }
  0x10   :  { %p7084_p7 = pnand %p7083_p6, %p7077_p3 }
  0x12   :  { %7087 = shalt.err (!%p7084_p7)
}
  0x13   :  { %s7208_s20 = smov 128   ;;  %s7209_s21 = smov 8  }
  0x14   :  { %47 = dma.hbm_to_vmem [thread:$0]  %s8979_s2, 768, %s42_s26, [#allocation6], %s7208_s20, %s7208_s20, %s7209_s21  }
  0x15   :  { %s7088_s27 = scalar_lea.hbm %s8982_s5, 32 }
  0x16   :  { %p7089_p8 = scmp.ne.s32.totalorder %s8982_s5, %s7088_s27  ;;  %p7092_p9 = scmp.lt.u32.totalorder %s7088_s27, %s8982_s5 }
  0x18   :  { %p7094_p10 = pnand %p7092_p9, %p7089_p8 }
  0x1a   :  { %7097 = shalt.err (!%p7094_p10)
}
  0x1b   :  { %s7098_s16 = scalar_lea.vmem %s7298_s28, 32  ;;  %p7103_p12 = scmp.lt.s32.totalorder %s7298_s28, %s7298_s28 }
  0x1c   :  { %p7099_p11 = scmp.ne.s32.totalorder %s7298_s28, %s7098_s16  ;;  %p7104_p13 = scmp.lt.s32.totalorder %s7098_s16, %s7098_s16 }
  0x1e   :  { %p7105_p0 = por %p7104_p13, %p7103_p12 }
  0x20   :  { %p7106_p1 = pnand %p7105_p0, %p7099_p11 }
  0x22   :  { %7109 = shalt.err (!%p7106_p1)
}
  0x23   :  { %s7210_s2 = smov 16   ;;  %s7211_s26 = smov 1  }
  0x24   :  { %73 = dma.hbm_to_vmem [thread:$0]  %s8982_s5, 32, %s7298_s28, [#allocation9], %s7210_s2, %s7210_s2, %s7211_s26  }
  0x25   :  { %s7212_s19 = smov [#allocation2]   ;;  %s7213_s23 = smov [#allocation7]  }
  0x26   :  { %s29_s22 = sshll.u32 %s7212_s19, 4  ;;  %s53_s24 = sshll.u32 %s7213_s23, 4  ;;  %s30_s22 = int_to_ptr.vmem [resolvable:$true] %s29_s22  ;;  %s7334_s24 = int_to_ptr.vmem [resolvable:$true] %s53_s24 }
  0x27   :  { %s7110_s29 = scalar_lea.hbm %s8978_s1, 768 }
  0x28   :  { %p7111_p2 = scmp.ne.s32.totalorder %s8978_s1, %s7110_s29  ;;  %p7114_p3 = scmp.lt.u32.totalorder %s7110_s29, %s8978_s1 }
  0x2a   :  { %p7116_p4 = pnand %p7114_p3, %p7111_p2 }
  0x2c   :  { %7119 = shalt.err (!%p7116_p4)
}
  0x2d   :  { %s7120_s5 = scalar_lea.vmem %s30_s22, 768  ;;  %p7125_p6 = scmp.lt.s32.totalorder %s30_s22, %s30_s22 }
  0x2e   :  { %p7121_p5 = scmp.ne.s32.totalorder %s30_s22, %s7120_s5  ;;  %p7126_p7 = scmp.lt.s32.totalorder %s7120_s5, %s7120_s5 }
  0x30   :  { %p7127_p8 = por %p7126_p7, %p7125_p6 }
  0x32   :  { %p7128_p9 = pnand %p7127_p8, %p7121_p5 }
  0x34   :  { %7131 = shalt.err (!%p7128_p9)
}
  0x35   :  { %35 = dma.hbm_to_vmem [thread:$0]  %s8978_s1, 768, %s30_s22, [#allocation3], %s7208_s20, %s7208_s20, %s7209_s21  }
  0x36   :  { %s7132_s19 = scalar_lea.hbm %s8980_s3, 512 }
  0x37   :  { %p7133_p10 = scmp.ne.s32.totalorder %s8980_s3, %s7132_s19  ;;  %p7136_p11 = scmp.lt.u32.totalorder %s7132_s19, %s8980_s3 }
  0x39   :  { %p7138_p12 = pnand %p7136_p11, %p7133_p10 }
  0x3b   :  { %7141 = shalt.err (!%p7138_p12)
}
  0x3c   :  { %s7142_s30 = scalar_lea.vmem %s7334_s24, 512  ;;  %p7147_p0 = scmp.lt.s32.totalorder %s7334_s24, %s7334_s24 }
  0x3d   :  { %p7143_p13 = scmp.ne.s32.totalorder %s7334_s24, %s7142_s30  ;;  %p7148_p1 = scmp.lt.s32.totalorder %s7142_s30, %s7142_s30 }
  0x3f   :  { %p7149_p2 = por %p7148_p1, %p7147_p0 }
  0x41   :  { %p7150_p3 = pnand %p7149_p2, %p7143_p13 }
  0x43   :  { %7153 = shalt.err (!%p7150_p3)
}
  0x44   :  { %s7214_s1 = smov 64   ;;  %s7215_s22 = smov 4  }
  0x45   :  { %59 = dma.hbm_to_vmem [thread:$0]  %s8980_s3, 512, %s7334_s24, [#allocation6], %s7214_s1, %s7214_s1, %s7215_s22  }
  0x46   :  { %s7216_s16 = smov [#allocation10]   ;;  %s7154_s17 = scalar_lea.hbm %s8989_s12, 1024 }
  0x47   :  { %s91_s5 = sshll.u32 %s7216_s16, 4  ;;  %p7155_p4 = scmp.ne.s32.totalorder %s8989_s12, %s7154_s17  ;;  %s92_s5 = int_to_ptr.vmem [resolvable:$true] %s91_s5 }
  0x48   :  { %p7158_p5 = scmp.lt.u32.totalorder %s7154_s17, %s8989_s12 }
  0x4a   :  { %p7160_p6 = pnand %p7158_p5, %p7155_p4 }
  0x4c   :  { %7163 = shalt.err (!%p7160_p6)
}
  0x4d   :  { %s7164_s27 = scalar_lea.vmem %s92_s5, 1024  ;;  %p7169_p8 = scmp.lt.s32.totalorder %s92_s5, %s92_s5 }
  0x4e   :  { %p7165_p7 = scmp.ne.s32.totalorder %s92_s5, %s7164_s27  ;;  %p7170_p9 = scmp.lt.s32.totalorder %s7164_s27, %s7164_s27 }
  0x50   :  { %p7171_p10 = por %p7170_p9, %p7169_p8 }
  0x52   :  { %p7172_p11 = pnand %p7171_p10, %p7165_p7 }
  0x54   :  { %7175 = shalt.err (!%p7172_p11)
}
  0x55   :  { %97 = dma.hbm_to_vmem [thread:$0]  %s8989_s12, 1024, %s92_s5, [#allocation9], %s7208_s20, %s7208_s20, %s7209_s21  }
  0x56   :  { %7198 = dma.done.wait [#allocation3], 768  }
  0x57   :  { %7199 = vsyncadd [#allocation3], 4294966528 }
  0x58   :  { %7200 = dma.done.wait [#allocation6], 1280  }
  0x59   :  { %7201 = vsyncadd [#allocation6], 4294966016 }
  0x5a   :  { %7202 = dma.done.wait [#allocation9], 1056  }
  0x5b   :  { %7203 = vsyncadd [#allocation9], 4294966240  ;;  %v7217_v0 = vmov 0   ;;  %v116_v1 = vld [vmem:[%s8977_s0 + $0x10] sm:$0xff]  ;;  %v114_v2 = vld [vmem:[%s8977_s0] sm:$0xff]  ;;  %v120_v23 = vlaneseq  ;;  %s7221_s27 = smov 48  }
  0x5c   :  { %6645 = vset.pattern.permute.xlu1 %v7217_v0  ;;  %6644 = vset.pattern.permute.xlu0 %v7217_v0  ;;  %v117_v3 = vld [vmem:[%s8977_s0 + $0x18] sm:$0xff]  ;;  %v115_v4 = vld [vmem:[%s8977_s0 + $0x8] sm:$0xff]  ;;  %v6646_v5 = vld [vmem:[%s8981_s4 + $0x40] sm:$0xff]   ;;  %v7218_v30 = vmov 1.0|1.0   ;;  %s7222_s3 = smov 112  }
  0x5d   :  { %535 = vmatprep.mubr.bf16.mxu1 %v7217_v0  ;;  %130 = vperm.xlu1 %6645, %v116_v1   ;;  %v6647_v6 = vld [vmem:[%s8981_s4] sm:$0xff]   ;;  %v119_v7 = vld [vmem:[%s8977_s0 + $0x28] sm:$0xff]  ;;  %v6650_v11 = vld [vmem:[%s8981_s4 + $0x50] sm:$0xff]   ;;  %v7455_v24 = vand.u32 127, %v120_v23  ;;  %s7223_s24 = smov 32   ;;  %s7224_s29 = smov 96  }
  0x5e   :  { %124 = vperm.xlu0 %6644, %v114_v2   ;;  %5826 = vmatprep.subr.bf16.mxu0 %v6646_v5  ;;  %v6648_v8 = vld [vmem:[%s8981_s4 + $0x48] sm:$0xff]   ;;  %v118_v9 = vld [vmem:[%s8977_s0 + $0x20] sm:$0xff]  ;;  %v6651_v12 = vld [vmem:[%s8981_s4 + $0x10] sm:$0xff]   ;;  %s7225_s12 = smov 80  }
  0x5f   :  { %5827 = vmatpush3.bf16.msra.mxu0 %v6647_v6  ;;  %v6649_v10 = vld [vmem:[%s8981_s4 + $0x8] sm:$0xff]   ;;  %v6652_v13 = vld [vmem:[%s8981_s4 + $0x58] sm:$0xff]   ;;  %v6654_v15 = vld [vmem:[%s8981_s4 + $0x60] sm:$0xff]   ;;  %v122_v27 = vadd.s32 128, %v7455_v24 }
  0x60   :  { %5828 = vmatprep.subr.bf16.mxu0 %v6648_v8  ;;  %v6653_v14 = vld [vmem:[%s8981_s4 + $0x18] sm:$0xff]   ;;  %v6655_v16 = vld [vmem:[%s8981_s4 + $0x20] sm:$0xff]   ;;  %v6656_v17 = vld [vmem:[%s8981_s4 + $0x68] sm:$0xff]  }
  0x61   :  { %133 = vperm.xlu1 %6645, %v117_v3   ;;  %v6657_v18 = vld [vmem:[%s8981_s4 + $0x28] sm:$0xff]   ;;  %v6658_v19 = vld [vmem:[%s8981_s4 + $0x70] sm:$0xff]   ;;  %v6660_v21 = vld [vmem:[%s8981_s4 + $0x78] sm:$0xff]  }
  0x62   :  { %127 = vperm.xlu0 %6644, %v115_v4   ;;  %v6659_v20 = vld [vmem:[%s8981_s4 + $0x30] sm:$0xff]   ;;  %v6661_v22 = vld [vmem:[%s8981_s4 + $0x38] sm:$0xff]   ;;  %v6662_v63 = vld [vmem:[%s8983_s6 + $0x4] ss:$8 sps:$4 sm:$0xff]  }
  0x63   :  { %5829 = vmatpush3.bf16.msra.mxu0 %v6649_v10  ;;  %v6664_v1 = vld [vmem:[%s8983_s6] ss:$8 sps:$4 sm:$0xff]   ;;  %503 = vmatprep.subr.bf16.mxu1 %v6662_v63  ;;  %v6665_v2 = vld [vmem:[%s8983_s6 + $0x14] ss:$8 sps:$4 sm:$0xff]   ;;  %v6667_v3 = vld [vmem:[%s8983_s6 + $0x10] ss:$8 sps:$4 sm:$0xff]  }
  0x64   :  { %5830 = vmatprep.subr.bf16.mxu0 %v6650_v11  ;;  %504 = vmatpush1.bf16.msra.mxu1 %v6664_v1  ;;  %v6668_v4 = vld [vmem:[%s8983_s6 + $0x24] ss:$8 sps:$4 sm:$0xff]   ;;  %v6670_v5 = vld [vmem:[%s8983_s6 + $0x20] ss:$8 sps:$4 sm:$0xff]   ;;  %v6671_v6 = vld [vmem:[%s8983_s6 + $0x34] ss:$8 sps:$4 sm:$0xff]  }
  0x65   :  { %139 = vperm.xlu1 %6645, %v119_v7   ;;  %505 = vmatprep.subr.bf16.mxu1 %v6665_v2  ;;  %v6673_v7 = vld [vmem:[%s8983_s6 + $0x30] ss:$8 sps:$4 sm:$0xff]   ;;  %v6674_v8 = vld [vmem:[#allocation7] sm:$0xff]  }
  0x66   :  { %136 = vperm.xlu0 %6644, %v118_v9   ;;  %v7219_v9 = vmov 0.0   ;;  %v6675_v10 = vld [vmem:[#allocation7 + $0x8] sm:$0xff]   ;;  %v6676_v11 = vld [vmem:[#allocation7 + $0x10] sm:$0xff]  }
  0x67   :  { %5831 = vmatpush3.bf16.msra.mxu0 %v6651_v12 }
  0x68   :  { %5832 = vmatprep.subr.bf16.mxu0 %v6652_v13  ;;  %506 = vmatpush1.bf16.msra.mxu1 %v6667_v3 }
  0x69   :  { %507 = vmatprep.subr.bf16.mxu1 %v6668_v4 }
  0x6b   :  { %5833 = vmatpush3.bf16.msra.mxu0 %v6653_v14 }
  0x6c   :  { %5834 = vmatprep.subr.bf16.mxu0 %v6654_v15  ;;  %508 = vmatpush1.bf16.msra.mxu1 %v6670_v5 }
  0x6d   :  { %509 = vmatprep.subr.bf16.mxu1 %v6671_v6 }
  0x6f   :  { %5835 = vmatpush3.bf16.msra.mxu0 %v6655_v16 }
  0x70   :  { %5836 = vmatprep.subr.bf16.mxu0 %v6656_v17  ;;  %510 = vmatpush1.bf16.msra.mxu1 %v6673_v7 }
  0x71   :  { %6070 = vmatprep.subr.bf16.mxu1 %v7219_v9 }
  0x73   :  { %5837 = vmatpush3.bf16.msra.mxu0 %v6657_v18 }
  0x74   :  { %5838 = vmatprep.subr.bf16.mxu0 %v6658_v19 }
  0x77   :  { %5839 = vmatpush3.bf16.msra.mxu0 %v6659_v20 }
  0x78   :  { %5840 = vmatprep.subr.bf16.mxu0 %v6660_v21 }
  0x7b   :  { %5841 = vmatpush3.bf16.msra.mxu0 %v6661_v22 }
  0x7c   :  { %6090 = vmatprep.subr.bf16.mxu0 %v7219_v9 }
  0xdc   :  { %v131_v25 = vpop.permute.xlu1 %130 }
  0xdd   :  { %v125_v26 = vpop.permute.xlu0 %124  ;;  %vm146_vm0 = vcmp.eq.s32.totalorder %v131_v25, %v122_v27  ;;  %vm145_vm9 = vcmp.eq.s32.totalorder %v131_v25, %v7455_v24 }
  0xde   :  { %vm142_vm3 = vcmp.eq.s32.totalorder %v125_v26, %v122_v27  ;;  %vm141_vm5 = vcmp.eq.s32.totalorder %v125_v26, %v7455_v24 }
  0xe0   :  { %v134_v28 = vpop.permute.xlu1 %133 }
  0xe1   :  { %v128_v29 = vpop.permute.xlu0 %127  ;;  %vm148_vm1 = vcmp.eq.s32.totalorder %v134_v28, %v122_v27  ;;  %vm147_vm10 = vcmp.eq.s32.totalorder %v134_v28, %v7455_v24 }
  0xe2   :  { %vm143_vm2 = vcmp.eq.s32.totalorder %v128_v29, %v7455_v24  ;;  %vm144_vm4 = vcmp.eq.s32.totalorder %v128_v29, %v122_v27  ;;  %vm5577_vm8 = vmpackc.low %vm148_vm1, %vm146_vm0  ;;  %vm387_vm0 = vcmask 523264   ;;  %vm7220_vm1 = vmmov 0  }
  0xe3   :  { %vm5573_vm6 = vmpackc.low %vm144_vm4, %vm142_vm3  ;;  %vm844_vm4 = vcmask 130048  }
  0xe4   :  { %5574 = vmatprep.mubr.msk.bf16.mxu0 %vm5573_vm6, %v7218_v30  ;;  %vm5575_vm7 = vmpackc.low %vm143_vm2, %vm141_vm5  ;;  %v140_v31 = vpop.permute.xlu1 %139  ;;  %vm1063_vm5 = vcmask 1043456  }
  0xe5   :  { %5576 = vmatmul.mubr.msk.bf16.vlgmr.msra.gmra.mrb[0].mxu0 %vm5575_vm7, %v7218_v30  ;;  %v137_v32 = vpop.permute.xlu0 %136  ;;  %vm152_vm11 = vcmp.eq.s32.totalorder %v140_v31, %v122_v27  ;;  %vm5579_vm13 = vmpackc.low %vm147_vm10, %vm145_vm9  ;;  %vm151_vm15 = vcmp.eq.s32.totalorder %v140_v31, %v7455_v24  ;;  %v5585_v31 = vld [vmem:[#allocation8] ss:$0 sm:$0xff]  ;;  %vm986_vm7 = vcmask 195584  }
  0xe6   :  { %5578 = vmatprep.mubr.msk.bf16.mxu0 %vm5577_vm8, %v7218_v30  ;;  %vm150_vm12 = vcmp.eq.s32.totalorder %v137_v32, %v122_v27  ;;  %vm149_vm3 = vcmp.eq.s32.totalorder %v137_v32, %v7455_v24  ;;  %6091 = vmatpush3.bf16.msra.mxu0 %v6674_v8 }
  0xe7   :  { %vm5581_vm14 = vmpackc.low %vm152_vm11, %vm150_vm12  ;;  %6092 = vmatprep.subr.bf16.mxu0 %v7219_v9 }
  0xe8   :  { %vm5583_vm2 = vmpackc.low %vm151_vm15, %vm149_vm3 }
  0xea   :  { %6093 = vmatpush3.bf16.msra.mxu0 %v6675_v10 }
  0xeb   :  { %6094 = vmatprep.subr.bf16.mxu0 %v7219_v9 }
  0xed   :  { %5580 = vmatmul.mubr.msk.bf16.gmra.mrb[4].mxu0 %vm5579_vm13, %v7218_v30 }
  0xee   :  { %5582 = vmatprep.mubr.msk.bf16.mxu0 %vm5581_vm14, %v7218_v30  ;;  %6095 = vmatpush3.bf16.msra.mxu0 %v6676_v11 }
  0xef   :  { %6096 = vmatprep.subr.bf16.mxu0 %v7219_v9 }
  0xf5   :  { %5584 = vmatmul.mubr.msk.bf16.gmra.mrb[8].mxu0 %vm5583_vm2, %v7218_v30 }
  0xf6   :  { %6098 = vmatprep.mubr.msk.bf16.mxu0 %vm7220_vm1, %v7219_v9 }
 0x1b8   :  { %v5842_v33 = vpop.f32.mrb[0].mxu0 }
 0x1b9   :  { %v5843_v34 = vpop.f32.mrb[1].mxu0 }
 0x1ba   :  { %v7464_v35 = vadd.f32 %v5843_v34, %v5842_v33  ;;  %v5845_v36 = vpop.f32.mrb[2].mxu0 }
 0x1bb   :  { %v5846_v37 = vpop.f32.mrb[3].mxu0 }
 0x1bc   :  { %v7466_v38 = vadd.f32 %v5846_v37, %v5845_v36  ;;  %v381_v39 = vmul.f32 %v7464_v35, %v7464_v35 }
 0x1be   :  { %v388_v40 = vsel %vm387_vm0, %v381_v39, 0.0  ;;  %v382_v41 = vmul.f32 %v7466_v38, %v7466_v38 }
 0x1bf   :  { %389 = vadd.xlane.f32.xlu0 %v388_v40 }
 0x1c0   :  { %v5848_v42 = vpop.f32.mrb[4].mxu0  ;;  %v391_v43 = vsel %vm387_vm0, %v382_v41, 0.0 }
 0x1c1   :  { %v5849_v44 = vpop.f32.mrb[5].mxu0  ;;  %392 = vadd.xlane.f32.xlu1 %v391_v43 }
 0x1c2   :  { %v7474_v45 = vadd.f32 %v5849_v44, %v5848_v42  ;;  %v5851_v46 = vpop.f32.mrb[6].mxu0 }
 0x1c3   :  { %v5852_v47 = vpop.f32.mrb[7].mxu0 }
 0x1c4   :  { %v7476_v48 = vadd.f32 %v5852_v47, %v5851_v46  ;;  %v383_v49 = vmul.f32 %v7474_v45, %v7474_v45 }
 0x1c6   :  { %v394_v50 = vsel %vm387_vm0, %v383_v49, 0.0  ;;  %v384_v51 = vmul.f32 %v7476_v48, %v7476_v48 }
 0x1c7   :  { %395 = vadd.xlane.f32.xlu0 %v394_v50 }
 0x1c8   :  { %v5854_v52 = vpop.f32.mrb[8].mxu0  ;;  %v397_v56 = vsel %vm387_vm0, %v384_v51, 0.0 }
 0x1c9   :  { %v5855_v53 = vpop.f32.mrb[9].mxu0 }
 0x1ca   :  { %v7483_v54 = vadd.f32 %v5855_v53, %v5854_v52  ;;  %v5857_v55 = vpop.f32.mrb[10].mxu0 }
 0x1cb   :  { %398 = vadd.xlane.f32.xlu0 %v397_v56  ;;  %v5858_v57 = vpop.f32.mrb[11].mxu0 }
 0x1cc   :  { %v7486_v58 = vadd.f32 %v5858_v57, %v5857_v55  ;;  %v385_v59 = vmul.f32 %v7483_v54, %v7483_v54 }
 0x1ce   :  { %v400_v60 = vsel %vm387_vm0, %v385_v59, 0.0  ;;  %v386_v61 = vmul.f32 %v7486_v58, %v7486_v58 }
 0x1cf   :  { %401 = vadd.xlane.f32.xlu1 %v400_v60  ;;  %v6677_v60 = vld [vmem:[#allocation7 + $0x18] sm:$0xff]  }
 0x1d0   :  { %v403_v62 = vsel %vm387_vm0, %v386_v61, 0.0  ;;  %6097 = vmatpush3.bf16.msra.mxu0 %v6677_v60 }
 0x1d1   :  { %404 = vadd.xlane.f32.xlu0 %v403_v62 }
 0x24c   :  { %v390_v12 = vpop.xlane.xlu0 %389 }
 0x24d   :  { %v407_v13 = vmul.f32 0.015625, %v390_v12 }
 0x24e   :  { %v393_v14 = vpop.xlane.xlu1 %392 }
 0x24f   :  { %v413_v15 = vadd.f32 1e-06, %v407_v13  ;;  %v408_v16 = vmul.f32 0.015625, %v393_v14 }
 0x251   :  { %6750 = vrsqrt.f32 %v413_v15  ;;  %v414_v17 = vadd.f32 1e-06, %v408_v16 }
 0x253   :  { %6752 = vrsqrt.f32 %v414_v17  ;;  %v356_v17 = vld [vmem:[#allocation2] sm:$0xff] }
 0x254   :  { %v396_v18 = vpop.xlane.xlu0 %395 }
 0x255   :  { %v409_v19 = vmul.f32 0.015625, %v396_v18 }
 0x257   :  { %v415_v20 = vadd.f32 1e-06, %v409_v19 }
 0x258   :  { %v399_v21 = vpop.xlane.xlu0 %398 }
 0x259   :  { %6754 = vrsqrt.f32 %v415_v20  ;;  %v410_v22 = vmul.f32 0.015625, %v399_v21  ;;  %v362_v21 = vld [vmem:[#allocation5] sm:$0xff] }
 0x25b   :  { %v6751_v25 = vpop.eup %6750  ;;  %v416_v26 = vadd.f32 1e-06, %v410_v22 }
 0x25c   :  { %v402_v27 = vpop.xlane.xlu1 %401  ;;  %v425_v28 = vmul.f32 %v6751_v25, %v7464_v35  ;;  %v363_v25 = vld [vmem:[#allocation5 + $0x8] sm:$0xff] }
 0x25d   :  { %v6753_v29 = vpop.eup %6752  ;;  %6756 = vrsqrt.f32 %v416_v26  ;;  %v411_v30 = vmul.f32 0.015625, %v402_v27 }
 0x25e   :  { %v405_v32 = vpop.xlane.xlu0 %404  ;;  %v426_v33 = vmul.f32 %v6753_v29, %v7466_v38  ;;  %v437_v37 = vmul.f32 %v5585_v31, %v425_v28 }
 0x25f   :  { %v417_v34 = vadd.f32 1e-06, %v411_v30  ;;  %v412_v36 = vmul.f32 0.015625, %v405_v32 }
 0x260   :  { %v438_v39 = vmul.f32 %v5585_v31, %v426_v33 }
 0x261   :  { %6758 = vrsqrt.f32 %v417_v34  ;;  %v418_v40 = vadd.f32 1e-06, %v412_v36 }
 0x262   :  { %v443_v41 = vpack.c.bf16 %v438_v39, %v437_v37  ;;  %v364_v37 = vld [vmem:[#allocation5 + $0x10] sm:$0xff]  ;;  %v358_v39 = vld [vmem:[#allocation2 + $0x10] sm:$0xff] }
 0x263   :  { %v6755_v42 = vpop.eup %6754  ;;  %6760 = vrsqrt.f32 %v418_v40  ;;  %v359_v40 = vld [vmem:[#allocation2 + $0x18] sm:$0xff] }
 0x264   :  { %5594 = vmatmul.mubr.msk.bf16.vlgmr.msra.gmra.mrb[0].mxu1 %vm387_vm0, %v443_v41  ;;  %v427_v43 = vmul.f32 %v6755_v42, %v7474_v45  ;;  %v365_v42 = vld [vmem:[#allocation5 + $0x18] sm:$0xff] }
 0x265   :  { %545 = vmatprep.mubr.bf16.mxu1 %v7217_v0  ;;  %6071 = vmatpush3.bf16.msra.mxu1 %v6674_v8 }
 0x266   :  { %6072 = vmatprep.subr.bf16.mxu1 %v7219_v9  ;;  %v439_v47 = vmul.f32 %v5585_v31, %v427_v43 }
 0x267   :  { %v6757_v44 = vpop.eup %6756 }
 0x268   :  { %v428_v46 = vmul.f32 %v6757_v44, %v7476_v48 }
 0x269   :  { %6073 = vmatpush3.bf16.msra.mxu1 %v6675_v10 }
 0x26a   :  { %v440_v49 = vmul.f32 %v5585_v31, %v428_v46  ;;  %6074 = vmatprep.subr.bf16.mxu1 %v7219_v9 }
 0x26b   :  { %v6759_v50 = vpop.eup %6758 }
 0x26c   :  { %v444_v51 = vpack.c.bf16 %v440_v49, %v439_v47  ;;  %v429_v53 = vmul.f32 %v6759_v50, %v7483_v54 }
 0x26d   :  { %v6761_v52 = vpop.eup %6760  ;;  %6075 = vmatpush3.bf16.msra.mxu1 %v6676_v11  ;;  %v357_v11 = vld [vmem:[#allocation2 + $0x8] sm:$0xff] }
 0x26e   :  { %5595 = vmatmul.mubr.msk.bf16.gmra.mrb[4].mxu1 %vm387_vm0, %v444_v51  ;;  %v430_v55 = vmul.f32 %v6761_v52, %v7486_v58  ;;  %6076 = vmatprep.subr.bf16.mxu1 %v7219_v9  ;;  %v441_v57 = vmul.f32 %v5585_v31, %v429_v53 }
 0x26f   :  { %555 = vmatprep.mubr.bf16.mxu1 %v7217_v0 }
 0x270   :  { %v442_v56 = vmul.f32 %v5585_v31, %v430_v55  ;;  %v360_v55 = vld [vmem:[#allocation2 + $0x20] sm:$0xff] }
 0x271   :  { %6077 = vmatpush3.bf16.msra.mxu1 %v6677_v60  ;;  %v361_v60 = vld [vmem:[#allocation2 + $0x28] sm:$0xff] }
 0x272   :  { %v445_v59 = vpack.c.bf16 %v442_v56, %v441_v57  ;;  %v366_v56 = vld [vmem:[#allocation5 + $0x20] sm:$0xff] }
 0x276   :  { %5596 = vmatmul.mubr.msk.bf16.gmra.mrb[8].mxu1 %vm387_vm0, %v445_v59  ;;  %v367_v59 = vld [vmem:[#allocation5 + $0x28] sm:$0xff] }
 0x277   :  { %6078 = vmatprep.mubr.msk.bf16.mxu1 %vm7220_vm1, %v7219_v9 }
 0x337   :  { %v7541_v61 = vpop.f32.mrb[0].mxu1 }
 0x338   :  { %v539_v62 = vpop.f32.mrb[1].mxu1  ;;  %v566_v26 = vmul.f32 %v7541_v61, %v356_v17 }
 0x339   :  { %v7543_v63 = vpop.f32.mrb[2].mxu1 }
 0x33a   :  { %v543_v1 = vpop.f32.mrb[3].mxu1  ;;  %v572_v2 = vpack.c.bf16 %v7543_v63, %v7541_v61  ;;  %v567_v30 = vmul.f32 %v7543_v63, %v357_v11 }
 0x33b   :  { %v7547_v3 = vpack.c.bf16 %v543_v1, %v539_v62 }
 0x33c   :  { %710 = vrot.lane.b32.xlu1 %v572_v2, %s7214_s1  ;;  %6079 = vmatmul.mubr.msk.bf16.vlgmr.msra.gmra.mrb[12].mxu1 %vm387_vm0, %v572_v2 }
 0x33d   :  { %6082 = vmatprep.mubr.msk.bf16.mxu1 %vm7220_vm1, %v7219_v9 }
 0x341   :  { %v7553_v4 = vpop.f32.mrb[4].mxu1 }
 0x342   :  { %v7555_v5 = vpop.f32.mrb[5].mxu1  ;;  %v568_v46 = vmul.f32 %v7553_v4, %v358_v39 }
 0x343   :  { %v7557_v6 = vpop.f32.mrb[6].mxu1 }
 0x344   :  { %v553_v7 = vpop.f32.mrb[7].mxu1  ;;  %v573_v8 = vpack.c.bf16 %v7557_v6, %v7553_v4  ;;  %v569_v49 = vmul.f32 %v7557_v6, %v359_v40 }
 0x346   :  { %712 = vrot.lane.b32.xlu0 %v573_v8, %s7214_s1  ;;  %6083 = vmatmul.mubr.msk.bf16.gmra.mrb[16].mxu1 %vm387_vm0, %v573_v8 }
 0x347   :  { %6086 = vmatprep.mubr.msk.bf16.mxu1 %vm7220_vm1, %v7219_v9 }
 0x349   :  { %v7565_v10 = vpop.f32.mrb[8].mxu1 }
 0x34a   :  { %685 = vrot.lane.b32.xlu0 %v357_v11, %s7214_s1  ;;  %v559_v12 = vpop.f32.mrb[9].mxu1  ;;  %v570_v62 = vmul.f32 %v7565_v10, %v360_v55 }
 0x34b   :  { %v7568_v13 = vpack.c.bf16 %v559_v12, %v553_v7  ;;  %v7570_v14 = vpop.f32.mrb[10].mxu1 }
 0x34c   :  { %v7572_v15 = vpop.f32.mrb[11].mxu1  ;;  %v574_v16 = vpack.c.bf16 %v7570_v14, %v7565_v10 }
 0x34e   :  { %714 = vrot.lane.b32.xlu1 %v574_v16, %s7214_s1  ;;  %6087 = vmatmul.mubr.msk.bf16.gmra.mrb[20].mxu1 %vm387_vm0, %v574_v16  ;;  %v571_v16 = vmul.f32 %v7570_v14, %v361_v60 }
 0x352   :  { %683 = vrot.lane.b32.xlu1 %v356_v17, %s7214_s1 }
 0x3ae   :  { %v711_v18 = vpop.permute.xlu1 %710 }
 0x3af   :  { %6099 = vmatmul.mubr.msk.bf16.vlgmr.msra.gmra.mrb[12].mxu0 %vm387_vm0, %v711_v18 }
 0x3b0   :  { %6102 = vmatprep.mubr.msk.bf16.mxu0 %vm7220_vm1, %v7219_v9 }
 0x3b8   :  { %v713_v19 = vpop.permute.xlu0 %712 }
 0x3b9   :  { %6103 = vmatmul.mubr.msk.bf16.gmra.mrb[16].mxu0 %vm387_vm0, %v713_v19 }
 0x3ba   :  { %6106 = vmatprep.mubr.msk.bf16.mxu0 %vm7220_vm1, %v7219_v9 }
 0x3c0   :  { %v715_v20 = vpop.permute.xlu1 %714 }
 0x3c1   :  { %6107 = vmatmul.mubr.msk.bf16.gmra.mrb[20].mxu0 %vm387_vm0, %v715_v20 }
 0x40f   :  { %v642_v22 = vpop.f32.mrb[12].mxu1 }
 0x410   :  { %v665_v27 = vmul.f32 %v642_v22, %v362_v21  ;;  %v6080_v28 = vpop.f32.mrb[13].mxu1 }
 0x411   :  { %v645_v29 = vpop.f32.mrb[14].mxu1 }
 0x412   :  { %v671_v31 = vadd.f32 %v665_v27, %v566_v26  ;;  %v666_v32 = vmul.f32 %v645_v29, %v363_v25  ;;  %v6081_v33 = vpop.f32.mrb[15].mxu1 }
 0x414   :  { %v672_v34 = vadd.f32 %v666_v32, %v567_v30 }
 0x416   :  { %v7588_v36 = vpack.c.bf16 %v672_v34, %v671_v31 }
 0x418   :  { %6114 = vmatprep.mubr.msk.bf16.mxu1 %vm844_vm4, %v7588_v36 }
 0x419   :  { %v650_v41 = vpop.f32.mrb[16].mxu1 }
 0x41a   :  { %v667_v43 = vmul.f32 %v650_v41, %v364_v37  ;;  %v6084_v44 = vpop.f32.mrb[17].mxu1 }
 0x41b   :  { %v653_v47 = vpop.f32.mrb[18].mxu1 }
 0x41c   :  { %v668_v50 = vmul.f32 %v653_v47, %v365_v42  ;;  %v6085_v51 = vpop.f32.mrb[19].mxu1  ;;  %v7594_v52 = vadd.f32 %v667_v43, %v568_v46  ;;  %v7616_v43 = vpop.permute.xlu0 %685 }
 0x41d   :  { %v702_v46 = vmul.f32 %v7616_v43, %v7543_v63 }
 0x41e   :  { %v674_v53 = vadd.f32 %v668_v50, %v569_v49 }
 0x421   :  { %v658_v57 = vpop.f32.mrb[20].mxu1 }
 0x422   :  { %v669_v1 = vmul.f32 %v658_v57, %v366_v56  ;;  %v6088_v2 = vpop.f32.mrb[21].mxu1 }
 0x423   :  { %v661_v7 = vpop.f32.mrb[22].mxu1 }
 0x424   :  { %v675_v8 = vadd.f32 %v669_v1, %v570_v62  ;;  %v670_v11 = vmul.f32 %v661_v7, %v367_v59  ;;  %v6089_v12 = vpop.f32.mrb[23].mxu1 }
 0x426   :  { %v7598_v17 = vpack.c.bf16 %v675_v8, %v674_v53  ;;  %v7600_v18 = vadd.f32 %v670_v11, %v571_v16 }
 0x428   :  { %6122 = vmatprep.mubr.msk.bf16.mxu0 %vm844_vm4, %v7598_v17 }
 0x482   :  { %v759_v19 = vpop.f32.mrb[12].mxu0 }
 0x483   :  { %v782_v20 = vmul.f32 %v759_v19, %v362_v21  ;;  %v6100_v22 = vpop.f32.mrb[13].mxu0 }
 0x484   :  { %v762_v26 = vpop.f32.mrb[14].mxu0 }
 0x485   :  { %v783_v27 = vmul.f32 %v762_v26, %v363_v25  ;;  %v6101_v28 = vpop.f32.mrb[15].mxu0  ;;  %794 = vrot.lane.b32.xlu1 %v782_v20, %s7214_s1 }
 0x487   :  { %796 = vrot.lane.b32.xlu0 %v783_v27, %s7214_s1  ;;  %v7661_v27 = vpack.c.bf16 %v7594_v52, %v7594_v52 }
 0x489   :  { %687 = vrot.lane.b32.xlu1 %v358_v39, %s7214_s1 }
 0x48c   :  { %v767_v29 = vpop.f32.mrb[16].mxu0 }
 0x48d   :  { %v784_v30 = vmul.f32 %v767_v29, %v364_v37  ;;  %689 = vrot.lane.b32.xlu1 %v359_v40, %s7214_s1  ;;  %v6104_v31 = vpop.f32.mrb[17].mxu0  ;;  %v7665_v29 = vpack.c.bf16 %v7555_v5, %v7555_v5 }
 0x48e   :  { %v770_v32 = vpop.f32.mrb[18].mxu0 }
 0x48f   :  { %v785_v33 = vmul.f32 %v770_v32, %v365_v42  ;;  %798 = vrot.lane.b32.xlu0 %v784_v30, %s7214_s1  ;;  %v6105_v21 = vpop.f32.mrb[19].mxu0  ;;  %v7614_v42 = vpop.permute.xlu1 %683  ;;  %v1065_v5 = vsel %vm1063_vm5, %v7665_v29, 0  ;;  %v7681_v32 = vpack.c.bf16 %v7600_v18, %v7600_v18 }
 0x490   :  { %v701_v47 = vmul.f32 %v7614_v42, %v7541_v61 }
 0x491   :  { %800 = vrot.lane.b32.xlu1 %v785_v33, %s7214_s1  ;;  %v377_v33 = vshrl.u32 %v120_v23, 7 }
 0x493   :  { %691 = vrot.lane.b32.xlu0 %v360_v55, %s7214_s1  ;;  %v378_v21 = vadd.s32 8, %v377_v33  ;;  %vm7687_vm6 = vcmp.le.s32.totalorder %v7455_v24, %v377_v33 }
 0x494   :  { %v775_v25 = vpop.f32.mrb[20].mxu0 }
 0x495   :  { %v786_v34 = vmul.f32 %v775_v25, %v366_v56  ;;  %693 = vrot.lane.b32.xlu1 %v361_v60, %s7214_s1  ;;  %v6108_v41 = vpop.f32.mrb[21].mxu0  ;;  %vm7692_vm8 = vcmp.le.s32.totalorder %v7455_v24, %v378_v21 }
 0x496   :  { %v778_v39 = vpop.f32.mrb[22].mxu0 }
 0x497   :  { %802 = vrot.lane.b32.xlu0 %v786_v34, %s7214_s1  ;;  %v6109_v37 = vpop.f32.mrb[23].mxu0  ;;  %v787_v40 = vmul.f32 %v778_v39, %v367_v59  ;;  %v379_v34 = vadd.s32 16, %v377_v33 }
 0x499   :  { %vm7699_vm9 = vcmp.le.s32.totalorder %v7455_v24, %v379_v34 }
 0x49b   :  { %804 = vrot.lane.b32.xlu0 %v787_v40, %s7214_s1 }
 0x4f7   :  { %v795_v44 = vpop.permute.xlu1 %794 }
 0x4f8   :  { %v812_v50 = vadd.f32 %v795_v44, %v701_v47 }
 0x4f9   :  { %v797_v49 = vpop.permute.xlu0 %796 }
 0x4fa   :  { %v813_v51 = vadd.f32 %v797_v49, %v702_v46 }
 0x4fb   :  { %v7622_v53 = vpop.permute.xlu1 %687 }
 0x4fc   :  { %v7624_v55 = vpack.c.bf16 %v813_v51, %v812_v50  ;;  %v703_v57 = vmul.f32 %v7622_v53, %v7553_v4 }
 0x4fe   :  { %840 = vrot.lane.b32.xlu1 %v7624_v55, %s7214_s1 }
 0x4ff   :  { %v7628_v56 = vpop.permute.xlu1 %689 }
 0x500   :  { %v704_v1 = vmul.f32 %v7628_v56, %v7557_v6 }
 0x501   :  { %v799_v59 = vpop.permute.xlu0 %798 }
 0x502   :  { %v814_v63 = vadd.f32 %v799_v59, %v703_v57 }
 0x503   :  { %v801_v60 = vpop.permute.xlu1 %800 }
 0x504   :  { %v7632_v62 = vpack.c.bf16 %v814_v63, %v814_v63  ;;  %v815_v4 = vadd.f32 %v801_v60, %v704_v1 }
 0x505   :  { %v7634_v61 = vpop.permute.xlu0 %691 }
 0x506   :  { %842 = vrot.lane.b32.xlu0 %v7632_v62, %s7214_s1  ;;  %v705_v2 = vmul.f32 %v7634_v61, %v7565_v10 }
 0x507   :  { %v7642_v7 = vpop.permute.xlu1 %693 }
 0x508   :  { %v706_v12 = vmul.f32 %v7642_v7, %v7570_v14 }
 0x509   :  { %v803_v8 = vpop.permute.xlu0 %802 }
 0x50a   :  { %v816_v11 = vadd.f32 %v803_v8, %v705_v2 }
 0x50c   :  { %v7646_v16 = vpack.c.bf16 %v816_v11, %v815_v4 }
 0x50d   :  { %v805_v19 = vpop.permute.xlu0 %804 }
 0x50e   :  { %v817_v20 = vadd.f32 %v805_v19, %v706_v12  ;;  %907 = vrot.lane.b32.xlu1 %v7646_v16, %s7214_s1 }
 0x510   :  { %v7650_v22 = vpack.c.bf16 %v817_v20, %v817_v20 }
 0x512   :  { %909 = vrot.lane.b32.xlu0 %v7650_v22, %s7214_s1 }
 0x570   :  { %v841_v6 = vpop.permute.xlu1 %840 }
 0x571   :  { %6574 = vmatprep.subr.msk.bf16.mxu1 %vm844_vm4, %v841_v6  ;;  %v852_v10 = vsel %vm844_vm4, %v841_v6, 0 }
 0x572   :  { %6111 = vmatpush3.bf16.xpose.msra.mxu1 %v852_v10 }
 0x578   :  { %v843_v26 = vpop.permute.xlu0 %842 }
 0x579   :  { %6575 = vmatprep.subr.msk.bf16.mxu1 %vm844_vm4, %v843_v26  ;;  %v855_v14 = vsel %vm844_vm4, %v843_v26, 0 }
 0x57a   :  { %6113 = vmatpush3.bf16.xpose.msra.mxu1 %v855_v14 }
 0x57b   :  { %6126 = vmatprep.subr.bf16.mxu1 %v7547_v3 }
 0x580   :  { %v908_v28 = vpop.permute.xlu1 %907 }
 0x581   :  { %6115 = vmatmul.mubr.msk.bf16.vlgmr.msra.gmra.mrb[24].mxu1 %vm844_vm4, %v7661_v27  ;;  %6576 = vmatprep.subr.msk.bf16.mxu0 %vm844_vm4, %v908_v28  ;;  %v918_v30 = vsel %vm844_vm4, %v908_v28, 0 }
 0x582   :  { %6119 = vmatpush3.bf16.xpose.msra.mxu0 %v918_v30  ;;  %6127 = vmatpush3.bf16.msra.mxu1 %v7547_v3 }
 0x583   :  { %6578 = vmatprep.subr.msk.bf16.mxu1 %vm1063_vm5, %v7665_v29 }
 0x584   :  { %v910_v52 = vpop.permute.xlu0 %909 }
 0x585   :  { %6577 = vmatprep.subr.msk.bf16.mxu0 %vm844_vm4, %v910_v52  ;;  %v921_v31 = vsel %vm844_vm4, %v910_v52, 0 }
 0x586   :  { %6129 = vmatpush3.bf16.msra.mxu1 %v1065_v5 }
 0x587   :  { %6134 = vmatprep.subr.bf16.mxu1 %v7568_v13 }
 0x58a   :  { %6121 = vmatpush3.bf16.xpose.msra.mxu0 %v921_v31 }
 0x591   :  { %6123 = vmatmul.mubr.msk.bf16.vlgmr.msra.gmra.mrb[24].mxu0 %vm844_vm4, %v7681_v32 }
 0x654   :  { %v6116_v25 = vpop.f32.mrb[24].mxu1 }
 0x655   :  { %v891_v39 = vpop.f32.mrb[25].mxu1  ;;  %v973_v46 = vmul.f32 0.25, %v6116_v25 }
 0x656   :  { %v971_v37 = vmul.f32 0.25, %v891_v39  ;;  %v6117_v40 = vpop.f32.mrb[26].mxu1 }
 0x657   :  { %v894_v44 = vpop.f32.mrb[27].mxu1  ;;  %v982_v59 = vsel %vm7699_vm9, %v973_v46, -1e+30 }
 0x658   :  { %v972_v23 = vmul.f32 0.25, %v894_v44  ;;  %v980_v47 = vsel %vm7687_vm6, %v971_v37, -1e+30  ;;  %v993_v63 = vsel %vm986_vm7, %v982_v59, -inf }
 0x659   :  { %v987_v50 = vsel %vm986_vm7, %v980_v47, -inf }
 0x65a   :  { %988 = vmax.xlane.f32.xlu1 %v987_v50  ;;  %v981_v51 = vsel %vm7692_vm8, %v972_v23, -1e+30 }
 0x65b   :  { %v990_v57 = vsel %vm986_vm7, %v981_v51, -inf }
 0x65c   :  { %991 = vmax.xlane.f32.xlu0 %v990_v57 }
 0x660   :  { %994 = vmax.xlane.f32.xlu0 %v993_v63 }
 0x664   :  { %v6124_v60 = vpop.f32.mrb[24].mxu0 }
 0x665   :  { %v957_v24 = vpop.f32.mrb[25].mxu0  ;;  %v976_v1 = vmul.f32 0.25, %v6124_v60 }
 0x666   :  { %v974_v2 = vmul.f32 0.25, %v957_v24  ;;  %v6125_v8 = vpop.f32.mrb[26].mxu0 }
 0x667   :  { %v960_v4 = vpop.f32.mrb[27].mxu0  ;;  %v985_v6 = vsel %vm7699_vm9, %v976_v1, -1e+30 }
 0x668   :  { %v975_v11 = vmul.f32 0.25, %v960_v4  ;;  %v983_v12 = vsel %vm7687_vm6, %v974_v2, -1e+30  ;;  %v1002_v26 = vsel %vm986_vm7, %v985_v6, -inf }
 0x669   :  { %v996_v19 = vsel %vm986_vm7, %v983_v12, -inf }
 0x66a   :  { %997 = vmax.xlane.f32.xlu1 %v996_v19  ;;  %v984_v20 = vsel %vm7692_vm8, %v975_v11, -1e+30 }
 0x66b   :  { %v999_v10 = vsel %vm986_vm7, %v984_v20, -inf }
 0x66c   :  { %1000 = vmax.xlane.f32.xlu0 %v999_v10 }
 0x66e   :  { %1003 = vmax.xlane.f32.xlu1 %v1002_v26 }
 0x6e7   :  { %v989_v14 = vpop.xlane.xlu1 %988 }
 0x6e8   :  { %v1005_v52 = vsub.f32 %v980_v47, %v989_v14 }
 0x6e9   :  { %v992_v28 = vpop.xlane.xlu0 %991 }
 0x6ea   :  { %v1006_v30 = vsub.f32 %v981_v51, %v992_v28  ;;  %v1011_v21 = vmul.f32 1.442695, %v1005_v52 }
 0x6ec   :  { %v1013_v5 = vmul.f32 1.442695, %v1006_v30 }
 0x6ed   :  { %v995_v31 = vpop.xlane.xlu0 %994 }
 0x6ee   :  { %6762 = vpow2.f32 %v1013_v5  ;;  %v1007_v33 = vsub.f32 %v982_v59, %v995_v31 }
 0x6f0   :  { %v1015_v25 = vmul.f32 1.442695, %v1007_v33 }
 0x6f2   :  { %6764 = vpow2.f32 %v1015_v25 }
 0x6f3   :  { %6766 = vpow2.f32 %v1011_v21 }
 0x6f7   :  { %v998_v34 = vpop.xlane.xlu1 %997 }
 0x6f8   :  { %v6763_v39 = vpop.eup %6762  ;;  %v1008_v44 = vsub.f32 %v983_v12, %v998_v34 }
 0x6f9   :  { %v1001_v37 = vpop.xlane.xlu0 %1000  ;;  %v1026_v40 = vsel %vm986_vm7, %v6763_v39, 0.0 }
 0x6fa   :  { %v1009_v46 = vsub.f32 %v984_v20, %v1001_v37  ;;  %1027 = vadd.xlane.f32.xlu1 %v1026_v40  ;;  %v1017_v59 = vmul.f32 1.442695, %v1008_v44  ;;  %v7749_v44 = vpack.c.bf16 %v7572_v15, %v7572_v15 }
 0x6fb   :  { %v1004_v23 = vpop.xlane.xlu1 %1003 }
 0x6fc   :  { %v6765_v50 = vpop.eup %6764  ;;  %v1019_v51 = vmul.f32 1.442695, %v1009_v46  ;;  %v1010_v47 = vsub.f32 %v985_v6, %v1004_v23  ;;  %v1122_v46 = vsel %vm1063_vm5, %v7749_v44, 0 }
 0x6fd   :  { %v1029_v57 = vsel %vm986_vm7, %v6765_v50, 0.0  ;;  %v6767_v63 = vpop.eup %6766 }
 0x6fe   :  { %6768 = vpow2.f32 %v1019_v51  ;;  %v1021_v60 = vmul.f32 1.442695, %v1010_v47  ;;  %1030 = vadd.xlane.f32.xlu0 %v1029_v57  ;;  %v1023_v24 = vsel %vm986_vm7, %v6767_v63, 0.0 }
 0x700   :  { %6770 = vpow2.f32 %v1021_v60 }
 0x701   :  { %6772 = vpow2.f32 %v1017_v59 }
 0x702   :  { %1024 = vadd.xlane.f32.xlu0 %v1023_v24 }
 0x708   :  { %v7722_v1 = vpop.eup %6768 }
 0x709   :  { %v1035_v2 = vsel %vm986_vm7, %v7722_v1, 0.0 }
 0x70a   :  { %v6771_v8 = vpop.eup %6770  ;;  %1036 = vadd.xlane.f32.xlu0 %v1035_v2 }
 0x70b   :  { %v1038_v4 = vsel %vm986_vm7, %v6771_v8, 0.0  ;;  %v6773_v11 = vpop.eup %6772 }
 0x70c   :  { %1039 = vadd.xlane.f32.xlu1 %v1038_v4  ;;  %v1032_v12 = vsel %vm986_vm7, %v6773_v11, 0.0 }
 0x710   :  { %1033 = vadd.xlane.f32.xlu1 %v1032_v12 }
 0x720   :  { %1181 = vrot.lane.b32.xlu0 %v7624_v55, %s7221_s27 }
 0x721   :  { %1183 = vrot.lane.b32.xlu1 %v7632_v62, %s7221_s27 }
 0x724   :  { %1177 = vrot.lane.b32.xlu0 %v7588_v36, %s7222_s3 }
 0x725   :  { %1251 = vrot.lane.b32.xlu1 %v7646_v16, %s7221_s27 }
 0x728   :  { %1253 = vrot.lane.b32.xlu0 %v7650_v22, %s7221_s27 }
 0x729   :  { %1179 = vrot.lane.b32.xlu1 %v7661_v27, %s7222_s3 }
 0x72c   :  { %1249 = vrot.lane.b32.xlu0 %v7681_v32, %s7222_s3 }
 0x72d   :  { %1247 = vrot.lane.b32.xlu1 %v7598_v17, %s7222_s3 }
 0x787   :  { %v1028_v19 = vpop.xlane.xlu1 %1027 }
 0x78b   :  { %v1031_v20 = vpop.xlane.xlu0 %1030 }
 0x78c   :  { %6774 = vrcp.f32 %v1031_v20 }
 0x78d   :  { %6776 = vrcp.f32 %v1028_v19 }
 0x78f   :  { %v1025_v6 = vpop.xlane.xlu0 %1024 }
 0x790   :  { %6778 = vrcp.f32 %v1025_v6 }
 0x796   :  { %v6775_v10 = vpop.eup %6774 }
 0x797   :  { %v1037_v26 = vpop.xlane.xlu0 %1036  ;;  %v6777_v14 = vpop.eup %6776  ;;  %v1049_v52 = vmul.f32 %v6775_v10, %v6765_v50 }
 0x798   :  { %v1048_v33 = vmul.f32 %v6777_v14, %v6763_v39 }
 0x799   :  { %v1040_v28 = vpop.xlane.xlu1 %1039  ;;  %v1054_v37 = vpack.c.bf16 %v1049_v52, %v1049_v52 }
 0x79a   :  { %v6779_v30 = vpop.eup %6778  ;;  %6780 = vrcp.f32 %v1040_v28 }
 0x79b   :  { %v1182_v5 = vpop.permute.xlu0 %1181  ;;  %v1047_v31 = vmul.f32 %v6779_v30, %v6767_v63  ;;  %6782 = vrcp.f32 %v1037_v26 }
 0x79c   :  { %6580 = vmatprep.subr.msk.bf16.mxu0 %vm844_vm4, %v1182_v5  ;;  %v1192_v21 = vsel %vm844_vm4, %v1182_v5, 0 }
 0x79d   :  { %v1034_v25 = vpop.xlane.xlu1 %1033  ;;  %6143 = vmatpush3.bf16.xpose.msra.mxu0 %v1192_v21  ;;  %v1053_v34 = vpack.c.bf16 %v1048_v33, %v1047_v31 }
 0x79e   :  { %6784 = vrcp.f32 %v1034_v25 }
 0x79f   :  { %6130 = vmatprep.mubr.msk.bf16.mxu1 %vm986_vm7, %v1053_v34  ;;  %v1178_v40 = vpop.permute.xlu0 %1177 }
 0x7a0   :  { %6131 = vmatmul.mubr.msk.bf16.vlgmr.msra.gmra.mrb[28].mxu1 %vm986_vm7, %v1054_v37  ;;  %6146 = vmatprep.mubr.msk.bf16.mxu0 %vm844_vm4, %v1178_v40 }
 0x7a1   :  { %6135 = vmatpush3.bf16.msra.mxu1 %v7568_v13  ;;  %v1184_v39 = vpop.permute.xlu1 %1183 }
 0x7a2   :  { %6579 = vmatprep.subr.msk.bf16.mxu1 %vm1063_vm5, %v7749_v44  ;;  %6581 = vmatprep.subr.msk.bf16.mxu0 %vm844_vm4, %v1184_v39  ;;  %v1195_v23 = vsel %vm844_vm4, %v1184_v39, 0 }
 0x7a3   :  { %v1254_v19 = vpop.permute.xlu0 %1253 }
 0x7a4   :  { %v6781_v50 = vpop.eup %6780 }
 0x7a5   :  { %6137 = vmatpush3.bf16.msra.mxu1 %v1122_v46  ;;  %v1252_v15 = vpop.permute.xlu1 %1251  ;;  %6145 = vmatpush3.bf16.xpose.msra.mxu0 %v1195_v23  ;;  %v6783_v51 = vpop.eup %6782  ;;  %v1052_v57 = vmul.f32 %v6781_v50, %v6771_v8  ;;  %v1265_v8 = vsel %vm844_vm4, %v1254_v19, 0 }
 0x7a6   :  { %6582 = vmatprep.subr.msk.bf16.mxu1 %vm844_vm4, %v1252_v15  ;;  %v1051_v60 = vmul.f32 %v6783_v51, %v7722_v1  ;;  %v1262_v12 = vsel %vm844_vm4, %v1252_v15, 0 }
 0x7a7   :  { %v1056_v2 = vpack.c.bf16 %v1052_v57, %v1052_v57  ;;  %v1250_v1 = vpop.permute.xlu0 %1249 }
 0x7a8   :  { %v6785_v47 = vpop.eup %6784 }
 0x7a9   :  { %v1180_v63 = vpop.permute.xlu1 %1179  ;;  %v1050_v59 = vmul.f32 %v6785_v47, %v6773_v11 }
 0x7ab   :  { %v1055_v24 = vpack.c.bf16 %v1051_v60, %v1050_v59 }
 0x7ac   :  { %6147 = vmatmul.mubr.msk.bf16.vlgmr.msra.gmra.mrb[28].mxu0 %vm844_vm4, %v1180_v63 }
 0x7ad   :  { %v1248_v4 = vpop.permute.xlu1 %1247  ;;  %6138 = vmatprep.mubr.msk.bf16.mxu1 %vm986_vm7, %v1055_v24 }
 0x7ae   :  { %6139 = vmatmul.mubr.msk.bf16.vlgmr.msra.gmra.mrb[32].mxu1 %vm986_vm7, %v1056_v2 }
 0x7af   :  { %6151 = vmatpush3.bf16.xpose.msra.mxu1 %v1262_v12  ;;  %6154 = vmatprep.mubr.msk.bf16.mxu1 %vm844_vm4, %v1248_v4 }
 0x7b0   :  { %6583 = vmatprep.subr.msk.bf16.mxu1 %vm844_vm4, %v1254_v19 }
 0x7b7   :  { %6153 = vmatpush3.bf16.xpose.msra.mxu1 %v1265_v8 }
 0x7be   :  { %6155 = vmatmul.mubr.msk.bf16.vlgmr.msra.gmra.mrb[36].mxu1 %vm844_vm4, %v1250_v1 }
 0x873   :  { %v7770_v11 = vpop.f32.mrb[28].mxu1 }
 0x874   :  { %v7772_v20 = vpop.f32.mrb[29].mxu1 }
 0x875   :  { %v6133_v6 = vpop.f32.mrb[30].mxu1 }
 0x876   :  { %v7774_v10 = vpop.f32.mrb[31].mxu1 }
 0x877   :  { %v1172_v26 = vpack.c.bf16 %v7774_v10, %v7772_v20 }
 0x87f   :  { %v6148_v14 = vpop.f32.mrb[28].mxu0 }
 0x880   :  { %v1231_v28 = vpop.f32.mrb[29].mxu0  ;;  %v1317_v21 = vmul.f32 0.25, %v6148_v14 }
 0x881   :  { %v1315_v30 = vmul.f32 0.25, %v1231_v28  ;;  %v7778_v52 = vpop.f32.mrb[32].mxu1  ;;  %v6149_v5 = vpop.f32.mrb[30].mxu0 }
 0x882   :  { %v7780_v31 = vpop.f32.mrb[33].mxu1  ;;  %v1234_v33 = vpop.f32.mrb[31].mxu0  ;;  %v1323_v51 = vsel %vm7699_vm9, %v1317_v21, -1e+30 }
 0x883   :  { %v1173_v25 = vpack.c.bf16 %v7780_v31, %v7770_v11  ;;  %v1316_v34 = vmul.f32 0.25, %v1234_v33  ;;  %v6141_v37 = vpop.f32.mrb[34].mxu1  ;;  %v1321_v40 = vsel %vm7687_vm6, %v1315_v30, -1e+30  ;;  %v1333_v47 = vsel %vm986_vm7, %v1323_v51, -inf }
 0x884   :  { %v7786_v39 = vpop.f32.mrb[35].mxu1  ;;  %v1327_v46 = vsel %vm986_vm7, %v1321_v40, -inf }
 0x885   :  { %v1174_v23 = vpack.c.bf16 %v7778_v52, %v7786_v39  ;;  %1328 = vmax.xlane.f32.xlu1 %v1327_v46  ;;  %v1322_v50 = vsel %vm7692_vm8, %v1316_v34, -1e+30 }
 0x886   :  { %v1330_v15 = vsel %vm986_vm7, %v1322_v50, -inf }
 0x887   :  { %1331 = vmax.xlane.f32.xlu0 %v1330_v15 }
 0x88b   :  { %1334 = vmax.xlane.f32.xlu0 %v1333_v47 }
 0x891   :  { %v6156_v57 = vpop.f32.mrb[36].mxu1 }
 0x892   :  { %v1301_v63 = vpop.f32.mrb[37].mxu1  ;;  %v1320_v59 = vmul.f32 0.25, %v6156_v57 }
 0x893   :  { %v1318_v60 = vmul.f32 0.25, %v1301_v63  ;;  %v6157_v24 = vpop.f32.mrb[38].mxu1 }
 0x894   :  { %v1304_v2 = vpop.f32.mrb[39].mxu1  ;;  %v1326_v1 = vsel %vm7699_vm9, %v1320_v59, -1e+30 }
 0x895   :  { %v1319_v4 = vmul.f32 0.25, %v1304_v2  ;;  %v1324_v12 = vsel %vm7687_vm6, %v1318_v60, -1e+30  ;;  %v1342_v14 = vsel %vm986_vm7, %v1326_v1, -inf }
 0x896   :  { %v1336_v19 = vsel %vm986_vm7, %v1324_v12, -inf }
 0x897   :  { %1337 = vmax.xlane.f32.xlu1 %v1336_v19  ;;  %v1325_v8 = vsel %vm7692_vm8, %v1319_v4, -1e+30 }
 0x898   :  { %v1339_v6 = vsel %vm986_vm7, %v1325_v8, -inf }
 0x899   :  { %1340 = vmax.xlane.f32.xlu0 %v1339_v6 }
 0x89b   :  { %1343 = vmax.xlane.f32.xlu1 %v1342_v14 }
 0x912   :  { %v1329_v28 = vpop.xlane.xlu1 %1328 }
 0x913   :  { %v1345_v30 = vsub.f32 %v1321_v40, %v1329_v28 }
 0x914   :  { %v1332_v5 = vpop.xlane.xlu0 %1331 }
 0x915   :  { %v1351_v33 = vmul.f32 1.442695, %v1345_v30  ;;  %v1346_v21 = vsub.f32 %v1322_v50, %v1332_v5 }
 0x917   :  { %6786 = vpow2.f32 %v1351_v33  ;;  %v1353_v34 = vmul.f32 1.442695, %v1346_v21 }
 0x918   :  { %v1335_v37 = vpop.xlane.xlu0 %1334 }
 0x919   :  { %6788 = vpow2.f32 %v1353_v34  ;;  %v1347_v46 = vsub.f32 %v1323_v51, %v1335_v37 }
 0x91b   :  { %v1355_v15 = vmul.f32 1.442695, %v1347_v46 }
 0x91d   :  { %6790 = vpow2.f32 %v1355_v15 }
 0x921   :  { %v6787_v47 = vpop.eup %6786 }
 0x922   :  { %v1363_v57 = vsel %vm986_vm7, %v6787_v47, 0.0 }
 0x923   :  { %v6789_v63 = vpop.eup %6788  ;;  %1364 = vadd.xlane.f32.xlu0 %v1363_v57 }
 0x924   :  { %v1366_v59 = vsel %vm986_vm7, %v6789_v63, 0.0  ;;  %v1338_v50 = vpop.xlane.xlu1 %1337 }
 0x925   :  { %1367 = vadd.xlane.f32.xlu1 %v1366_v59  ;;  %v1348_v4 = vsub.f32 %v1324_v12, %v1338_v50 }
 0x926   :  { %v1341_v2 = vpop.xlane.xlu0 %1340 }
 0x927   :  { %v6791_v60 = vpop.eup %6790  ;;  %v1349_v19 = vsub.f32 %v1325_v8, %v1341_v2  ;;  %v1357_v14 = vmul.f32 1.442695, %v1348_v4 }
 0x928   :  { %v1369_v40 = vsel %vm986_vm7, %v6791_v60, 0.0  ;;  %v1344_v51 = vpop.xlane.xlu1 %1343 }
 0x929   :  { %1370 = vadd.xlane.f32.xlu0 %v1369_v40  ;;  %v1350_v24 = vsub.f32 %v1326_v1, %v1344_v51  ;;  %v1359_v28 = vmul.f32 1.442695, %v1349_v19  ;;  %v6678_v19 = vld [vmem:[%s8984_s7 + $0x8] sm:$0xff]  }
 0x92b   :  { %v1361_v6 = vmul.f32 1.442695, %v1350_v24 }
 0x92d   :  { %6792 = vpow2.f32 %v1361_v6 }
 0x92e   :  { %6794 = vpow2.f32 %v1357_v14 }
 0x92f   :  { %6796 = vpow2.f32 %v1359_v28 }
 0x936   :  { %1401 = vrot.lane.b32.xlu1 %v7665_v29, %s7222_s3 }
 0x937   :  { %v7813_v30 = vpop.eup %6792 }
 0x938   :  { %v7815_v5 = vpop.eup %6794  ;;  %v1378_v33 = vsel %vm986_vm7, %v7813_v30, 0.0 }
 0x939   :  { %v7819_v21 = vpop.eup %6796  ;;  %v1372_v12 = vsel %vm986_vm7, %v7815_v5, 0.0 }
 0x93a   :  { %v1375_v8 = vsel %vm986_vm7, %v7819_v21, 0.0 }
 0x93f   :  { %1399 = vrot.lane.b32.xlu0 %v7547_v3, %s7222_s3 }
 0x95a   :  { %1379 = vadd.xlane.f32.xlu1 %v1378_v33 }
 0x95e   :  { %1373 = vadd.xlane.f32.xlu1 %v1372_v12  ;;  %1376 = vadd.xlane.f32.xlu0 %v1375_v8 }
 0x96f   :  { %1463 = vrot.lane.b32.xlu1 %v7568_v13, %s7222_s3 }
 0x973   :  { %1676 = vrot.lane.b32.xlu1 %v7624_v55, %s7223_s24 }
 0x974   :  { %1465 = vrot.lane.b32.xlu0 %v7749_v44, %s7222_s3 }
 0x977   :  { %1744 = vrot.lane.b32.xlu1 %v7646_v16, %s7223_s24 }
 0x978   :  { %1678 = vrot.lane.b32.xlu0 %v7632_v62, %s7223_s24 }
 0x97b   :  { %1674 = vrot.lane.b32.xlu1 %v7661_v27, %s7224_s29 }
 0x97c   :  { %1672 = vrot.lane.b32.xlu0 %v7588_v36, %s7224_s29 }
 0x97f   :  { %1740 = vrot.lane.b32.xlu1 %v7598_v17, %s7224_s29 }
 0x980   :  { %1746 = vrot.lane.b32.xlu0 %v7650_v22, %s7223_s24 }
 0x984   :  { %1742 = vrot.lane.b32.xlu0 %v7681_v32, %s7224_s29 }
 0x9b0   :  { %v1365_v1 = vpop.xlane.xlu0 %1364 }
 0x9b1   :  { %6798 = vrcp.f32 %v1365_v1 }
 0x9b2   :  { %v1368_v34 = vpop.xlane.xlu1 %1367 }
 0x9b3   :  { %6800 = vrcp.f32 %v1368_v34 }
 0x9b6   :  { %v1371_v37 = vpop.xlane.xlu0 %1370  ;;  %v1402_v57 = vpop.permute.xlu1 %1401 }
 0x9b7   :  { %6802 = vrcp.f32 %v1371_v37  ;;  %v1411_v51 = vsel %vm1063_vm5, %v1402_v57, 0 }
 0x9ba   :  { %v1400_v46 = vpop.permute.xlu0 %1399 }
 0x9bb   :  { %v6799_v15 = vpop.eup %6798  ;;  %6158 = vmatprep.subr.bf16.mxu0 %v1400_v46 }
 0x9bc   :  { %6159 = vmatpush3.bf16.msra.mxu0 %v1400_v46  ;;  %v1387_v40 = vmul.f32 %v6799_v15, %v6787_v47 }
 0x9bd   :  { %v6801_v59 = vpop.eup %6800  ;;  %6584 = vmatprep.subr.msk.bf16.mxu0 %vm1063_vm5, %v1402_v57 }
 0x9be   :  { %v1388_v50 = vmul.f32 %v6801_v59, %v6789_v63  ;;  %v6679_v59 = vld [vmem:[%s8984_s7] sm:$0xff]  }
 0x9c0   :  { %6161 = vmatpush3.bf16.msra.mxu0 %v1411_v51  ;;  %v1393_v24 = vpack.c.bf16 %v1388_v50, %v1387_v40 }
 0x9c1   :  { %v6803_v2 = vpop.eup %6802  ;;  %6174 = vmatprep.subr.bf16.mxu0 %v7219_v9 }
 0x9c2   :  { %6162 = vmatprep.mubr.msk.bf16.mxu0 %vm986_vm7, %v1393_v24  ;;  %v1389_v4 = vmul.f32 %v6803_v2, %v6791_v60 }
 0x9c4   :  { %v1394_v6 = vpack.c.bf16 %v1389_v4, %v1389_v4 }
 0x9c6   :  { %6163 = vmatmul.mubr.msk.bf16.vlgmr.msra.gmra.mrb[32].mxu0 %vm986_vm7, %v1394_v6 }
 0x9c7   :  { %6175 = vmatpush3.bf16.msra.mxu0 %v6678_v19  ;;  %6176 = vmatprep.mubr.msk.bf16.mxu0 %vm7220_vm1, %v7219_v9 }
 0x9e7   :  { %v1380_v47 = vpop.xlane.xlu1 %1379 }
 0x9e8   :  { %6804 = vrcp.f32 %v1380_v47 }
 0x9eb   :  { %v1374_v63 = vpop.xlane.xlu1 %1373  ;;  %v1377_v14 = vpop.xlane.xlu0 %1376 }
 0x9ec   :  { %6806 = vrcp.f32 %v1374_v63 }
 0x9ed   :  { %6808 = vrcp.f32 %v1377_v14 }
 0x9ef   :  { %v1464_v28 = vpop.permute.xlu1 %1463  ;;  %v1466_v60 = vpop.permute.xlu0 %1465 }
 0x9f0   :  { %6166 = vmatprep.subr.bf16.mxu1 %v1464_v28  ;;  %v1475_v8 = vsel %vm1063_vm5, %v1466_v60, 0 }
 0x9f1   :  { %6167 = vmatpush3.bf16.msra.mxu1 %v1464_v28 }
 0x9f2   :  { %6585 = vmatprep.subr.msk.bf16.mxu1 %vm1063_vm5, %v1466_v60  ;;  %v6805_v12 = vpop.eup %6804 }
 0x9f3   :  { %v1677_v33 = vpop.permute.xlu1 %1676  ;;  %v1392_v46 = vmul.f32 %v6805_v12, %v7813_v30  ;;  %v1679_v40 = vpop.permute.xlu0 %1678 }
 0x9f4   :  { %6586 = vmatprep.subr.msk.bf16.mxu0 %vm844_vm4, %v1677_v33  ;;  %v1687_v19 = vsel %vm844_vm4, %v1677_v33, 0  ;;  %v1690_v52 = vsel %vm844_vm4, %v1679_v40, 0 }
 0x9f5   :  { %6169 = vmatpush3.bf16.msra.mxu1 %v1475_v8  ;;  %v1396_v50 = vpack.c.bf16 %v1392_v46, %v1392_v46 }
 0x9f6   :  { %v6807_v1 = vpop.eup %6806  ;;  %6188 = vmatprep.subr.bf16.mxu1 %v7219_v9 }
 0x9f7   :  { %v6809_v34 = vpop.eup %6808  ;;  %v1390_v37 = vmul.f32 %v6807_v1, %v7815_v5  ;;  %v1745_v51 = vpop.permute.xlu1 %1744 }
 0x9f8   :  { %v1391_v15 = vmul.f32 %v6809_v34, %v7819_v21  ;;  %v1673_v30 = vpop.permute.xlu0 %1672  ;;  %v1755_v5 = vsel %vm844_vm4, %v1745_v51, 0 }
 0x9fa   :  { %v1395_v57 = vpack.c.bf16 %v1391_v15, %v1390_v37 }
 0x9fb   :  { %v1675_v20 = vpop.permute.xlu1 %1674 }
 0x9fc   :  { %6170 = vmatprep.mubr.msk.bf16.mxu1 %vm986_vm7, %v1395_v57  ;;  %v1747_v21 = vpop.permute.xlu0 %1746 }
 0x9fd   :  { %6171 = vmatmul.mubr.msk.bf16.vlgmr.msra.gmra.mrb[40].mxu1 %vm986_vm7, %v1396_v50  ;;  %v1758_v24 = vsel %vm844_vm4, %v1747_v21, 0 }
 0x9fe   :  { %6189 = vmatpush3.bf16.msra.mxu1 %v6679_v59  ;;  %6190 = vmatprep.mubr.msk.bf16.mxu1 %vm7220_vm1, %v7219_v9 }
 0x9ff   :  { %6588 = vmatprep.subr.msk.bf16.mxu1 %vm844_vm4, %v1745_v51  ;;  %v1741_v10 = vpop.permute.xlu1 %1740 }
 0xa05   :  { %6191 = vmatmul.mubr.msk.bf16.vlgmr.msra.gmra.mrb[44].mxu1 %vm844_vm4, %v1172_v26  ;;  %v1743_v26 = vpop.permute.xlu0 %1742 }
 0xa06   :  { %6194 = vmatprep.mubr.msk.bf16.mxu1 %vm7220_vm1, %v7219_v9 }
 0xa07   :  { %6211 = vmatpush3.bf16.xpose.msra.mxu1 %v1755_v5 }
 0xa08   :  { %6589 = vmatprep.subr.msk.bf16.mxu1 %vm844_vm4, %v1747_v21 }
 0xa0d   :  { %6195 = vmatmul.mubr.msk.bf16.gmra.mrb[48].mxu1 %vm844_vm4, %v1173_v25 }
 0xa0e   :  { %6198 = vmatprep.mubr.msk.bf16.mxu1 %vm7220_vm1, %v7219_v9 }
 0xa0f   :  { %6213 = vmatpush3.bf16.xpose.msra.mxu1 %v1758_v24 }
 0xa15   :  { %6199 = vmatmul.mubr.msk.bf16.gmra.mrb[52].mxu1 %vm844_vm4, %v1174_v23 }
 0xa16   :  { %6214 = vmatprep.mubr.msk.bf16.mxu1 %vm844_vm4, %v1741_v10 }
 0xa1d   :  { %6215 = vmatmul.mubr.msk.bf16.vlgmr.msra.gmra.mrb[56].mxu1 %vm844_vm4, %v1743_v26 }
 0xa99   :  { %v6164_v11 = vpop.f32.mrb[32].mxu0 }
 0xa9a   :  { %v1447_v31 = vpop.f32.mrb[33].mxu0 }
 0xa9b   :  { %v6165_v25 = vpop.f32.mrb[34].mxu0 }
 0xa9c   :  { %v1450_v2 = vpop.f32.mrb[35].mxu0 }
 0xa9d   :  { %v1525_v4 = vpack.c.bf16 %v1450_v2, %v1447_v31 }
 0xa9f   :  { %6177 = vmatmul.mubr.msk.bf16.vlgmr.msra.gmra.mrb[36].mxu0 %vm844_vm4, %v1525_v4 }
 0xaa0   :  { %6203 = vmatpush3.bf16.xpose.msra.mxu0 %v1687_v19  ;;  %6180 = vmatprep.mubr.msk.bf16.mxu0 %vm7220_vm1, %v7219_v9 }
 0xaa1   :  { %6587 = vmatprep.subr.msk.bf16.mxu0 %vm844_vm4, %v1679_v40 }
 0xaa8   :  { %6205 = vmatpush3.bf16.xpose.msra.mxu0 %v1690_v52 }
 0xad0   :  { %v6172_v39 = vpop.f32.mrb[40].mxu1 }
 0xad1   :  { %v1511_v23 = vpop.f32.mrb[41].mxu1 }
 0xad2   :  { %v1526_v6 = vpack.c.bf16 %v1511_v23, %v6164_v11  ;;  %v6173_v47 = vpop.f32.mrb[42].mxu1 }
 0xad3   :  { %v1514_v63 = vpop.f32.mrb[43].mxu1 }
 0xad4   :  { %v1527_v14 = vpack.c.bf16 %v6172_v39, %v1514_v63  ;;  %6181 = vmatmul.mubr.msk.bf16.gmra.mrb[40].mxu0 %vm844_vm4, %v1526_v6 }
 0xad5   :  { %6184 = vmatprep.mubr.msk.bf16.mxu0 %vm7220_vm1, %v7219_v9 }
 0xad8   :  { %v1649_v28 = vpop.f32.mrb[44].mxu1 }
 0xad9   :  { %v6192_v60 = vpop.f32.mrb[45].mxu1 }
 0xada   :  { %v1652_v33 = vpop.f32.mrb[46].mxu1 }
 0xadb   :  { %v6193_v12 = vpop.f32.mrb[47].mxu1 }
 0xadc   :  { %6185 = vmatmul.mubr.msk.bf16.gmra.mrb[44].mxu0 %vm844_vm4, %v1527_v14 }
 0xadd   :  { %6206 = vmatprep.mubr.msk.bf16.mxu0 %vm844_vm4, %v1673_v30 }
 0xae0   :  { %v1657_v8 = vpop.f32.mrb[48].mxu1 }
 0xae1   :  { %v6196_v1 = vpop.f32.mrb[49].mxu1 }
 0xae2   :  { %v1660_v34 = vpop.f32.mrb[50].mxu1 }
 0xae3   :  { %v6197_v37 = vpop.f32.mrb[51].mxu1 }
 0xae4   :  { %6207 = vmatmul.mubr.msk.bf16.vlgmr.msra.gmra.mrb[48].mxu0 %vm844_vm4, %v1675_v20 }
 0xae8   :  { %v1665_v46 = vpop.f32.mrb[52].mxu1 }
 0xae9   :  { %v6200_v15 = vpop.f32.mrb[53].mxu1 }
 0xaea   :  { %v1668_v57 = vpop.f32.mrb[54].mxu1 }
 0xaeb   :  { %v6201_v59 = vpop.f32.mrb[55].mxu1 }
 0xaf0   :  { %v6216_v40 = vpop.f32.mrb[56].mxu1 }
 0xaf1   :  { %v1794_v50 = vpop.f32.mrb[57].mxu1 }
 0xaf2   :  { %v6217_v51 = vpop.f32.mrb[58].mxu1  ;;  %v1811_v60 = vmul.f32 0.25, %v1794_v50 }
 0xaf3   :  { %v1797_v5 = vpop.f32.mrb[59].mxu1 }
 0xaf4   :  { %v1817_v59 = vsel %vm7687_vm6, %v1811_v60, -1e+30  ;;  %v1812_v51 = vmul.f32 0.25, %v1797_v5 }
 0xb72   :  { %v1577_v21 = vpop.f32.mrb[36].mxu0 }
 0xb73   :  { %v7903_v24 = vadd.f32 %v1649_v28, %v1577_v21  ;;  %v6178_v10 = vpop.f32.mrb[37].mxu0 }
 0xb74   :  { %v1580_v26 = vpop.f32.mrb[38].mxu0  ;;  %v1829_v10 = vsel %vm986_vm7, %v1817_v59, -inf }
 0xb75   :  { %v7905_v30 = vadd.f32 %v1652_v33, %v1580_v26  ;;  %v6179_v11 = vpop.f32.mrb[39].mxu0 }
 0xb76   :  { %v1818_v11 = vsel %vm7692_vm8, %v1812_v51, -1e+30 }
 0xb77   :  { %v1832_v5 = vsel %vm986_vm7, %v1818_v11, -inf }
 0xba7   :  { %v1585_v31 = vpop.f32.mrb[40].mxu0 }
 0xba8   :  { %v7907_v25 = vadd.f32 %v1657_v8, %v1585_v31  ;;  %v6182_v20 = vpop.f32.mrb[41].mxu0 }
 0xba9   :  { %v1588_v2 = vpop.f32.mrb[42].mxu0 }
 0xbaa   :  { %v7909_v4 = vadd.f32 %v1660_v34, %v1588_v2  ;;  %v6183_v19 = vpop.f32.mrb[43].mxu0 }
 0xbaf   :  { %v1593_v52 = vpop.f32.mrb[44].mxu0 }
 0xbb0   :  { %v7911_v39 = vadd.f32 %v1665_v46, %v1593_v52  ;;  %v6186_v23 = vpop.f32.mrb[45].mxu0  ;;  %v1813_v46 = vmul.f32 0.25, %v6216_v40 }
 0xbb1   :  { %v1596_v6 = vpop.f32.mrb[46].mxu0 }
 0xbb2   :  { %v7913_v47 = vadd.f32 %v1668_v57, %v1596_v6  ;;  %v6187_v63 = vpop.f32.mrb[47].mxu0  ;;  %v1819_v40 = vsel %vm7699_vm9, %v1813_v46, -1e+30 }
 0xbb3   :  { %v1835_v31 = vsel %vm986_vm7, %v1819_v40, -inf }
 0xbb7   :  { %v6208_v14 = vpop.f32.mrb[48].mxu0 }
 0xbb8   :  { %v1726_v28 = vpop.f32.mrb[49].mxu0  ;;  %v1810_v1 = vmul.f32 0.25, %v6208_v14 }
 0xbb9   :  { %v1808_v33 = vmul.f32 0.25, %v1726_v28  ;;  %v6209_v12 = vpop.f32.mrb[50].mxu0 }
 0xbba   :  { %v1729_v8 = vpop.f32.mrb[51].mxu0  ;;  %v1816_v21 = vsel %vm7699_vm9, %v1810_v1, -1e+30 }
 0xbbb   :  { %v1809_v37 = vmul.f32 0.25, %v1729_v8  ;;  %v1814_v34 = vsel %vm7687_vm6, %v1808_v33, -1e+30  ;;  %v1826_v26 = vsel %vm986_vm7, %v1816_v21, -inf }
 0xbbc   :  { %v1820_v15 = vsel %vm986_vm7, %v1814_v34, -inf }
 0xbbd   :  { %1821 = vmax.xlane.f32.xlu1 %v1820_v15  ;;  %v1815_v57 = vsel %vm7692_vm8, %v1809_v37, -1e+30 }
 0xbbe   :  { %v1823_v50 = vsel %vm986_vm7, %v1815_v57, -inf }
 0xbbf   :  { %1824 = vmax.xlane.f32.xlu0 %v1823_v50 }
 0xbc1   :  { %1830 = vmax.xlane.f32.xlu1 %v1829_v10 }
 0xbc3   :  { %1827 = vmax.xlane.f32.xlu0 %v1826_v26 }
 0xbc5   :  { %1836 = vmax.xlane.f32.xlu1 %v1835_v31 }
 0xbc7   :  { %1833 = vmax.xlane.f32.xlu0 %v1832_v5 }
 0xc4a   :  { %v1822_v20 = vpop.xlane.xlu1 %1821 }
 0xc4b   :  { %v1838_v8 = vsub.f32 %v1814_v34, %v1822_v20 }
 0xc4c   :  { %v1825_v2 = vpop.xlane.xlu0 %1824 }
 0xc4d   :  { %v1844_v15 = vmul.f32 1.442695, %v1838_v8  ;;  %v1839_v31 = vsub.f32 %v1815_v57, %v1825_v2 }
 0xc4e   :  { %v1831_v19 = vpop.xlane.xlu1 %1830 }
 0xc4f   :  { %v1841_v52 = vsub.f32 %v1817_v59, %v1831_v19  ;;  %v1846_v5 = vmul.f32 1.442695, %v1839_v31 }
 0xc50   :  { %v1828_v23 = vpop.xlane.xlu0 %1827 }
 0xc51   :  { %v1850_v6 = vmul.f32 1.442695, %v1841_v52  ;;  %v1840_v14 = vsub.f32 %v1816_v21, %v1828_v23 }
 0xc52   :  { %v1837_v63 = vpop.xlane.xlu1 %1836 }
 0xc53   :  { %6810 = vpow2.f32 %v1850_v6  ;;  %v1843_v28 = vsub.f32 %v1819_v40, %v1837_v63  ;;  %v1848_v1 = vmul.f32 1.442695, %v1840_v14 }
 0xc54   :  { %v1834_v60 = vpop.xlane.xlu0 %1833 }
 0xc55   :  { %v1854_v33 = vmul.f32 1.442695, %v1843_v28  ;;  %v1842_v12 = vsub.f32 %v1818_v11, %v1834_v60 }
 0xc57   :  { %6812 = vpow2.f32 %v1854_v33  ;;  %v1852_v37 = vmul.f32 1.442695, %v1842_v12 }
 0xc59   :  { %6814 = vpow2.f32 %v1852_v37 }
 0xc5a   :  { %6816 = vpow2.f32 %v1848_v1 }
 0xc5b   :  { %6818 = vpow2.f32 %v1844_v15 }
 0xc5c   :  { %6820 = vpow2.f32 %v1846_v5 }
 0xc5d   :  { %v6811_v46 = vpop.eup %6810 }
 0xc5e   :  { %v1865_v50 = vsel %vm986_vm7, %v6811_v46, 0.0 }
 0xc5f   :  { %1866 = vadd.xlane.f32.xlu1 %v1865_v50 }
 0xc61   :  { %v7934_v59 = vpop.eup %6812 }
 0xc62   :  { %v1871_v51 = vsel %vm986_vm7, %v7934_v59, 0.0 }
 0xc63   :  { %v6815_v21 = vpop.eup %6814  ;;  %1872 = vadd.xlane.f32.xlu1 %v1871_v51 }
 0xc64   :  { %v1868_v34 = vsel %vm986_vm7, %v6815_v21, 0.0  ;;  %v7939_v10 = vpop.eup %6816 }
 0xc65   :  { %1869 = vadd.xlane.f32.xlu0 %v1868_v34  ;;  %v1862_v40 = vsel %vm986_vm7, %v7939_v10, 0.0  ;;  %v7943_v26 = vpop.eup %6818 }
 0xc66   :  { %v1856_v11 = vsel %vm986_vm7, %v7943_v26, 0.0  ;;  %v6821_v20 = vpop.eup %6820 }
 0xc67   :  { %v1859_v57 = vsel %vm986_vm7, %v6821_v20, 0.0 }
 0xc69   :  { %1863 = vadd.xlane.f32.xlu0 %v1862_v40 }
 0xc6d   :  { %1857 = vadd.xlane.f32.xlu0 %v1856_v11  ;;  %v6680_v11 = vld [vmem:[%s8984_s7 + $0x10] sm:$0xff]  }
 0xc74   :  { %1892 = vrot.lane.b32.xlu1 %v7665_v29, %s7224_s29 }
 0xc83   :  { %1890 = vrot.lane.b32.xlu0 %v7547_v3, %s7224_s29 }
 0xc87   :  { %1954 = vrot.lane.b32.xlu0 %v7749_v44, %s7224_s29 }
 0xc8b   :  { %2101 = vrot.lane.b32.xlu0 %v7632_v62, %s7210_s2 }
 0xc8f   :  { %2095 = vrot.lane.b32.xlu0 %v7588_v36, %s7225_s12 }
 0xc93   :  { %2169 = vrot.lane.b32.xlu0 %v7650_v22, %s7210_s2 }
 0xc97   :  { %2165 = vrot.lane.b32.xlu0 %v7681_v32, %s7225_s12 }
 0xc98   :  { %1860 = vadd.xlane.f32.xlu1 %v1859_v57 }
 0xca9   :  { %1952 = vrot.lane.b32.xlu1 %v7568_v13, %s7224_s29 }
 0xcad   :  { %2099 = vrot.lane.b32.xlu1 %v7624_v55, %s7210_s2 }
 0xcb1   :  { %2167 = vrot.lane.b32.xlu1 %v7646_v16, %s7210_s2 }
 0xcb5   :  { %2097 = vrot.lane.b32.xlu1 %v7661_v27, %s7225_s12 }
 0xcb9   :  { %2163 = vrot.lane.b32.xlu1 %v7598_v17, %s7225_s12 }
 0xcec   :  { %v1867_v36 = vpop.xlane.xlu1 %1866 }
 0xced   :  { %6822 = vrcp.f32 %v1867_v36 }
 0xcf0   :  { %v1873_v32 = vpop.xlane.xlu1 %1872 }
 0xcf2   :  { %v1870_v62 = vpop.xlane.xlu0 %1869 }
 0xcf3   :  { %6824 = vrcp.f32 %v1870_v62 }
 0xcf4   :  { %v1893_v16 = vpop.permute.xlu1 %1892  ;;  %6826 = vrcp.f32 %v1873_v32 }
 0xcf5   :  { %v1902_v17 = vsel %vm1063_vm5, %v1893_v16, 0 }
 0xcf6   :  { %v1864_v22 = vpop.xlane.xlu0 %1863 }
 0xcf7   :  { %v6823_v19 = vpop.eup %6822  ;;  %6828 = vrcp.f32 %v1864_v22 }
 0xcf8   :  { %v1883_v55 = vmul.f32 %v6823_v19, %v6811_v46 }
 0xcfa   :  { %v1858_v2 = vpop.xlane.xlu0 %1857 }
 0xcfb   :  { %6830 = vrcp.f32 %v1858_v2 }
 0xcfd   :  { %v6825_v52 = vpop.eup %6824 }
 0xcfe   :  { %v1891_v23 = vpop.permute.xlu0 %1890  ;;  %v1884_v6 = vmul.f32 %v6825_v52, %v6815_v21  ;;  %v6827_v28 = vpop.eup %6826 }
 0xcff   :  { %6218 = vmatprep.subr.bf16.mxu0 %v1891_v23  ;;  %v1885_v12 = vmul.f32 %v6827_v28, %v7934_v59 }
 0xd00   :  { %6219 = vmatpush3.bf16.msra.mxu0 %v1891_v23  ;;  %v1888_v63 = vpack.c.bf16 %v1884_v6, %v1883_v55 }
 0xd01   :  { %6590 = vmatprep.subr.msk.bf16.mxu0 %vm1063_vm5, %v1893_v16  ;;  %v6829_v8 = vpop.eup %6828  ;;  %v1889_v50 = vpack.c.bf16 %v1885_v12, %v1885_v12 }
 0xd02   :  { %6230 = vmatprep.mubr.msk.bf16.mxu1 %vm986_vm7, %v1888_v63  ;;  %v1955_v14 = vpop.permute.xlu0 %1954  ;;  %v1882_v51 = vmul.f32 %v6829_v8, %v7939_v10 }
 0xd03   :  { %v1964_v37 = vsel %vm1063_vm5, %v1955_v14, 0 }
 0xd04   :  { %6221 = vmatpush3.bf16.msra.mxu0 %v1902_v17  ;;  %v1887_v31 = vpack.c.bf16 %v1882_v51, %v1882_v51 }
 0xd05   :  { %6234 = vmatprep.subr.bf16.mxu0 %v7219_v9  ;;  %v6831_v1 = vpop.eup %6830 }
 0xd06   :  { %v2102_v33 = vpop.permute.xlu0 %2101  ;;  %v1880_v21 = vmul.f32 %v6831_v1, %v7943_v26 }
 0xd07   :  { %v2113_v26 = vsel %vm844_vm4, %v2102_v33, 0 }
 0xd0a   :  { %v2096_v40 = vpop.permute.xlu0 %2095 }
 0xd0e   :  { %v2170_v63 = vpop.permute.xlu0 %2169 }
 0xd0f   :  { %v2181_v17 = vsel %vm844_vm4, %v2170_v63, 0 }
 0xd25   :  { %v1861_v27 = vpop.xlane.xlu1 %1860 }
 0xd26   :  { %6832 = vrcp.f32 %v1861_v27 }
 0xd29   :  { %v1953_v60 = vpop.permute.xlu1 %1952 }
 0xd2a   :  { %6226 = vmatprep.subr.bf16.mxu1 %v1953_v60 }
 0xd2b   :  { %6227 = vmatpush3.bf16.msra.mxu1 %v1953_v60 }
 0xd2c   :  { %6591 = vmatprep.subr.msk.bf16.mxu1 %vm1063_vm5, %v1955_v14 }
 0xd2d   :  { %v2100_v15 = vpop.permute.xlu1 %2099 }
 0xd2e   :  { %v2110_v10 = vsel %vm844_vm4, %v2100_v15, 0 }
 0xd2f   :  { %6229 = vmatpush3.bf16.msra.mxu1 %v1964_v37 }
 0xd30   :  { %v6833_v46 = vpop.eup %6832  ;;  %6592 = vmatprep.subr.msk.bf16.mxu1 %vm844_vm4, %v2100_v15 }
 0xd31   :  { %v1881_v34 = vmul.f32 %v6833_v46, %v6821_v20  ;;  %v2168_v5 = vpop.permute.xlu1 %2167 }
 0xd32   :  { %6231 = vmatmul.mubr.msk.bf16.vlgmr.msra.gmra.mrb[60].mxu1 %vm986_vm7, %v1889_v50  ;;  %v2178_v16 = vsel %vm844_vm4, %v2168_v5, 0 }
 0xd33   :  { %6252 = vmatprep.mubr.msk.bf16.mxu1 %vm844_vm4, %v2096_v40  ;;  %v1886_v59 = vpack.c.bf16 %v1881_v34, %v1880_v21  ;;  %v2166_v34 = vpop.permute.xlu0 %2165 }
 0xd35   :  { %6222 = vmatprep.mubr.msk.bf16.mxu0 %vm986_vm7, %v1886_v59  ;;  %v2098_v20 = vpop.permute.xlu1 %2097 }
 0xd36   :  { %6223 = vmatmul.mubr.msk.bf16.vlgmr.msra.gmra.mrb[52].mxu0 %vm986_vm7, %v1887_v31 }
 0xd37   :  { %6235 = vmatpush3.bf16.msra.mxu0 %v6680_v11  ;;  %6236 = vmatprep.mubr.msk.bf16.mxu0 %vm7220_vm1, %v7219_v9 }
 0xd38   :  { %6594 = vmatprep.subr.msk.bf16.mxu0 %vm844_vm4, %v2168_v5  ;;  %6249 = vmatpush3.bf16.xpose.msra.mxu1 %v2110_v10 }
 0xd39   :  { %6593 = vmatprep.subr.msk.bf16.mxu1 %vm844_vm4, %v2102_v33  ;;  %v2164_v37 = vpop.permute.xlu1 %2163 }
 0xd40   :  { %6251 = vmatpush3.bf16.xpose.msra.mxu1 %v2113_v26 }
 0xd47   :  { %6253 = vmatmul.mubr.msk.bf16.vlgmr.msra.gmra.mrb[64].mxu1 %vm844_vm4, %v2098_v20 }
 0xe05   :  { %v6232_v57 = vpop.f32.mrb[60].mxu1 }
 0xe06   :  { %v2000_v36 = vpop.f32.mrb[61].mxu1 }
 0xe07   :  { %v6233_v62 = vpop.f32.mrb[62].mxu1 }
 0xe08   :  { %v2003_v22 = vpop.f32.mrb[63].mxu1 }
 0xe09   :  { %v2016_v32 = vpack.c.bf16 %v6232_v57, %v2003_v22  ;;  %v6224_v2 = vpop.f32.mrb[52].mxu0 }
 0xe0a   :  { %v2015_v19 = vpack.c.bf16 %v2000_v36, %v6224_v2  ;;  %v1938_v52 = vpop.f32.mrb[53].mxu0 }
 0xe0b   :  { %v6225_v23 = vpop.f32.mrb[54].mxu0 }
 0xe0c   :  { %v1941_v55 = vpop.f32.mrb[55].mxu0 }
 0xe0d   :  { %v2014_v6 = vpack.c.bf16 %v1941_v55, %v1938_v52 }
 0xe0f   :  { %6237 = vmatmul.mubr.msk.bf16.vlgmr.msra.gmra.mrb[56].mxu0 %vm844_vm4, %v2014_v6 }
 0xe10   :  { %6257 = vmatpush3.bf16.xpose.msra.mxu0 %v2178_v16  ;;  %6240 = vmatprep.mubr.msk.bf16.mxu0 %vm7220_vm1, %v7219_v9 }
 0xe11   :  { %6595 = vmatprep.subr.msk.bf16.mxu0 %vm844_vm4, %v2170_v63 }
 0xe17   :  { %6241 = vmatmul.mubr.msk.bf16.gmra.mrb[60].mxu0 %vm844_vm4, %v2015_v19 }
 0xe18   :  { %6259 = vmatpush3.bf16.xpose.msra.mxu0 %v2181_v17  ;;  %6244 = vmatprep.mubr.msk.bf16.mxu0 %vm7220_vm1, %v7219_v9 }
 0xe19   :  { %6280 = vmatprep.subr.bf16.mxu0 %v7219_v9 }
 0xe1a   :  { %v6254_v27 = vpop.f32.mrb[64].mxu1 }
 0xe1b   :  { %v2149_v14 = vpop.f32.mrb[65].mxu1  ;;  %v2233_v12 = vmul.f32 0.25, %v6254_v27 }
 0xe1c   :  { %v2231_v28 = vmul.f32 0.25, %v2149_v14  ;;  %v6255_v60 = vpop.f32.mrb[66].mxu1 }
 0xe1d   :  { %v2152_v33 = vpop.f32.mrb[67].mxu1  ;;  %v2239_v51 = vsel %vm7699_vm9, %v2233_v12, -1e+30 }
 0xe1e   :  { %v2237_v8 = vsel %vm7687_vm6, %v2231_v28, -1e+30  ;;  %v2232_v1 = vmul.f32 0.25, %v2152_v33  ;;  %v2249_v21 = vsel %vm986_vm7, %v2239_v51, -inf }
 0xe1f   :  { %6245 = vmatmul.mubr.msk.bf16.gmra.mrb[64].mxu0 %vm844_vm4, %v2016_v32  ;;  %v2243_v15 = vsel %vm986_vm7, %v2237_v8, -inf }
 0xe20   :  { %v2238_v46 = vsel %vm7692_vm8, %v2232_v1, -1e+30  ;;  %6260 = vmatprep.mubr.msk.bf16.mxu0 %vm844_vm4, %v2164_v37  ;;  %2244 = vmax.xlane.f32.xlu1 %v2243_v15 }
 0xe21   :  { %v2246_v50 = vsel %vm986_vm7, %v2238_v46, -inf }
 0xe22   :  { %2247 = vmax.xlane.f32.xlu0 %v2246_v50 }
 0xe26   :  { %2250 = vmax.xlane.f32.xlu0 %v2249_v21 }
 0xe27   :  { %6261 = vmatmul.mubr.msk.bf16.vlgmr.msra.gmra.mrb[68].mxu0 %vm844_vm4, %v2166_v34 }
 0xe28   :  { %6282 = vmatprep.mubr.msk.bf16.mxu0 %vm7220_vm1, %v7219_v9 }
 0xead   :  { %v2245_v22 = vpop.xlane.xlu1 %2244 }
 0xeaf   :  { %v2248_v20 = vpop.xlane.xlu0 %2247 }
 0xeb0   :  { %v2262_v52 = vsub.f32 %v2238_v46, %v2248_v20 }
 0xeb2   :  { %v2269_v27 = vmul.f32 1.442695, %v2262_v52 }
 0xeb3   :  { %v2251_v19 = vpop.xlane.xlu0 %2250 }
 0xeb4   :  { %v2263_v16 = vsub.f32 %v2239_v51, %v2251_v19 }
 0xee2   :  { %v2066_v40 = vpop.f32.mrb[56].mxu0 }
 0xee3   :  { %v8021_v59 = vadd.f32 %v2066_v40, %v7903_v24  ;;  %v6238_v11 = vpop.f32.mrb[57].mxu0  ;;  %v2261_v24 = vsub.f32 %v2237_v8, %v2245_v22 }
 0xee4   :  { %v2069_v31 = vpop.f32.mrb[58].mxu0 }
 0xee5   :  { %v8024_v5 = vadd.f32 %v2069_v31, %v7905_v30  ;;  %v6239_v10 = vpop.f32.mrb[59].mxu0  ;;  %v2267_v6 = vmul.f32 1.442695, %v2261_v24 }
 0xee7   :  { %6834 = vpow2.f32 %v2267_v6 }
 0xee8   :  { %6836 = vpow2.f32 %v2269_v27 }
 0xeea   :  { %v2074_v26 = vpop.f32.mrb[60].mxu0 }
 0xeeb   :  { %v8027_v57 = vadd.f32 %v2074_v26, %v7907_v25  ;;  %v6242_v36 = vpop.f32.mrb[61].mxu0 }
 0xeec   :  { %v2077_v62 = vpop.f32.mrb[62].mxu0 }
 0xeed   :  { %v8030_v32 = vadd.f32 %v2077_v62, %v7909_v4  ;;  %v6243_v2 = vpop.f32.mrb[63].mxu0  ;;  %v2271_v4 = vmul.f32 1.442695, %v2263_v16 }
 0xeef   :  { %6838 = vpow2.f32 %v2271_v4 }
 0xef1   :  { %v6835_v50 = vpop.eup %6834 }
 0xef2   :  { %v2082_v23 = vpop.f32.mrb[64].mxu0  ;;  %v6837_v21 = vpop.eup %6836  ;;  %v2279_v34 = vsel %vm986_vm7, %v6835_v50, 0.0 }
 0xef3   :  { %v8033_v30 = vadd.f32 %v2082_v23, %v7911_v39  ;;  %v6246_v55 = vpop.f32.mrb[65].mxu0  ;;  %v2282_v11 = vsel %vm986_vm7, %v6837_v21, 0.0 }
 0xef4   :  { %v2085_v63 = vpop.f32.mrb[66].mxu0 }
 0xef5   :  { %v8036_v25 = vadd.f32 %v2085_v63, %v7913_v47  ;;  %v6247_v17 = vpop.f32.mrb[67].mxu0 }
 0xef9   :  { %v6839_v40 = vpop.eup %6838 }
 0xefa   :  { %v6262_v14 = vpop.f32.mrb[68].mxu0  ;;  %v2285_v31 = vsel %vm986_vm7, %v6839_v40, 0.0 }
 0xefb   :  { %v2217_v28 = vpop.f32.mrb[69].mxu0  ;;  %v2236_v60 = vmul.f32 0.25, %v6262_v14 }
 0xefc   :  { %v2234_v33 = vmul.f32 0.25, %v2217_v28  ;;  %v6263_v12 = vpop.f32.mrb[70].mxu0 }
 0xefd   :  { %v2220_v39 = vpop.f32.mrb[71].mxu0  ;;  %v2242_v47 = vsel %vm7699_vm9, %v2236_v60, -1e+30 }
 0xefe   :  { %v2240_v8 = vsel %vm7687_vm6, %v2234_v33, -1e+30  ;;  %v2235_v1 = vmul.f32 0.25, %v2220_v39  ;;  %v2258_v51 = vsel %vm986_vm7, %v2242_v47, -inf }
 0xeff   :  { %v2252_v37 = vsel %vm986_vm7, %v2240_v8, -inf }
 0xf00   :  { %v2241_v15 = vsel %vm7692_vm8, %v2235_v1, -1e+30  ;;  %2253 = vmax.xlane.f32.xlu1 %v2252_v37 }
 0xf01   :  { %v2255_v46 = vsel %vm986_vm7, %v2241_v15, -inf }
 0xf02   :  { %2256 = vmax.xlane.f32.xlu0 %v2255_v46 }
 0xf04   :  { %2259 = vmax.xlane.f32.xlu1 %v2258_v51 }
 0xf06   :  { %2280 = vadd.xlane.f32.xlu0 %v2279_v34 }
 0xf08   :  { %2283 = vadd.xlane.f32.xlu1 %v2282_v11 }
 0xf0a   :  { %2286 = vadd.xlane.f32.xlu0 %v2285_v31 }
 0xf19   :  { %2315 = vrot.lane.b32.xlu1 %v7665_v29, %s7225_s12 }
 0xf20   :  { %2313 = vrot.lane.b32.xlu0 %v7547_v3, %s7225_s12 }
 0xf8d   :  { %v2254_v10 = vpop.xlane.xlu1 %2253 }
 0xf8e   :  { %v2264_v26 = vsub.f32 %v2240_v8, %v2254_v10 }
 0xf8f   :  { %v2257_v20 = vpop.xlane.xlu0 %2256 }
 0xf90   :  { %v2273_v36 = vmul.f32 1.442695, %v2264_v26  ;;  %v2265_v62 = vsub.f32 %v2241_v15, %v2257_v20 }
 0xf91   :  { %v2260_v22 = vpop.xlane.xlu1 %2259 }
 0xf92   :  { %v2275_v2 = vmul.f32 1.442695, %v2265_v62  ;;  %v2266_v24 = vsub.f32 %v2242_v47, %v2260_v22  ;;  %6840 = vpow2.f32 %v2273_v36  ;;  %v6681_v47 = vld [vmem:[%s8984_s7 + $0x18] sm:$0xff]  }
 0xf93   :  { %v2281_v19 = vpop.xlane.xlu0 %2280  ;;  %6281 = vmatpush3.bf16.msra.mxu0 %v6681_v47  ;;  %v6693_v47 = vld [vmem:[%s8986_s9 + $0x34] ss:$8 sps:$4 sm:$0xff]  }
 0xf94   :  { %6842 = vpow2.f32 %v2275_v2  ;;  %v2277_v52 = vmul.f32 1.442695, %v2266_v24  ;;  %6294 = vmatprep.subr.bf16.mxu0 %v7219_v9 }
 0xf95   :  { %6844 = vrcp.f32 %v2281_v19  ;;  %v2284_v23 = vpop.xlane.xlu1 %2283 }
 0xf96   :  { %6846 = vpow2.f32 %v2277_v52 }
 0xf97   :  { %6848 = vrcp.f32 %v2284_v23  ;;  %v2287_v29 = vpop.xlane.xlu0 %2286 }
 0xf98   :  { %6850 = vrcp.f32 %v2287_v29 }
 0xf99   :  { %v2316_v6 = vpop.permute.xlu1 %2315 }
 0xf9a   :  { %v2325_v4 = vsel %vm1063_vm5, %v2316_v6, 0 }
 0xf9b   :  { %v2314_v55 = vpop.permute.xlu0 %2313 }
 0xf9c   :  { %6264 = vmatprep.subr.bf16.mxu1 %v2314_v55  ;;  %v6841_v3 = vpop.eup %6840 }
 0xf9d   :  { %6265 = vmatpush3.bf16.msra.mxu1 %v2314_v55  ;;  %v2288_v1 = vsel %vm986_vm7, %v6841_v3, 0.0 }
 0xf9e   :  { %v6843_v16 = vpop.eup %6842  ;;  %6596 = vmatprep.subr.msk.bf16.mxu1 %vm1063_vm5, %v2316_v6 }
 0xf9f   :  { %v6845_v63 = vpop.eup %6844  ;;  %v2291_v17 = vsel %vm986_vm7, %v6843_v16, 0.0 }
 0xfa0   :  { %v6847_v27 = vpop.eup %6846  ;;  %2292 = vadd.xlane.f32.xlu0 %v2291_v17  ;;  %v2303_v33 = vmul.f32 %v6845_v63, %v6835_v50 }
 0xfa1   :  { %v6849_v14 = vpop.eup %6848  ;;  %6267 = vmatpush3.bf16.msra.mxu1 %v2325_v4  ;;  %v2294_v28 = vsel %vm986_vm7, %v6847_v27, 0.0 }
 0xfa2   :  { %v6851_v60 = vpop.eup %6850  ;;  %2295 = vadd.xlane.f32.xlu1 %v2294_v28  ;;  %v2304_v12 = vmul.f32 %v6849_v14, %v6837_v21 }
 0xfa3   :  { %v2305_v39 = vmul.f32 %v6851_v60, %v6839_v40 }
 0xfa4   :  { %v2309_v8 = vpack.c.bf16 %v2304_v12, %v2303_v33 }
 0xfa5   :  { %v2310_v37 = vpack.c.bf16 %v2305_v39, %v2305_v39  ;;  %v6685_v39 = vld [vmem:[%s8986_s9 + $0x10] ss:$8 sps:$4 sm:$0xff]  }
 0xfa6   :  { %6268 = vmatprep.mubr.msk.bf16.mxu1 %vm986_vm7, %v2309_v8  ;;  %2289 = vadd.xlane.f32.xlu1 %v2288_v1  ;;  %v6690_v8 = vld [vmem:[%s8986_s9 + $0x24] ss:$8 sps:$4 sm:$0xff]   ;;  %v6688_v1 = vld [vmem:[%s8986_s9 + $0x20] ss:$8 sps:$4 sm:$0xff]  }
 0xfa7   :  { %6269 = vmatmul.mubr.msk.bf16.vlgmr.msra.gmra.mrb[68].mxu1 %vm986_vm7, %v2310_v37  ;;  %v6691_v37 = vld [vmem:[%s8986_s9 + $0x30] ss:$8 sps:$4 sm:$0xff]  }
 0xfb6   :  { %2377 = vrot.lane.b32.xlu0 %v7749_v44, %s7225_s12 }
 0xfb7   :  { %2375 = vrot.lane.b32.xlu1 %v7568_v13, %s7225_s12 }
0x102d   :  { %v2293_v15 = vpop.xlane.xlu0 %2292 }
0x102f   :  { %v2296_v46 = vpop.xlane.xlu1 %2295 }
0x1030   :  { %6852 = vrcp.f32 %v2296_v46 }
0x1031   :  { %6854 = vrcp.f32 %v2293_v15  ;;  %v2378_v21 = vpop.permute.xlu0 %2377 }
0x1032   :  { %v2387_v34 = vsel %vm1063_vm5, %v2378_v21, 0 }
0x1033   :  { %v2290_v50 = vpop.xlane.xlu1 %2289 }
0x1034   :  { %6856 = vrcp.f32 %v2290_v50 }
0x1037   :  { %v2376_v51 = vpop.permute.xlu1 %2375 }
0x1038   :  { %6272 = vmatprep.subr.bf16.mxu1 %v2376_v51 }
0x1039   :  { %6273 = vmatpush3.bf16.msra.mxu1 %v2376_v51 }
0x103a   :  { %6597 = vmatprep.subr.msk.bf16.mxu1 %vm1063_vm5, %v2378_v21  ;;  %v6853_v13 = vpop.eup %6852 }
0x103b   :  { %v6855_v44 = vpop.eup %6854  ;;  %v2308_v11 = vmul.f32 %v6853_v13, %v6847_v27 }
0x103c   :  { %v2307_v10 = vmul.f32 %v6855_v44, %v6843_v16 }
0x103d   :  { %6275 = vmatpush3.bf16.msra.mxu1 %v2387_v34  ;;  %v2312_v20 = vpack.c.bf16 %v2308_v11, %v2308_v11 }
0x103e   :  { %v6857_v40 = vpop.eup %6856 }
0x103f   :  { %v2306_v31 = vmul.f32 %v6857_v40, %v6841_v3 }
0x1041   :  { %v2311_v26 = vpack.c.bf16 %v2307_v10, %v2306_v31 }
0x1043   :  { %6276 = vmatprep.mubr.msk.bf16.mxu1 %vm986_vm7, %v2311_v26 }
0x1044   :  { %6277 = vmatmul.mubr.msk.bf16.vlgmr.msra.gmra.mrb[72].mxu1 %vm986_vm7, %v2312_v20 }
0x1045   :  { %2677 = vmatprep.mubr.bf16.mxu1 %v7217_v0 }
0x107a   :  { %v6270_v36 = vpop.f32.mrb[68].mxu1 }
0x107b   :  { %v2361_v62 = vpop.f32.mrb[69].mxu1 }
0x107c   :  { %v6271_v22 = vpop.f32.mrb[70].mxu1 }
0x107d   :  { %v2364_v2 = vpop.f32.mrb[71].mxu1 }
0x107e   :  { %v2437_v24 = vpack.c.bf16 %v2364_v2, %v2361_v62 }
0x1080   :  { %6283 = vmatmul.mubr.msk.bf16.vlgmr.msra.gmra.mrb[72].mxu0 %vm844_vm4, %v2437_v24 }
0x1081   :  { %6286 = vmatprep.mubr.msk.bf16.mxu0 %vm7220_vm1, %v7219_v9 }
0x1117   :  { %v6278_v19 = vpop.f32.mrb[72].mxu1 }
0x1118   :  { %v2423_v52 = vpop.f32.mrb[73].mxu1 }
0x1119   :  { %v2438_v23 = vpack.c.bf16 %v2423_v52, %v6270_v36  ;;  %v6279_v29 = vpop.f32.mrb[74].mxu1 }
0x111a   :  { %v2426_v55 = vpop.f32.mrb[75].mxu1 }
0x111b   :  { %v2439_v3 = vpack.c.bf16 %v6278_v19, %v2426_v55  ;;  %6287 = vmatmul.mubr.msk.bf16.gmra.mrb[76].mxu0 %vm844_vm4, %v2438_v23 }
0x111c   :  { %6290 = vmatprep.mubr.msk.bf16.mxu0 %vm7220_vm1, %v7219_v9 }
0x1123   :  { %6291 = vmatmul.mubr.msk.bf16.gmra.mrb[80].mxu0 %vm844_vm4, %v2439_v3  ;;  %v8144_v3 = vld [vmem:[%s8985_s8] ss:$0 sm:$0xff] }
0x1124   :  { %6310 = vmatprep.mubr.msk.bf16.mxu0 %vm7220_vm1, %v7219_v9 }
0x1153   :  { %v2489_v6 = vpop.f32.mrb[72].mxu0 }
0x1154   :  { %v2512_v16 = vadd.f32 %v2489_v6, %v8021_v59  ;;  %v6284_v63 = vpop.f32.mrb[73].mxu0 }
0x1155   :  { %v2492_v17 = vpop.f32.mrb[74].mxu0 }
0x1156   :  { %v8085_v27 = vadd.f32 %v7464_v35, %v2512_v16  ;;  %v2513_v4 = vadd.f32 %v2492_v17, %v8024_v5  ;;  %v6285_v14 = vpop.f32.mrb[75].mxu0  ;;  %v6684_v35 = vld [vmem:[%s8986_s9 + $0x4] ss:$8 sps:$4 sm:$0xff]   ;;  %v6687_v5 = vld [vmem:[%s8986_s9 + $0x14] ss:$8 sps:$4 sm:$0xff]  }
0x1157   :  { %2645 = vmatprep.subr.bf16.mxu1 %v6684_v35  ;;  %v6699_v35 = vld [vmem:[%s8987_s10 + $0x28] sm:$0xff]  }
0x1158   :  { %v8089_v28 = vadd.f32 %v7466_v38, %v2513_v4  ;;  %v2525_v60 = vmul.f32 %v8085_v27, %v8085_v27  ;;  %v6682_v38 = vld [vmem:[%s8986_s9] ss:$8 sps:$4 sm:$0xff]  }
0x1159   :  { %2646 = vmatpush1.bf16.msra.mxu1 %v6682_v38  ;;  %v6700_v38 = vld [vmem:[%s8987_s10 + $0x30] sm:$0xff]  }
0x115a   :  { %v2531_v33 = vsel %vm387_vm0, %v2525_v60, 0.0  ;;  %v2526_v12 = vmul.f32 %v8089_v28, %v8089_v28  ;;  %2647 = vmatprep.subr.bf16.mxu1 %v6687_v5  ;;  %v6695_v60 = vld [vmem:[%s8987_s10 + $0x8] sm:$0xff]   ;;  %v6701_v5 = vld [vmem:[%s8987_s10 + $0x38] sm:$0xff]  }
0x115b   :  { %2532 = vadd.xlane.f32.xlu1 %v2531_v33  ;;  %v6696_v33 = vld [vmem:[%s8987_s10 + $0x10] sm:$0xff]  }
0x115c   :  { %v2534_v59 = vsel %vm387_vm0, %v2526_v12, 0.0  ;;  %v6697_v12 = vld [vmem:[%s8987_s10 + $0x18] sm:$0xff]  }
0x115d   :  { %2535 = vadd.xlane.f32.xlu0 %v2534_v59  ;;  %2648 = vmatpush1.bf16.msra.mxu1 %v6685_v39  ;;  %v6698_v59 = vld [vmem:[%s8987_s10 + $0x20] sm:$0xff]  }
0x115e   :  { %2649 = vmatprep.subr.bf16.mxu1 %v6690_v8 }
0x1161   :  { %2650 = vmatpush1.bf16.msra.mxu1 %v6688_v1 }
0x1162   :  { %2651 = vmatprep.subr.bf16.mxu1 %v6693_v47 }
0x1165   :  { %2652 = vmatpush1.bf16.msra.mxu1 %v6691_v37 }
0x11e8   :  { %v2533_v15 = vpop.xlane.xlu1 %2532 }
0x11e9   :  { %v2549_v46 = vmul.f32 0.015625, %v2533_v15 }
0x11ea   :  { %v2536_v50 = vpop.xlane.xlu0 %2535 }
0x11eb   :  { %v2555_v51 = vadd.f32 1e-06, %v2549_v46  ;;  %v2550_v21 = vmul.f32 0.015625, %v2536_v50 }
0x11ed   :  { %6858 = vrsqrt.f32 %v2555_v51  ;;  %v2556_v13 = vadd.f32 1e-06, %v2550_v21 }
0x11ee   :  { %v2497_v44 = vpop.f32.mrb[76].mxu0 }
0x11ef   :  { %6860 = vrsqrt.f32 %v2556_v13  ;;  %v2514_v34 = vadd.f32 %v2497_v44, %v8027_v57  ;;  %v6288_v40 = vpop.f32.mrb[77].mxu0 }
0x11f0   :  { %v2500_v11 = vpop.f32.mrb[78].mxu0 }
0x11f1   :  { %v8123_v31 = vadd.f32 %v7474_v45, %v2514_v34  ;;  %v2515_v10 = vadd.f32 %v2500_v11, %v8030_v32  ;;  %v6289_v26 = vpop.f32.mrb[79].mxu0 }
0x11f3   :  { %v8127_v20 = vadd.f32 %v7476_v48, %v2515_v10  ;;  %v2527_v36 = vmul.f32 %v8123_v31, %v8123_v31 }
0x11f5   :  { %v2537_v62 = vsel %vm387_vm0, %v2527_v36, 0.0  ;;  %v2528_v22 = vmul.f32 %v8127_v20, %v8127_v20 }
0x11f6   :  { %2538 = vadd.xlane.f32.xlu0 %v2537_v62  ;;  %v2505_v57 = vpop.f32.mrb[80].mxu0 }
0x11f7   :  { %v6859_v2 = vpop.eup %6858  ;;  %v2516_v45 = vadd.f32 %v2505_v57, %v8033_v30  ;;  %v6292_v24 = vpop.f32.mrb[81].mxu0  ;;  %v2540_v32 = vsel %vm387_vm0, %v2528_v22, 0.0 }
0x11f8   :  { %v2567_v19 = vmul.f32 %v6859_v2, %v8085_v27  ;;  %2541 = vadd.xlane.f32.xlu1 %v2540_v32  ;;  %v2508_v48 = vpop.f32.mrb[82].mxu0 }
0x11f9   :  { %v6861_v52 = vpop.eup %6860  ;;  %v8138_v23 = vadd.f32 %v7483_v54, %v2516_v45  ;;  %v2517_v29 = vadd.f32 %v2508_v48, %v8036_v25  ;;  %v6293_v55 = vpop.f32.mrb[83].mxu0 }
0x11fa   :  { %v2568_v30 = vmul.f32 %v6861_v52, %v8089_v28  ;;  %v2579_v63 = vmul.f32 %v8144_v3, %v2567_v19 }
0x11fb   :  { %v8148_v6 = vadd.f32 %v7486_v58, %v2517_v29  ;;  %v2529_v16 = vmul.f32 %v8138_v23, %v8138_v23  ;;  %v6694_v58 = vld [vmem:[%s8987_s10] sm:$0xff]  }
0x11fc   :  { %v2580_v54 = vmul.f32 %v8144_v3, %v2568_v30  ;;  %6295 = vmatpush3.bf16.msra.mxu0 %v6694_v58 }
0x11fd   :  { %v2543_v25 = vsel %vm387_vm0, %v2529_v16, 0.0  ;;  %v2530_v17 = vmul.f32 %v8148_v6, %v8148_v6  ;;  %6296 = vmatprep.subr.bf16.mxu0 %v7219_v9 }
0x11fe   :  { %2544 = vadd.xlane.f32.xlu0 %v2543_v25  ;;  %v2585_v4 = vpack.c.bf16 %v2580_v54, %v2579_v63 }
0x11ff   :  { %v2546_v14 = vsel %vm387_vm0, %v2530_v17, 0.0 }
0x1200   :  { %2547 = vadd.xlane.f32.xlu1 %v2546_v14  ;;  %5664 = vmatmul.mubr.msk.bf16.vlgmr.msra.gmra.mrb[76].mxu1 %vm387_vm0, %v2585_v4 }
0x1201   :  { %2687 = vmatprep.mubr.bf16.mxu1 %v7217_v0  ;;  %6297 = vmatpush3.bf16.msra.mxu0 %v6695_v60 }
0x1202   :  { %6298 = vmatprep.subr.bf16.mxu0 %v7219_v9 }
0x1205   :  { %6299 = vmatpush3.bf16.msra.mxu0 %v6696_v33 }
0x1206   :  { %6300 = vmatprep.subr.bf16.mxu0 %v7219_v9 }
0x1209   :  { %6301 = vmatpush3.bf16.msra.mxu0 %v6697_v12 }
0x120a   :  { %6302 = vmatprep.subr.bf16.mxu0 %v7219_v9 }
0x120d   :  { %6303 = vmatpush3.bf16.msra.mxu0 %v6698_v59  ;;  %v8206_v59 = vld [vmem:[#allocation7] sm:$0xff]  }
0x120e   :  { %6304 = vmatprep.subr.bf16.mxu0 %v7219_v9 }
0x1211   :  { %6305 = vmatpush3.bf16.msra.mxu0 %v6699_v35  ;;  %v8210_v35 = vld [vmem:[#allocation7 + $0x8] sm:$0xff]  }
0x1212   :  { %6306 = vmatprep.subr.bf16.mxu0 %v7219_v9 }
0x1215   :  { %6307 = vmatpush3.bf16.msra.mxu0 %v6700_v38  ;;  %v8214_v38 = vld [vmem:[#allocation7 + $0x10] sm:$0xff]  }
0x1216   :  { %6308 = vmatprep.subr.bf16.mxu0 %v7219_v9 }
0x1219   :  { %6309 = vmatpush3.bf16.msra.mxu0 %v6701_v5  ;;  %v8218_v5 = vld [vmem:[#allocation7 + $0x18] sm:$0xff]  }
0x121a   :  { %6322 = vmatprep.subr.bf16.mxu0 %v7219_v9 }
0x1283   :  { %v2539_v39 = vpop.xlane.xlu0 %2538 }
0x1284   :  { %v2551_v8 = vmul.f32 0.015625, %v2539_v39 }
0x1285   :  { %v2542_v1 = vpop.xlane.xlu1 %2541 }
0x1286   :  { %v2557_v37 = vadd.f32 1e-06, %v2551_v8  ;;  %v2552_v47 = vmul.f32 0.015625, %v2542_v1 }
0x1288   :  { %6862 = vrsqrt.f32 %v2557_v37  ;;  %v2558_v15 = vadd.f32 1e-06, %v2552_v47 }
0x128a   :  { %6864 = vrsqrt.f32 %v2558_v15 }
0x128b   :  { %v2545_v46 = vpop.xlane.xlu0 %2544 }
0x128c   :  { %v2553_v50 = vmul.f32 0.015625, %v2545_v46 }
0x128d   :  { %v2548_v51 = vpop.xlane.xlu1 %2547 }
0x128e   :  { %v2559_v21 = vadd.f32 1e-06, %v2553_v50  ;;  %v2554_v13 = vmul.f32 0.015625, %v2548_v51 }
0x1290   :  { %6866 = vrsqrt.f32 %v2559_v21  ;;  %v2560_v44 = vadd.f32 1e-06, %v2554_v13 }
0x1292   :  { %v6863_v34 = vpop.eup %6862  ;;  %6868 = vrsqrt.f32 %v2560_v44 }
0x1293   :  { %v2569_v40 = vmul.f32 %v6863_v34, %v8123_v31 }
0x1294   :  { %v6865_v11 = vpop.eup %6864 }
0x1295   :  { %v2570_v10 = vmul.f32 %v6865_v11, %v8127_v20  ;;  %v2581_v26 = vmul.f32 %v8144_v3, %v2569_v40 }
0x1297   :  { %v2582_v36 = vmul.f32 %v8144_v3, %v2570_v10 }
0x1299   :  { %v2586_v62 = vpack.c.bf16 %v2582_v36, %v2581_v26 }
0x129a   :  { %v6867_v22 = vpop.eup %6866 }
0x129b   :  { %5665 = vmatmul.mubr.msk.bf16.gmra.mrb[80].mxu1 %vm387_vm0, %v2586_v62  ;;  %v2571_v57 = vmul.f32 %v6867_v22, %v8138_v23 }
0x129c   :  { %v6869_v2 = vpop.eup %6868  ;;  %2697 = vmatprep.mubr.bf16.mxu1 %v7217_v0 }
0x129d   :  { %v2572_v45 = vmul.f32 %v6869_v2, %v8148_v6  ;;  %v2583_v24 = vmul.f32 %v8144_v3, %v2571_v57 }
0x129f   :  { %v2584_v32 = vmul.f32 %v8144_v3, %v2572_v45 }
0x12a1   :  { %v2587_v19 = vpack.c.bf16 %v2584_v32, %v2583_v24 }
0x12a3   :  { %5666 = vmatmul.mubr.msk.bf16.gmra.mrb[84].mxu1 %vm387_vm0, %v2587_v19 }
0x12a4   :  { %3041 = vmatprep.mubr.bf16.mxu1 %v7217_v0 }
0x12d3   :  { %v2679_v48 = vpop.f32.mrb[76].mxu1 }
0x12d4   :  { %v5667_v52 = vmul.f32 -1.442695, %v2679_v48  ;;  %v2681_v29 = vpop.f32.mrb[77].mxu1 }
0x12d5   :  { %v2683_v55 = vpop.f32.mrb[78].mxu1 }
0x12d6   :  { %6870 = vpow2.f32 %v5667_v52  ;;  %v5668_v30 = vmul.f32 -1.442695, %v2683_v55  ;;  %v2685_v16 = vpop.f32.mrb[79].mxu1 }
0x12d8   :  { %6872 = vpow2.f32 %v5668_v30 }
0x12e0   :  { %v6871_v63 = vpop.eup %6870 }
0x12e1   :  { %v2726_v54 = vadd.f32 1.0, %v6871_v63 }
0x12e2   :  { %v6873_v25 = vpop.eup %6872 }
0x12e3   :  { %6874 = vrcp.f32 %v2726_v54  ;;  %v2727_v17 = vadd.f32 1.0, %v6873_v25 }
0x12e5   :  { %6876 = vrcp.f32 %v2727_v17 }
0x12ed   :  { %v6875_v3 = vpop.eup %6874 }
0x12ee   :  { %v2744_v4 = vmul.f32 %v6875_v3, %v2679_v48 }
0x12ef   :  { %v6877_v14 = vpop.eup %6876 }
0x12f0   :  { %v2750_v58 = vmul.f32 %v2744_v4, %v2681_v29  ;;  %v2745_v60 = vmul.f32 %v6877_v14, %v2683_v55 }
0x12f2   :  { %v2751_v33 = vmul.f32 %v2745_v60, %v2685_v16 }
0x12f4   :  { %v2756_v12 = vpack.c.bf16 %v2751_v33, %v2750_v58 }
0x12f6   :  { %6311 = vmatmul.mubr.bf16.vlgmr.msra.gmra.mrb[84].mxu0 %v2756_v12 }
0x12f7   :  { %6314 = vmatprep.mubr.msk.bf16.mxu0 %vm7220_vm1, %v7219_v9  ;;  %6323 = vmatpush3.bf16.msra.mxu0 %v8206_v59 }
0x12f8   :  { %6324 = vmatprep.subr.bf16.mxu0 %v7219_v9 }
0x12fb   :  { %6325 = vmatpush3.bf16.msra.mxu0 %v8210_v35 }
0x12fc   :  { %6326 = vmatprep.subr.bf16.mxu0 %v7219_v9 }
0x12ff   :  { %6327 = vmatpush3.bf16.msra.mxu0 %v8214_v38 }
0x1300   :  { %6328 = vmatprep.subr.bf16.mxu0 %v7219_v9 }
0x1303   :  { %6329 = vmatpush3.bf16.msra.mxu0 %v8218_v5 }
0x136e   :  { %v2689_v39 = vpop.f32.mrb[80].mxu1 }
0x136f   :  { %v5669_v8 = vmul.f32 -1.442695, %v2689_v39  ;;  %v2691_v1 = vpop.f32.mrb[81].mxu1 }
0x1370   :  { %v2693_v37 = vpop.f32.mrb[82].mxu1 }
0x1371   :  { %6878 = vpow2.f32 %v5669_v8  ;;  %v5670_v47 = vmul.f32 -1.442695, %v2693_v37  ;;  %v2695_v15 = vpop.f32.mrb[83].mxu1  ;;  %v6707_v8 = vld [vmem:[%s8983_s6 + $0x54] ss:$8 sps:$4 sm:$0xff]  }
0x1373   :  { %6880 = vpow2.f32 %v5670_v47  ;;  %v6708_v47 = vld [vmem:[%s8983_s6 + $0x60] ss:$8 sps:$4 sm:$0xff]  }
0x1376   :  { %v2699_v46 = vpop.f32.mrb[84].mxu1 }
0x1377   :  { %v5671_v50 = vmul.f32 -1.442695, %v2699_v46  ;;  %v2701_v51 = vpop.f32.mrb[85].mxu1 }
0x1378   :  { %v2703_v21 = vpop.f32.mrb[86].mxu1 }
0x1379   :  { %6882 = vpow2.f32 %v5671_v50  ;;  %v5672_v13 = vmul.f32 -1.442695, %v2703_v21  ;;  %v2705_v44 = vpop.f32.mrb[87].mxu1 }
0x137b   :  { %v6879_v34 = vpop.eup %6878  ;;  %6884 = vpow2.f32 %v5672_v13 }
0x137c   :  { %v2728_v40 = vadd.f32 1.0, %v6879_v34 }
0x137d   :  { %v6881_v11 = vpop.eup %6880 }
0x137e   :  { %6886 = vrcp.f32 %v2728_v40  ;;  %v2729_v10 = vadd.f32 1.0, %v6881_v11 }
0x1380   :  { %6888 = vrcp.f32 %v2729_v10 }
0x1383   :  { %v6883_v26 = vpop.eup %6882 }
0x1384   :  { %v2730_v36 = vadd.f32 1.0, %v6883_v26 }
0x1385   :  { %v6885_v62 = vpop.eup %6884 }
0x1386   :  { %6890 = vrcp.f32 %v2730_v36  ;;  %v2731_v22 = vadd.f32 1.0, %v6885_v62 }
0x1388   :  { %v6887_v57 = vpop.eup %6886  ;;  %6892 = vrcp.f32 %v2731_v22 }
0x1389   :  { %v2746_v2 = vmul.f32 %v6887_v57, %v2689_v39 }
0x138a   :  { %v6889_v45 = vpop.eup %6888 }
0x138b   :  { %v2752_v24 = vmul.f32 %v2746_v2, %v2691_v1  ;;  %v2747_v32 = vmul.f32 %v6889_v45, %v2693_v37  ;;  %v6705_v1 = vld [vmem:[%s8983_s6 + $0x50] ss:$8 sps:$4 sm:$0xff]   ;;  %v6710_v37 = vld [vmem:[%s8983_s6 + $0x64] ss:$8 sps:$4 sm:$0xff]  }
0x138d   :  { %v2753_v19 = vmul.f32 %v2747_v32, %v2695_v15  ;;  %v6713_v15 = vld [vmem:[%s8983_s6 + $0x74] ss:$8 sps:$4 sm:$0xff]  }
0x138f   :  { %v2757_v48 = vpack.c.bf16 %v2753_v19, %v2752_v24 }
0x1390   :  { %v6891_v52 = vpop.eup %6890 }
0x1391   :  { %v2748_v29 = vmul.f32 %v6891_v52, %v2699_v46  ;;  %6315 = vmatmul.mubr.bf16.gmra.mrb[88].mxu0 %v2757_v48  ;;  %v6711_v46 = vld [vmem:[%s8983_s6 + $0x70] ss:$8 sps:$4 sm:$0xff]  }
0x1392   :  { %v6893_v55 = vpop.eup %6892  ;;  %6318 = vmatprep.mubr.msk.bf16.mxu0 %vm7220_vm1, %v7219_v9 }
0x1393   :  { %v2754_v30 = vmul.f32 %v2748_v29, %v2701_v51  ;;  %v2749_v16 = vmul.f32 %v6893_v55, %v2703_v21 }
0x1395   :  { %v2755_v63 = vmul.f32 %v2749_v16, %v2705_v44 }
0x1397   :  { %v2758_v54 = vpack.c.bf16 %v2755_v63, %v2754_v30 }
0x1399   :  { %6319 = vmatmul.mubr.bf16.gmra.mrb[92].mxu0 %v2758_v54 }
0x139a   :  { %6330 = vmatprep.mubr.msk.bf16.mxu0 %vm7220_vm1, %v7219_v9 }
0x13c9   :  { %v2857_v25 = vpop.f32.mrb[84].mxu0 }
0x13ca   :  { %v8226_v17 = vadd.f32 %v2857_v25, %v8085_v27  ;;  %v6312_v3 = vpop.f32.mrb[85].mxu0  ;;  %v6704_v27 = vld [vmem:[%s8983_s6 + $0x44] ss:$8 sps:$4 sm:$0xff]  }
0x13cb   :  { %v2860_v4 = vpop.f32.mrb[86].mxu0  ;;  %3009 = vmatprep.subr.bf16.mxu1 %v6704_v27 }
0x13cc   :  { %v8229_v14 = vadd.f32 %v2860_v4, %v8089_v28  ;;  %v6313_v58 = vpop.f32.mrb[87].mxu0  ;;  %v2888_v60 = vmul.f32 %v8226_v17, %v8226_v17  ;;  %v6702_v28 = vld [vmem:[%s8983_s6 + $0x40] ss:$8 sps:$4 sm:$0xff]  }
0x13cd   :  { %3010 = vmatpush1.bf16.msra.mxu1 %v6702_v28 }
0x13ce   :  { %v2894_v33 = vsel %vm387_vm0, %v2888_v60, 0.0  ;;  %v2889_v12 = vmul.f32 %v8229_v14, %v8229_v14  ;;  %3011 = vmatprep.subr.bf16.mxu1 %v6707_v8 }
0x13cf   :  { %2895 = vadd.xlane.f32.xlu0 %v2894_v33 }
0x13d0   :  { %v2897_v39 = vsel %vm387_vm0, %v2889_v12, 0.0 }
0x13d1   :  { %2898 = vadd.xlane.f32.xlu1 %v2897_v39  ;;  %3012 = vmatpush1.bf16.msra.mxu1 %v6705_v1 }
0x13d2   :  { %3013 = vmatprep.subr.bf16.mxu1 %v6710_v37 }
0x13d5   :  { %3014 = vmatpush1.bf16.msra.mxu1 %v6708_v47 }
0x13d6   :  { %3015 = vmatprep.subr.bf16.mxu1 %v6713_v15 }
0x13d9   :  { %3016 = vmatpush1.bf16.msra.mxu1 %v6711_v46 }
0x13da   :  { %6342 = vmatprep.subr.bf16.mxu1 %v7219_v9 }
0x145c   :  { %v2896_v50 = vpop.xlane.xlu0 %2895 }
0x145d   :  { %v2912_v51 = vmul.f32 0.015625, %v2896_v50 }
0x145e   :  { %v2899_v21 = vpop.xlane.xlu1 %2898 }
0x145f   :  { %v2918_v13 = vadd.f32 1e-06, %v2912_v51  ;;  %v2913_v44 = vmul.f32 0.015625, %v2899_v21 }
0x1461   :  { %6894 = vrsqrt.f32 %v2918_v13  ;;  %v2919_v34 = vadd.f32 1e-06, %v2913_v44 }
0x1463   :  { %6896 = vrsqrt.f32 %v2919_v34 }
0x1464   :  { %v2865_v40 = vpop.f32.mrb[88].mxu0 }
0x1465   :  { %v8263_v11 = vadd.f32 %v2865_v40, %v8123_v31  ;;  %v6316_v10 = vpop.f32.mrb[89].mxu0 }
0x1466   :  { %v2868_v26 = vpop.f32.mrb[90].mxu0 }
0x1467   :  { %v8266_v36 = vadd.f32 %v2868_v26, %v8127_v20  ;;  %v6317_v62 = vpop.f32.mrb[91].mxu0  ;;  %v2890_v22 = vmul.f32 %v8263_v11, %v8263_v11  ;;  %v5681_v20 = vld [vmem:[#allocation8 + $0x1] ss:$0 sm:$0xff] }
0x1469   :  { %v2900_v57 = vsel %vm387_vm0, %v2890_v22, 0.0  ;;  %v2891_v2 = vmul.f32 %v8266_v36, %v8266_v36 }
0x146a   :  { %2901 = vadd.xlane.f32.xlu0 %v2900_v57 }
0x146b   :  { %v6895_v45 = vpop.eup %6894  ;;  %v2903_v24 = vsel %vm387_vm0, %v2891_v2, 0.0 }
0x146c   :  { %v2930_v31 = vmul.f32 %v6895_v45, %v8226_v17  ;;  %2904 = vadd.xlane.f32.xlu1 %v2903_v24  ;;  %v2873_v32 = vpop.f32.mrb[92].mxu0 }
0x146d   :  { %v6897_v19 = vpop.eup %6896  ;;  %v8276_v48 = vadd.f32 %v2873_v32, %v8138_v23  ;;  %v6320_v52 = vpop.f32.mrb[93].mxu0 }
0x146e   :  { %v2931_v29 = vmul.f32 %v6897_v19, %v8229_v14  ;;  %v2876_v55 = vpop.f32.mrb[94].mxu0  ;;  %v2942_v54 = vmul.f32 %v5681_v20, %v2930_v31 }
0x146f   :  { %v8280_v30 = vadd.f32 %v2876_v55, %v8148_v6  ;;  %v6321_v16 = vpop.f32.mrb[95].mxu0  ;;  %v2892_v63 = vmul.f32 %v8276_v48, %v8276_v48 }
0x1470   :  { %v2943_v25 = vmul.f32 %v5681_v20, %v2931_v29 }
0x1471   :  { %v2906_v3 = vsel %vm387_vm0, %v2892_v63, 0.0  ;;  %v2893_v4 = vmul.f32 %v8280_v30, %v8280_v30 }
0x1472   :  { %2907 = vadd.xlane.f32.xlu0 %v2906_v3  ;;  %v2948_v23 = vpack.c.bf16 %v2943_v25, %v2942_v54 }
0x1473   :  { %v2909_v58 = vsel %vm387_vm0, %v2893_v4, 0.0 }
0x1474   :  { %2910 = vadd.xlane.f32.xlu1 %v2909_v58  ;;  %5698 = vmatmul.mubr.msk.bf16.vlgmr.msra.gmra.mrb[88].mxu1 %vm387_vm0, %v2948_v23  ;;  %v7054_v23 = vld [vmem:[#allocation2] sm:$0xff] }
0x1475   :  { %3051 = vmatprep.mubr.bf16.mxu1 %v7217_v0  ;;  %6343 = vmatpush3.bf16.msra.mxu1 %v8206_v59 }
0x1476   :  { %6344 = vmatprep.subr.bf16.mxu1 %v7219_v9 }
0x1479   :  { %6345 = vmatpush3.bf16.msra.mxu1 %v8210_v35 }
0x147a   :  { %6346 = vmatprep.subr.bf16.mxu1 %v7219_v9 }
0x147d   :  { %6347 = vmatpush3.bf16.msra.mxu1 %v8214_v38 }
0x147e   :  { %6348 = vmatprep.subr.bf16.mxu1 %v7219_v9 }
0x1481   :  { %6349 = vmatpush3.bf16.msra.mxu1 %v8218_v5 }
0x14f7   :  { %v2902_v6 = vpop.xlane.xlu0 %2901 }
0x14f8   :  { %v2914_v60 = vmul.f32 0.015625, %v2902_v6  ;;  %v7055_v6 = vld [vmem:[#allocation5] sm:$0xff] }
0x14f9   :  { %v2905_v33 = vpop.xlane.xlu1 %2904 }
0x14fa   :  { %v2920_v12 = vadd.f32 1e-06, %v2914_v60  ;;  %v2915_v39 = vmul.f32 0.015625, %v2905_v33 }
0x14fc   :  { %6898 = vrsqrt.f32 %v2920_v12  ;;  %v2921_v27 = vadd.f32 1e-06, %v2915_v39  ;;  %v7056_v39 = vld [vmem:[#allocation2 + $0x8] sm:$0xff] }
0x14fe   :  { %6900 = vrsqrt.f32 %v2921_v27 }
0x14ff   :  { %v2908_v59 = vpop.xlane.xlu0 %2907 }
0x1500   :  { %v2916_v28 = vmul.f32 0.015625, %v2908_v59 }
0x1501   :  { %v2911_v8 = vpop.xlane.xlu1 %2910 }
0x1502   :  { %v2922_v35 = vadd.f32 1e-06, %v2916_v28  ;;  %v2917_v1 = vmul.f32 0.015625, %v2911_v8  ;;  %v7057_v28 = vld [vmem:[#allocation5 + $0x8] sm:$0xff] }
0x1504   :  { %6902 = vrsqrt.f32 %v2922_v35  ;;  %v2923_v37 = vadd.f32 1e-06, %v2917_v1 }
0x1506   :  { %v6899_v38 = vpop.eup %6898  ;;  %6904 = vrsqrt.f32 %v2923_v37 }
0x1507   :  { %v2932_v47 = vmul.f32 %v6899_v38, %v8263_v11 }
0x1508   :  { %v6901_v5 = vpop.eup %6900 }
0x1509   :  { %v2933_v15 = vmul.f32 %v6901_v5, %v8266_v36  ;;  %v2944_v46 = vmul.f32 %v5681_v20, %v2932_v47 }
0x150b   :  { %v2945_v50 = vmul.f32 %v5681_v20, %v2933_v15 }
0x150d   :  { %v2949_v51 = vpack.c.bf16 %v2945_v50, %v2944_v46 }
0x150e   :  { %v6903_v21 = vpop.eup %6902 }
0x150f   :  { %5699 = vmatmul.mubr.msk.bf16.gmra.mrb[92].mxu1 %vm387_vm0, %v2949_v51  ;;  %v2934_v13 = vmul.f32 %v6903_v21, %v8276_v48 }
0x1510   :  { %v6905_v44 = vpop.eup %6904  ;;  %3061 = vmatprep.mubr.bf16.mxu1 %v7217_v0 }
0x1511   :  { %v2935_v34 = vmul.f32 %v6905_v44, %v8280_v30  ;;  %v2946_v40 = vmul.f32 %v5681_v20, %v2934_v13  ;;  %v7058_v44 = vld [vmem:[#allocation2 + $0x10] sm:$0xff] }
0x1513   :  { %v2947_v10 = vmul.f32 %v5681_v20, %v2935_v34 }
0x1515   :  { %v2950_v26 = vpack.c.bf16 %v2947_v10, %v2946_v40  ;;  %v7059_v40 = vld [vmem:[#allocation5 + $0x10] sm:$0xff] }
0x1517   :  { %5700 = vmatmul.mubr.msk.bf16.gmra.mrb[96].mxu1 %vm387_vm0, %v2950_v26 }
0x1518   :  { %6350 = vmatprep.mubr.msk.bf16.mxu1 %vm7220_vm1, %v7219_v9 }
0x1547   :  { %v8306_v62 = vpop.f32.mrb[88].mxu1 }
0x1548   :  { %v3045_v22 = vpop.f32.mrb[89].mxu1  ;;  %v3072_v58 = vmul.f32 %v7054_v23, %v8306_v62  ;;  %v7062_v23 = vld [vmem:[#allocation2 + $0x20] sm:$0xff] }
0x1549   :  { %v8308_v57 = vpop.f32.mrb[90].mxu1 }
0x154a   :  { %v3078_v2 = vpack.c.bf16 %v8308_v57, %v8306_v62  ;;  %v3049_v45 = vpop.f32.mrb[91].mxu1  ;;  %v3073_v27 = vmul.f32 %v7056_v39, %v8308_v57  ;;  %v7064_v39 = vld [vmem:[#allocation2 + $0x28] sm:$0xff] }
0x154b   :  { %v8312_v24 = vpack.c.bf16 %v3049_v45, %v3045_v22 }
0x154c   :  { %3168 = vrot.lane.b32.xlu0 %v3078_v2, %s7214_s1  ;;  %6331 = vmatmul.mubr.msk.bf16.vlgmr.msra.gmra.mrb[96].mxu0 %vm387_vm0, %v3078_v2  ;;  %v7060_v2 = vld [vmem:[#allocation2 + $0x18] sm:$0xff] }
0x154d   :  { %6334 = vmatprep.mubr.msk.bf16.mxu0 %vm7220_vm1, %v7219_v9 }
0x15be   :  { %v3169_v31 = vpop.permute.xlu0 %3168 }
0x15bf   :  { %6351 = vmatmul.mubr.msk.bf16.vlgmr.msra.gmra.mrb[100].mxu1 %vm387_vm0, %v3169_v31 }
0x15c0   :  { %6354 = vmatprep.mubr.msk.bf16.mxu1 %vm7220_vm1, %v7219_v9 }
0x15e2   :  { %v8321_v32 = vpop.f32.mrb[92].mxu1 }
0x15e3   :  { %v8323_v19 = vpop.f32.mrb[93].mxu1  ;;  %v3074_v34 = vmul.f32 %v7058_v44, %v8321_v32 }
0x15e4   :  { %v8325_v20 = vpop.f32.mrb[94].mxu1 }
0x15e5   :  { %v3079_v52 = vpack.c.bf16 %v8325_v20, %v8321_v32  ;;  %v3059_v29 = vpop.f32.mrb[95].mxu1  ;;  %v3075_v45 = vmul.f32 %v7060_v2, %v8325_v20 }
0x15e7   :  { %3170 = vrot.lane.b32.xlu1 %v3079_v52, %s7214_s1  ;;  %6335 = vmatmul.mubr.msk.bf16.gmra.mrb[100].mxu0 %vm387_vm0, %v3079_v52  ;;  %v7061_v52 = vld [vmem:[#allocation5 + $0x18] sm:$0xff] }
0x15e8   :  { %6338 = vmatprep.mubr.msk.bf16.mxu0 %vm7220_vm1, %v7219_v9 }
0x15ea   :  { %v8333_v55 = vpop.f32.mrb[96].mxu1 }
0x15eb   :  { %v3065_v16 = vpop.f32.mrb[97].mxu1 }
0x15ec   :  { %v8335_v63 = vpack.c.bf16 %v3065_v16, %v3059_v29  ;;  %v8337_v54 = vpop.f32.mrb[98].mxu1 }
0x15ed   :  { %v3080_v25 = vpack.c.bf16 %v8337_v54, %v8333_v55  ;;  %v8341_v3 = vpop.f32.mrb[99].mxu1 }
0x15ef   :  { %3172 = vrot.lane.b32.xlu1 %v3080_v25, %s7214_s1  ;;  %6339 = vmatmul.mubr.msk.bf16.gmra.mrb[104].mxu0 %vm387_vm0, %v3080_v25 }
0x161f   :  { %v3124_v4 = vpop.f32.mrb[96].mxu0 }
0x1620   :  { %v3147_v60 = vmul.f32 %v7055_v6, %v3124_v4  ;;  %v6332_v33 = vpop.f32.mrb[97].mxu0 }
0x1621   :  { %v3127_v12 = vpop.f32.mrb[98].mxu0 }
0x1622   :  { %v3153_v59 = vadd.f32 %v3147_v60, %v3072_v58  ;;  %v3148_v8 = vmul.f32 %v7057_v28, %v3127_v12  ;;  %v6333_v35 = vpop.f32.mrb[99].mxu0  ;;  %v3076_v58 = vmul.f32 %v7062_v23, %v8333_v55  ;;  %v3163_v23 = vmul.f32 %v8333_v55, %v7634_v61 }
0x1624   :  { %v3154_v1 = vadd.f32 %v3148_v8, %v3073_v27  ;;  %v3077_v27 = vmul.f32 %v7064_v39, %v8337_v54 }
0x1626   :  { %v8347_v37 = vpack.c.bf16 %v3154_v1, %v3153_v59 }
0x1628   :  { %6366 = vmatprep.mubr.msk.bf16.mxu0 %vm844_vm4, %v8347_v37 }
0x1659   :  { %v3171_v38 = vpop.permute.xlu1 %3170 }
0x165a   :  { %6355 = vmatmul.mubr.msk.bf16.gmra.mrb[104].mxu1 %vm387_vm0, %v3171_v38 }
0x165b   :  { %6358 = vmatprep.mubr.msk.bf16.mxu1 %vm7220_vm1, %v7219_v9 }
0x1661   :  { %v3173_v47 = vpop.permute.xlu1 %3172 }
0x1662   :  { %6359 = vmatmul.mubr.msk.bf16.gmra.mrb[108].mxu1 %vm387_vm0, %v3173_v47 }
0x1692   :  { %v3217_v5 = vpop.f32.mrb[100].mxu1 }
0x1693   :  { %v3240_v15 = vmul.f32 %v7055_v6, %v3217_v5  ;;  %v6352_v46 = vpop.f32.mrb[101].mxu1  ;;  %v7063_v6 = vld [vmem:[#allocation5 + $0x20] sm:$0xff]  ;;  %v3159_v5 = vmul.f32 %v8306_v62, %v7614_v42 }
0x1694   :  { %v3220_v50 = vpop.f32.mrb[102].mxu1 }
0x1695   :  { %v3241_v51 = vmul.f32 %v7057_v28, %v3220_v50  ;;  %3252 = vrot.lane.b32.xlu0 %v3240_v15, %s7214_s1  ;;  %v6353_v21 = vpop.f32.mrb[103].mxu1  ;;  %v7065_v28 = vld [vmem:[#allocation5 + $0x28] sm:$0xff]  ;;  %v3160_v15 = vmul.f32 %v8308_v57, %v7616_v43 }
0x1697   :  { %3254 = vrot.lane.b32.xlu1 %v3241_v51, %s7214_s1 }
0x16ba   :  { %v3132_v13 = vpop.f32.mrb[100].mxu0 }
0x16bb   :  { %v3149_v10 = vmul.f32 %v7059_v40, %v3132_v13  ;;  %v6336_v26 = vpop.f32.mrb[101].mxu0 }
0x16bc   :  { %v3135_v22 = vpop.f32.mrb[102].mxu0 }
0x16bd   :  { %v8359_v31 = vadd.f32 %v3149_v10, %v3074_v34  ;;  %v3150_v29 = vmul.f32 %v7061_v52, %v3135_v22  ;;  %v6337_v16 = vpop.f32.mrb[103].mxu0 }
0x16bf   :  { %v3156_v25 = vadd.f32 %v3150_v29, %v3075_v45 }
0x16c2   :  { %v3140_v4 = vpop.f32.mrb[104].mxu0 }
0x16c3   :  { %v3151_v60 = vmul.f32 %v7063_v6, %v3140_v4  ;;  %v6340_v33 = vpop.f32.mrb[105].mxu0  ;;  %v3162_v4 = vmul.f32 %v8325_v20, %v7628_v56  ;;  %v8408_v20 = vpack.c.bf16 %v8359_v31, %v8359_v31 }
0x16c4   :  { %v3143_v12 = vpop.f32.mrb[106].mxu0 }
0x16c5   :  { %v3157_v59 = vadd.f32 %v3151_v60, %v3076_v58  ;;  %v3152_v8 = vmul.f32 %v7065_v28, %v3143_v12  ;;  %v6341_v35 = vpop.f32.mrb[107].mxu0 }
0x16c6   :  { %v8432_v35 = vpack.c.bf16 %v8341_v3, %v8341_v3 }
0x16c7   :  { %v8363_v1 = vpack.c.bf16 %v3157_v59, %v3156_v25  ;;  %v8365_v38 = vadd.f32 %v3152_v8, %v3077_v27 }
0x16c9   :  { %6374 = vmatprep.mubr.msk.bf16.mxu1 %vm844_vm4, %v8363_v1  ;;  %v8428_v8 = vpack.c.bf16 %v8365_v38, %v8365_v38 }
0x1707   :  { %v3253_v47 = vpop.permute.xlu0 %3252 }
0x1708   :  { %v3270_v50 = vadd.f32 %v3253_v47, %v3159_v5  ;;  %v3575_v47 = vsel %vm1063_vm5, %v8432_v35, 0 }
0x1709   :  { %v3255_v46 = vpop.permute.xlu1 %3254 }
0x170a   :  { %v3271_v51 = vadd.f32 %v3255_v46, %v3160_v15 }
0x170c   :  { %v8373_v21 = vpack.c.bf16 %v3271_v51, %v3270_v50 }
0x172d   :  { %v3225_v13 = vpop.f32.mrb[104].mxu1 }
0x172e   :  { %v3242_v44 = vmul.f32 %v7059_v40, %v3225_v13  ;;  %v6356_v34 = vpop.f32.mrb[105].mxu1  ;;  %v3161_v40 = vmul.f32 %v8321_v32, %v7622_v53 }
0x172f   :  { %v3228_v10 = vpop.f32.mrb[106].mxu1 }
0x1730   :  { %v3243_v26 = vmul.f32 %v7061_v52, %v3228_v10  ;;  %3256 = vrot.lane.b32.xlu0 %v3242_v44, %s7214_s1  ;;  %v6357_v22 = vpop.f32.mrb[107].mxu1 }
0x1732   :  { %3258 = vrot.lane.b32.xlu1 %v3243_v26, %s7214_s1 }
0x1735   :  { %v3233_v2 = vpop.f32.mrb[108].mxu1 }
0x1736   :  { %v3244_v42 = vmul.f32 %v7063_v6, %v3233_v2  ;;  %v6360_v62 = vpop.f32.mrb[109].mxu1  ;;  %v3164_v6 = vmul.f32 %v8337_v54, %v7642_v7  ;;  %v8412_v54 = vpack.c.bf16 %v8323_v19, %v8323_v19 }
0x1737   :  { %v3236_v45 = vpop.f32.mrb[110].mxu1 }
0x1738   :  { %v3245_v43 = vmul.f32 %v7065_v28, %v3236_v45  ;;  %3260 = vrot.lane.b32.xlu0 %v3244_v42, %s7214_s1  ;;  %v6361_v57 = vpop.f32.mrb[111].mxu1  ;;  %v3518_v19 = vsel %vm1063_vm5, %v8412_v54, 0 }
0x173a   :  { %3262 = vrot.lane.b32.xlu1 %v3245_v43, %s7214_s1 }
0x173c   :  { %3299 = vrot.lane.b32.xlu0 %v8373_v21, %s7214_s1 }
0x17a2   :  { %v3257_v52 = vpop.permute.xlu0 %3256 }
0x17a3   :  { %v3272_v29 = vadd.f32 %v3257_v52, %v3161_v40 }
0x17a4   :  { %v3259_v25 = vpop.permute.xlu1 %3258 }
0x17a5   :  { %v8383_v16 = vpack.c.bf16 %v3272_v29, %v3272_v29  ;;  %v3273_v60 = vadd.f32 %v3259_v25, %v3162_v4 }
0x17a7   :  { %3301 = vrot.lane.b32.xlu1 %v8383_v16, %s7214_s1 }
0x17aa   :  { %v3261_v58 = vpop.permute.xlu0 %3260 }
0x17ab   :  { %v3274_v53 = vadd.f32 %v3261_v58, %v3163_v23 }
0x17ac   :  { %v3263_v32 = vpop.permute.xlu1 %3262 }
0x17ad   :  { %v8393_v33 = vpack.c.bf16 %v3274_v53, %v3273_v60  ;;  %v3275_v12 = vadd.f32 %v3263_v32, %v3164_v6 }
0x17ae   :  { %v3300_v39 = vpop.permute.xlu0 %3299 }
0x17af   :  { %v8395_v27 = vpack.c.bf16 %v3275_v12, %v3275_v12  ;;  %3365 = vrot.lane.b32.xlu0 %v8393_v33, %s7214_s1  ;;  %6598 = vmatprep.subr.msk.bf16.mxu0 %vm844_vm4, %v3300_v39  ;;  %v3310_v56 = vsel %vm844_vm4, %v3300_v39, 0 }
0x17b0   :  { %6363 = vmatpush3.bf16.xpose.msra.mxu0 %v3310_v56 }
0x17b1   :  { %3367 = vrot.lane.b32.xlu1 %v8395_v27, %s7214_s1 }
0x1819   :  { %v3302_v61 = vpop.permute.xlu1 %3301 }
0x181a   :  { %v3313_v7 = vsel %vm844_vm4, %v3302_v61, 0  ;;  %6599 = vmatprep.subr.msk.bf16.mxu0 %vm844_vm4, %v3302_v61 }
0x181b   :  { %6365 = vmatpush3.bf16.xpose.msra.mxu0 %v3313_v7 }
0x181c   :  { %6378 = vmatprep.subr.bf16.mxu0 %v8312_v24 }
0x1821   :  { %v3366_v55 = vpop.permute.xlu0 %3365 }
0x1822   :  { %6367 = vmatmul.mubr.msk.bf16.vlgmr.msra.gmra.mrb[108].mxu0 %vm844_vm4, %v8408_v20  ;;  %6600 = vmatprep.subr.msk.bf16.mxu1 %vm844_vm4, %v3366_v55  ;;  %v3376_v59 = vsel %vm844_vm4, %v3366_v55, 0 }
0x1823   :  { %6371 = vmatpush3.bf16.xpose.msra.mxu1 %v3376_v59  ;;  %6379 = vmatpush3.bf16.msra.mxu0 %v8312_v24  ;;  %v3368_v28 = vpop.permute.xlu1 %3367 }
0x1824   :  { %6601 = vmatprep.subr.msk.bf16.mxu1 %vm844_vm4, %v3368_v28  ;;  %6602 = vmatprep.subr.msk.bf16.mxu0 %vm1063_vm5, %v8412_v54  ;;  %v3379_v31 = vsel %vm844_vm4, %v3368_v28, 0 }
0x1827   :  { %6381 = vmatpush3.bf16.msra.mxu0 %v3518_v19 }
0x182b   :  { %6373 = vmatpush3.bf16.xpose.msra.mxu1 %v3379_v31 }
0x182c   :  { %6386 = vmatprep.subr.bf16.mxu1 %v8335_v63 }
0x1832   :  { %6375 = vmatmul.mubr.msk.bf16.vlgmr.msra.gmra.mrb[112].mxu1 %vm844_vm4, %v8428_v8 }
0x1833   :  { %6387 = vmatpush3.bf16.msra.mxu1 %v8335_v63 }
0x1834   :  { %6603 = vmatprep.subr.msk.bf16.mxu1 %vm1063_vm5, %v8432_v35 }
0x1837   :  { %6389 = vmatpush3.bf16.msra.mxu1 %v3575_v47 }
0x18f5   :  { %v6368_v5 = vpop.f32.mrb[108].mxu0 }
0x18f6   :  { %v3349_v15 = vpop.f32.mrb[109].mxu0  ;;  %v3431_v38 = vmul.f32 0.25, %v6368_v5 }
0x18f7   :  { %v3429_v46 = vmul.f32 0.25, %v3349_v15  ;;  %v6369_v50 = vpop.f32.mrb[110].mxu0 }
0x18f8   :  { %v3352_v51 = vpop.f32.mrb[111].mxu0  ;;  %v3437_v34 = vsel %vm7699_vm9, %v3431_v38, -1e+30 }
0x18f9   :  { %v3435_v3 = vsel %vm7687_vm6, %v3429_v46, -1e+30  ;;  %v3430_v13 = vmul.f32 0.25, %v3352_v51  ;;  %v3447_v22 = vsel %vm986_vm7, %v3437_v34, -inf }
0x18fa   :  { %v3441_v44 = vsel %vm986_vm7, %v3435_v3, -inf }
0x18fb   :  { %v3436_v10 = vsel %vm7692_vm8, %v3430_v13, -1e+30  ;;  %3442 = vmax.xlane.f32.xlu0 %v3441_v44 }
0x18fc   :  { %v3444_v26 = vsel %vm986_vm7, %v3436_v10, -inf }
0x18fd   :  { %3445 = vmax.xlane.f32.xlu1 %v3444_v26 }
0x18ff   :  { %3448 = vmax.xlane.f32.xlu0 %v3447_v22 }
0x1905   :  { %v6376_v2 = vpop.f32.mrb[112].mxu1 }
0x1906   :  { %v3415_v42 = vpop.f32.mrb[113].mxu1  ;;  %v3434_v62 = vmul.f32 0.25, %v6376_v2 }
0x1907   :  { %v3432_v45 = vmul.f32 0.25, %v3415_v42  ;;  %v6377_v43 = vpop.f32.mrb[114].mxu1 }
0x1908   :  { %v3418_v57 = vpop.f32.mrb[115].mxu1  ;;  %v3440_v25 = vsel %vm7699_vm9, %v3434_v62, -1e+30 }
0x1909   :  { %v3438_v40 = vsel %vm7687_vm6, %v3432_v45, -1e+30  ;;  %v3433_v52 = vmul.f32 0.25, %v3418_v57  ;;  %v3456_v58 = vsel %vm986_vm7, %v3440_v25, -inf }
0x190a   :  { %v3450_v29 = vsel %vm986_vm7, %v3438_v40, -inf }
0x190b   :  { %v3439_v4 = vsel %vm7692_vm8, %v3433_v52, -1e+30  ;;  %3451 = vmax.xlane.f32.xlu0 %v3450_v29 }
0x190c   :  { %v3453_v23 = vsel %vm986_vm7, %v3439_v4, -inf }
0x190d   :  { %3454 = vmax.xlane.f32.xlu1 %v3453_v23 }
0x190f   :  { %3457 = vmax.xlane.f32.xlu0 %v3456_v58 }
0x191e   :  { %3634 = vrot.lane.b32.xlu1 %v8373_v21, %s7221_s27 }
0x1988   :  { %v3443_v6 = vpop.xlane.xlu0 %3442 }
0x1989   :  { %v3459_v53 = vsub.f32 %v3435_v3, %v3443_v6 }
0x198a   :  { %v3446_v60 = vpop.xlane.xlu1 %3445 }
0x198b   :  { %v3460_v32 = vsub.f32 %v3436_v10, %v3446_v60  ;;  %v3465_v61 = vmul.f32 1.442695, %v3459_v53 }
0x198c   :  { %v3449_v12 = vpop.xlane.xlu0 %3448 }
0x198d   :  { %v3467_v39 = vmul.f32 1.442695, %v3460_v32  ;;  %v3461_v56 = vsub.f32 %v3437_v34, %v3449_v12 }
0x198f   :  { %6906 = vpow2.f32 %v3467_v39  ;;  %v3469_v7 = vmul.f32 1.442695, %v3461_v56 }
0x1991   :  { %6908 = vpow2.f32 %v3469_v7 }
0x1992   :  { %6910 = vpow2.f32 %v3465_v61 }
0x1998   :  { %v3452_v55 = vpop.xlane.xlu0 %3451 }
0x1999   :  { %v6907_v59 = vpop.eup %6906  ;;  %v3462_v47 = vsub.f32 %v3438_v40, %v3452_v55 }
0x199a   :  { %v3455_v28 = vpop.xlane.xlu1 %3454  ;;  %v3480_v19 = vsel %vm986_vm7, %v6907_v59, 0.0 }
0x199b   :  { %v6909_v31 = vpop.eup %6908  ;;  %3481 = vadd.xlane.f32.xlu0 %v3480_v19  ;;  %v3471_v51 = vmul.f32 1.442695, %v3462_v47  ;;  %v3463_v22 = vsub.f32 %v3439_v4, %v3455_v28 }
0x199c   :  { %v3458_v5 = vpop.xlane.xlu0 %3457  ;;  %v3483_v15 = vsel %vm986_vm7, %v6909_v31, 0.0  ;;  %v6911_v38 = vpop.eup %6910 }
0x199d   :  { %v3464_v46 = vsub.f32 %v3440_v25, %v3458_v5  ;;  %3484 = vadd.xlane.f32.xlu1 %v3483_v15  ;;  %v3477_v13 = vsel %vm986_vm7, %v6911_v38, 0.0  ;;  %v3473_v2 = vmul.f32 1.442695, %v3463_v22 }
0x199e   :  { %v3635_v50 = vpop.permute.xlu1 %3634 }
0x199f   :  { %v3475_v3 = vmul.f32 1.442695, %v3464_v46  ;;  %6604 = vmatprep.subr.msk.bf16.mxu0 %vm844_vm4, %v3635_v50  ;;  %v3645_v12 = vsel %vm844_vm4, %v3635_v50, 0 }
0x19a1   :  { %6912 = vpow2.f32 %v3475_v3  ;;  %3478 = vadd.xlane.f32.xlu1 %v3477_v13 }
0x19a2   :  { %6914 = vpow2.f32 %v3471_v51 }
0x19a3   :  { %6916 = vpow2.f32 %v3473_v2 }
0x19ab   :  { %v6913_v44 = vpop.eup %6912 }
0x19ac   :  { %v3492_v34 = vsel %vm986_vm7, %v6913_v44, 0.0  ;;  %v6915_v10 = vpop.eup %6914 }
0x19ad   :  { %3493 = vadd.xlane.f32.xlu0 %v3492_v34  ;;  %v3486_v26 = vsel %vm986_vm7, %v6915_v10, 0.0  ;;  %v6917_v42 = vpop.eup %6916 }
0x19ae   :  { %v3489_v62 = vsel %vm986_vm7, %v6917_v42, 0.0 }
0x19b1   :  { %3487 = vadd.xlane.f32.xlu0 %v3486_v26 }
0x19b2   :  { %3704 = vrot.lane.b32.xlu1 %v8393_v33, %s7221_s27 }
0x19c7   :  { %3636 = vrot.lane.b32.xlu0 %v8383_v16, %s7221_s27 }
0x19cb   :  { %3632 = vrot.lane.b32.xlu0 %v8408_v20, %s7222_s3 }
0x19cf   :  { %3700 = vrot.lane.b32.xlu0 %v8363_v1, %s7222_s3 }
0x19d6   :  { %3490 = vadd.xlane.f32.xlu1 %v3489_v62 }
0x19e7   :  { %3630 = vrot.lane.b32.xlu1 %v8347_v37, %s7222_s3 }
0x19eb   :  { %3706 = vrot.lane.b32.xlu1 %v8395_v27, %s7221_s27 }
0x19ef   :  { %3702 = vrot.lane.b32.xlu1 %v8428_v8, %s7222_s3 }
0x1a28   :  { %v3482_v45 = vpop.xlane.xlu0 %3481 }
0x1a2a   :  { %v3485_v43 = vpop.xlane.xlu1 %3484 }
0x1a2b   :  { %6918 = vrcp.f32 %v3485_v43 }
0x1a2c   :  { %6920 = vrcp.f32 %v3482_v45 }
0x1a2e   :  { %v3479_v57 = vpop.xlane.xlu1 %3478 }
0x1a2f   :  { %6922 = vrcp.f32 %v3479_v57 }
0x1a32   :  { %v3705_v40 = vpop.permute.xlu1 %3704 }
0x1a33   :  { %6606 = vmatprep.subr.msk.bf16.mxu1 %vm844_vm4, %v3705_v40  ;;  %v3715_v46 = vsel %vm844_vm4, %v3705_v40, 0 }
0x1a35   :  { %v6919_v52 = vpop.eup %6918 }
0x1a36   :  { %v6921_v29 = vpop.eup %6920  ;;  %v3503_v4 = vmul.f32 %v6919_v52, %v6909_v31 }
0x1a37   :  { %v3502_v6 = vmul.f32 %v6921_v29, %v6907_v59 }
0x1a38   :  { %v3508_v53 = vpack.c.bf16 %v3503_v4, %v3503_v4 }
0x1a39   :  { %v6923_v25 = vpop.eup %6922 }
0x1a3a   :  { %v3494_v23 = vpop.xlane.xlu0 %3493  ;;  %v3501_v58 = vmul.f32 %v6923_v25, %v6911_v38 }
0x1a3b   :  { %6924 = vrcp.f32 %v3494_v23 }
0x1a3c   :  { %v3507_v60 = vpack.c.bf16 %v3502_v6, %v3501_v58 }
0x1a3e   :  { %v3488_v32 = vpop.xlane.xlu0 %3487  ;;  %6382 = vmatprep.mubr.msk.bf16.mxu0 %vm986_vm7, %v3507_v60 }
0x1a3f   :  { %6383 = vmatmul.mubr.msk.bf16.vlgmr.msra.gmra.mrb[112].mxu0 %vm986_vm7, %v3508_v53  ;;  %6926 = vrcp.f32 %v3488_v32 }
0x1a40   :  { %6395 = vmatpush3.bf16.xpose.msra.mxu0 %v3645_v12 }
0x1a42   :  { %v3637_v39 = vpop.permute.xlu0 %3636 }
0x1a43   :  { %6605 = vmatprep.subr.msk.bf16.mxu0 %vm844_vm4, %v3637_v39  ;;  %v3648_v56 = vsel %vm844_vm4, %v3637_v39, 0 }
0x1a45   :  { %v6925_v59 = vpop.eup %6924 }
0x1a46   :  { %v3633_v55 = vpop.permute.xlu0 %3632  ;;  %v3506_v31 = vmul.f32 %v6925_v59, %v6913_v44 }
0x1a48   :  { %6397 = vmatpush3.bf16.xpose.msra.mxu0 %v3648_v56  ;;  %v3510_v38 = vpack.c.bf16 %v3506_v31, %v3506_v31 }
0x1a49   :  { %v6927_v28 = vpop.eup %6926 }
0x1a4a   :  { %v3504_v47 = vmul.f32 %v6927_v28, %v6915_v10  ;;  %v3701_v50 = vpop.permute.xlu0 %3700 }
0x1a63   :  { %v3491_v61 = vpop.xlane.xlu1 %3490 }
0x1a64   :  { %6928 = vrcp.f32 %v3491_v61 }
0x1a67   :  { %v3631_v7 = vpop.permute.xlu1 %3630 }
0x1a68   :  { %6398 = vmatprep.mubr.msk.bf16.mxu0 %vm844_vm4, %v3631_v7 }
0x1a69   :  { %6399 = vmatmul.mubr.msk.bf16.vlgmr.msra.gmra.mrb[116].mxu0 %vm844_vm4, %v3633_v55 }
0x1a6b   :  { %v3707_v51 = vpop.permute.xlu1 %3706 }
0x1a6c   :  { %v3718_v3 = vsel %vm844_vm4, %v3707_v51, 0 }
0x1a6e   :  { %v6929_v19 = vpop.eup %6928 }
0x1a6f   :  { %v3505_v5 = vmul.f32 %v6929_v19, %v6917_v42  ;;  %v3703_v13 = vpop.permute.xlu1 %3702 }
0x1a71   :  { %v3509_v15 = vpack.c.bf16 %v3505_v5, %v3504_v47 }
0x1a73   :  { %6390 = vmatprep.mubr.msk.bf16.mxu1 %vm986_vm7, %v3509_v15 }
0x1a74   :  { %6391 = vmatmul.mubr.msk.bf16.vlgmr.msra.gmra.mrb[116].mxu1 %vm986_vm7, %v3510_v38 }
0x1a75   :  { %6403 = vmatpush3.bf16.xpose.msra.mxu1 %v3715_v46  ;;  %6406 = vmatprep.mubr.msk.bf16.mxu1 %vm844_vm4, %v3701_v50 }
0x1a76   :  { %6607 = vmatprep.subr.msk.bf16.mxu1 %vm844_vm4, %v3707_v51 }
0x1a7d   :  { %6405 = vmatpush3.bf16.xpose.msra.mxu1 %v3718_v3 }
0x1a84   :  { %6407 = vmatmul.mubr.msk.bf16.vlgmr.msra.gmra.mrb[120].mxu1 %vm844_vm4, %v3703_v13 }
0x1b12   :  { %v8497_v44 = vpop.f32.mrb[112].mxu0 }
0x1b13   :  { %v8499_v34 = vpop.f32.mrb[113].mxu0 }
0x1b14   :  { %v6385_v10 = vpop.f32.mrb[114].mxu0 }
0x1b15   :  { %v8501_v26 = vpop.f32.mrb[115].mxu0 }
0x1b16   :  { %v3625_v22 = vpack.c.bf16 %v8501_v26, %v8499_v34 }
0x1b3c   :  { %v6400_v2 = vpop.f32.mrb[116].mxu0 }
0x1b3d   :  { %v3684_v42 = vpop.f32.mrb[117].mxu0  ;;  %v3770_v62 = vmul.f32 0.25, %v6400_v2 }
0x1b3e   :  { %v3768_v45 = vmul.f32 0.25, %v3684_v42  ;;  %v6401_v43 = vpop.f32.mrb[118].mxu0 }
0x1b3f   :  { %v3687_v57 = vpop.f32.mrb[119].mxu0  ;;  %v3776_v25 = vsel %vm7699_vm9, %v3770_v62, -1e+30 }
0x1b40   :  { %v3774_v40 = vsel %vm7687_vm6, %v3768_v45, -1e+30  ;;  %v3769_v52 = vmul.f32 0.25, %v3687_v57  ;;  %v3786_v58 = vsel %vm986_vm7, %v3776_v25, -inf }
0x1b41   :  { %v3780_v29 = vsel %vm986_vm7, %v3774_v40, -inf }
0x1b42   :  { %v3775_v4 = vsel %vm7692_vm8, %v3769_v52, -1e+30  ;;  %3781 = vmax.xlane.f32.xlu0 %v3780_v29 }
0x1b43   :  { %v3783_v23 = vsel %vm986_vm7, %v3775_v4, -inf }
0x1b44   :  { %3784 = vmax.xlane.f32.xlu1 %v3783_v23 }
0x1b46   :  { %3787 = vmax.xlane.f32.xlu0 %v3786_v58 }
0x1b47   :  { %v8514_v6 = vpop.f32.mrb[116].mxu1 }
0x1b48   :  { %v8516_v60 = vpop.f32.mrb[117].mxu1 }
0x1b49   :  { %v3626_v53 = vpack.c.bf16 %v8516_v60, %v8497_v44  ;;  %v6393_v32 = vpop.f32.mrb[118].mxu1 }
0x1b4a   :  { %v8520_v12 = vpop.f32.mrb[119].mxu1 }
0x1b4b   :  { %v3627_v39 = vpack.c.bf16 %v8514_v6, %v8520_v12 }
0x1b57   :  { %v6408_v56 = vpop.f32.mrb[120].mxu1 }
0x1b58   :  { %v3754_v61 = vpop.f32.mrb[121].mxu1  ;;  %v3773_v7 = vmul.f32 0.25, %v6408_v56 }
0x1b59   :  { %v3771_v55 = vmul.f32 0.25, %v3754_v61  ;;  %v6409_v59 = vpop.f32.mrb[122].mxu1 }
0x1b5a   :  { %v3757_v28 = vpop.f32.mrb[123].mxu1  ;;  %v3779_v5 = vsel %vm7699_vm9, %v3773_v7, -1e+30 }
0x1b5b   :  { %v3777_v19 = vsel %vm7687_vm6, %v3771_v55, -1e+30  ;;  %v3772_v31 = vmul.f32 0.25, %v3757_v28  ;;  %v3795_v46 = vsel %vm986_vm7, %v3779_v5, -inf }
0x1b5c   :  { %v3789_v47 = vsel %vm986_vm7, %v3777_v19, -inf }
0x1b5d   :  { %v3778_v15 = vsel %vm7692_vm8, %v3772_v31, -1e+30  ;;  %3790 = vmax.xlane.f32.xlu0 %v3789_v47 }
0x1b5e   :  { %v3792_v38 = vsel %vm986_vm7, %v3778_v15, -inf }
0x1b5f   :  { %3793 = vmax.xlane.f32.xlu1 %v3792_v38 }
0x1b61   :  { %3796 = vmax.xlane.f32.xlu0 %v3795_v46 }
0x1b70   :  { %3852 = vrot.lane.b32.xlu1 %v8312_v24, %s7222_s3 }
0x1bcf   :  { %v3782_v50 = vpop.xlane.xlu0 %3781 }
0x1bd0   :  { %v3798_v3 = vsub.f32 %v3774_v40, %v3782_v50 }
0x1bd1   :  { %v3785_v51 = vpop.xlane.xlu1 %3784 }
0x1bd2   :  { %v3799_v13 = vsub.f32 %v3775_v4, %v3785_v51  ;;  %v3804_v62 = vmul.f32 1.442695, %v3798_v3 }
0x1bd3   :  { %v3788_v10 = vpop.xlane.xlu0 %3787 }
0x1bd4   :  { %v3806_v2 = vmul.f32 1.442695, %v3799_v13  ;;  %v3800_v42 = vsub.f32 %v3776_v25, %v3788_v10 }
0x1bd6   :  { %6930 = vpow2.f32 %v3806_v2  ;;  %v3808_v45 = vmul.f32 1.442695, %v3800_v42 }
0x1bd8   :  { %6932 = vpow2.f32 %v3808_v45 }
0x1bd9   :  { %6934 = vpow2.f32 %v3804_v62 }
0x1be0   :  { %v6931_v43 = vpop.eup %6930 }
0x1be1   :  { %v3819_v57 = vsel %vm986_vm7, %v6931_v43, 0.0 }
0x1be2   :  { %v6933_v52 = vpop.eup %6932  ;;  %3820 = vadd.xlane.f32.xlu0 %v3819_v57 }
0x1be3   :  { %v3822_v29 = vsel %vm986_vm7, %v6933_v52, 0.0  ;;  %v6935_v23 = vpop.eup %6934 }
0x1be4   :  { %3823 = vadd.xlane.f32.xlu1 %v3822_v29  ;;  %v3816_v40 = vsel %vm986_vm7, %v6935_v23, 0.0 }
0x1be8   :  { %3817 = vadd.xlane.f32.xlu1 %v3816_v40 }
0x1bea   :  { %v3791_v4 = vpop.xlane.xlu0 %3790 }
0x1beb   :  { %v3801_v25 = vsub.f32 %v3777_v19, %v3791_v4 }
0x1bec   :  { %v3794_v58 = vpop.xlane.xlu1 %3793 }
0x1bed   :  { %v3810_v7 = vmul.f32 1.442695, %v3801_v25  ;;  %v3802_v47 = vsub.f32 %v3778_v15, %v3794_v58  ;;  %v6714_v25 = vld [vmem:[%s8984_s7 + $0x28] sm:$0xff]  }
0x1bee   :  { %v3797_v32 = vpop.xlane.xlu0 %3796 }
0x1bef   :  { %v3803_v56 = vsub.f32 %v3779_v5, %v3797_v32  ;;  %v3812_v5 = vmul.f32 1.442695, %v3802_v47 }
0x1bf0   :  { %v3853_v61 = vpop.permute.xlu1 %3852 }
0x1bf1   :  { %v3814_v55 = vmul.f32 1.442695, %v3803_v56  ;;  %6410 = vmatprep.subr.bf16.mxu0 %v3853_v61 }
0x1bf2   :  { %6411 = vmatpush3.bf16.msra.mxu0 %v3853_v61 }
0x1bf3   :  { %6936 = vpow2.f32 %v3814_v55 }
0x1bf4   :  { %6938 = vpow2.f32 %v3810_v7 }
0x1bf5   :  { %6940 = vpow2.f32 %v3812_v5 }
0x1bf9   :  { %3916 = vrot.lane.b32.xlu1 %v8335_v63, %s7222_s3 }
0x1bfd   :  { %v8540_v59 = vpop.eup %6936 }
0x1bfe   :  { %v3831_v28 = vsel %vm986_vm7, %v8540_v59, 0.0  ;;  %v8544_v31 = vpop.eup %6938 }
0x1bff   :  { %3832 = vadd.xlane.f32.xlu0 %v3831_v28  ;;  %v3825_v19 = vsel %vm986_vm7, %v8544_v31, 0.0  ;;  %v6941_v38 = vpop.eup %6940 }
0x1c00   :  { %v3828_v46 = vsel %vm986_vm7, %v6941_v38, 0.0 }
0x1c03   :  { %3826 = vadd.xlane.f32.xlu0 %v3825_v19 }
0x1c19   :  { %3854 = vrot.lane.b32.xlu0 %v8412_v54, %s7222_s3 }
0x1c1d   :  { %4129 = vrot.lane.b32.xlu0 %v8373_v21, %s7223_s24  ;;  %3829 = vadd.xlane.f32.xlu1 %v3828_v46  ;;  %v6715_v46 = vld [vmem:[%s8984_s7 + $0x20] sm:$0xff]  }
0x1c21   :  { %4197 = vrot.lane.b32.xlu0 %v8393_v33, %s7223_s24 }
0x1c25   :  { %4127 = vrot.lane.b32.xlu0 %v8408_v20, %s7224_s29 }
0x1c29   :  { %4193 = vrot.lane.b32.xlu0 %v8363_v1, %s7224_s29 }
0x1c2e   :  { %3918 = vrot.lane.b32.xlu1 %v8432_v35, %s7222_s3 }
0x1c32   :  { %4131 = vrot.lane.b32.xlu1 %v8383_v16, %s7223_s24 }
0x1c36   :  { %4125 = vrot.lane.b32.xlu1 %v8347_v37, %s7224_s29 }
0x1c3a   :  { %4199 = vrot.lane.b32.xlu1 %v8395_v27, %s7223_s24 }
0x1c3e   :  { %4195 = vrot.lane.b32.xlu1 %v8428_v8, %s7224_s29 }
0x1c6f   :  { %v3821_v15 = vpop.xlane.xlu0 %3820 }
0x1c70   :  { %6942 = vrcp.f32 %v3821_v15 }
0x1c71   :  { %v3824_v50 = vpop.xlane.xlu1 %3823 }
0x1c75   :  { %v3818_v51 = vpop.xlane.xlu1 %3817 }
0x1c76   :  { %6944 = vrcp.f32 %v3818_v51 }
0x1c77   :  { %6946 = vrcp.f32 %v3824_v50 }
0x1c79   :  { %v3917_v3 = vpop.permute.xlu1 %3916 }
0x1c7a   :  { %6418 = vmatprep.subr.bf16.mxu1 %v3917_v3  ;;  %v6943_v13 = vpop.eup %6942 }
0x1c7b   :  { %6419 = vmatpush3.bf16.msra.mxu1 %v3917_v3  ;;  %v3841_v42 = vmul.f32 %v6943_v13, %v6931_v43 }
0x1c80   :  { %v6945_v10 = vpop.eup %6944 }
0x1c81   :  { %v3840_v2 = vmul.f32 %v6945_v10, %v6935_v23  ;;  %v6947_v57 = vpop.eup %6946 }
0x1c82   :  { %v3842_v40 = vmul.f32 %v6947_v57, %v6933_v52 }
0x1c83   :  { %v3846_v62 = vpack.c.bf16 %v3841_v42, %v3840_v2 }
0x1c84   :  { %v3847_v23 = vpack.c.bf16 %v3842_v40, %v3842_v40 }
0x1c85   :  { %6414 = vmatprep.mubr.msk.bf16.mxu0 %vm986_vm7, %v3846_v62 }
0x1c8c   :  { %v3833_v45 = vpop.xlane.xlu0 %3832 }
0x1c8d   :  { %6948 = vrcp.f32 %v3833_v45 }
0x1c90   :  { %v3827_v29 = vpop.xlane.xlu0 %3826 }
0x1c91   :  { %6950 = vrcp.f32 %v3827_v29 }
0x1c94   :  { %v3855_v4 = vpop.permute.xlu0 %3854 }
0x1c95   :  { %v3864_v58 = vsel %vm1063_vm5, %v3855_v4, 0  ;;  %6608 = vmatprep.subr.msk.bf16.mxu0 %vm1063_vm5, %v3855_v4 }
0x1c96   :  { %6413 = vmatpush3.bf16.msra.mxu0 %v3864_v58 }
0x1c97   :  { %6426 = vmatprep.subr.bf16.mxu0 %v7219_v9  ;;  %v6949_v61 = vpop.eup %6948 }
0x1c98   :  { %v4130_v43 = vpop.permute.xlu0 %4129  ;;  %v3845_v28 = vmul.f32 %v6949_v61, %v8540_v59 }
0x1c99   :  { %6415 = vmatmul.mubr.msk.bf16.vlgmr.msra.gmra.mrb[120].mxu0 %vm986_vm7, %v3847_v23  ;;  %v4140_v2 = vsel %vm844_vm4, %v4130_v43, 0 }
0x1c9a   :  { %6427 = vmatpush3.bf16.msra.mxu0 %v6714_v25  ;;  %6428 = vmatprep.mubr.msk.bf16.mxu0 %vm7220_vm1, %v7219_v9  ;;  %v3849_v50 = vpack.c.bf16 %v3845_v28, %v3845_v28 }
0x1c9b   :  { %6610 = vmatprep.subr.msk.bf16.mxu0 %vm844_vm4, %v4130_v43  ;;  %v6951_v7 = vpop.eup %6950 }
0x1c9c   :  { %v3843_v19 = vmul.f32 %v6951_v7, %v8544_v31  ;;  %v4198_v51 = vpop.permute.xlu0 %4197 }
0x1c9d   :  { %v4208_v31 = vsel %vm844_vm4, %v4198_v51, 0 }
0x1ca0   :  { %v4128_v34 = vpop.permute.xlu0 %4127 }
0x1ca4   :  { %v4194_v26 = vpop.permute.xlu0 %4193 }
0x1caa   :  { %v3830_v52 = vpop.xlane.xlu1 %3829 }
0x1cab   :  { %6952 = vrcp.f32 %v3830_v52 }
0x1cae   :  { %v3919_v32 = vpop.permute.xlu1 %3918 }
0x1caf   :  { %v3928_v56 = vsel %vm1063_vm5, %v3919_v32, 0  ;;  %6609 = vmatprep.subr.msk.bf16.mxu1 %vm1063_vm5, %v3919_v32 }
0x1cb0   :  { %6421 = vmatpush3.bf16.msra.mxu1 %v3928_v56 }
0x1cb1   :  { %6440 = vmatprep.subr.bf16.mxu1 %v7219_v9 }
0x1cb2   :  { %v4132_v15 = vpop.permute.xlu1 %4131 }
0x1cb3   :  { %v4143_v6 = vsel %vm844_vm4, %v4132_v15, 0 }
0x1cb5   :  { %v6953_v55 = vpop.eup %6952 }
0x1cb6   :  { %v3844_v47 = vmul.f32 %v6953_v55, %v6941_v38  ;;  %v4126_v59 = vpop.permute.xlu1 %4125 }
0x1cb8   :  { %v3848_v5 = vpack.c.bf16 %v3844_v47, %v3843_v19 }
0x1cba   :  { %6422 = vmatprep.mubr.msk.bf16.mxu1 %vm986_vm7, %v3848_v5  ;;  %v4200_v38 = vpop.permute.xlu1 %4199 }
0x1cbb   :  { %6423 = vmatmul.mubr.msk.bf16.vlgmr.msra.gmra.mrb[124].mxu1 %vm986_vm7, %v3849_v50  ;;  %v4211_v3 = vsel %vm844_vm4, %v4200_v38, 0 }
0x1cbc   :  { %6441 = vmatpush3.bf16.msra.mxu1 %v6715_v46  ;;  %6442 = vmatprep.mubr.msk.bf16.mxu1 %vm7220_vm1, %v7219_v9 }
0x1cbd   :  { %6612 = vmatprep.subr.msk.bf16.mxu1 %vm844_vm4, %v4198_v51 }
0x1cc3   :  { %6443 = vmatmul.mubr.msk.bf16.vlgmr.msra.gmra.mrb[128].mxu1 %vm844_vm4, %v3625_v22  ;;  %v4196_v22 = vpop.permute.xlu1 %4195 }
0x1cc4   :  { %6446 = vmatprep.mubr.msk.bf16.mxu1 %vm7220_vm1, %v7219_v9 }
0x1cc5   :  { %6463 = vmatpush3.bf16.xpose.msra.mxu1 %v4208_v31 }
0x1cc6   :  { %6613 = vmatprep.subr.msk.bf16.mxu1 %vm844_vm4, %v4200_v38 }
0x1ccb   :  { %6447 = vmatmul.mubr.msk.bf16.gmra.mrb[132].mxu1 %vm844_vm4, %v3626_v53 }
0x1ccc   :  { %6450 = vmatprep.mubr.msk.bf16.mxu1 %vm7220_vm1, %v7219_v9 }
0x1ccd   :  { %6465 = vmatpush3.bf16.xpose.msra.mxu1 %v4211_v3 }
0x1cd3   :  { %6451 = vmatmul.mubr.msk.bf16.gmra.mrb[136].mxu1 %vm844_vm4, %v3627_v39 }
0x1cd4   :  { %6466 = vmatprep.mubr.msk.bf16.mxu1 %vm844_vm4, %v4194_v26 }
0x1cdb   :  { %6467 = vmatmul.mubr.msk.bf16.vlgmr.msra.gmra.mrb[140].mxu1 %vm844_vm4, %v4196_v22 }
0x1d6c   :  { %v6416_v44 = vpop.f32.mrb[120].mxu0 }
0x1d6d   :  { %v3900_v60 = vpop.f32.mrb[121].mxu0 }
0x1d6e   :  { %v6417_v53 = vpop.f32.mrb[122].mxu0 }
0x1d6f   :  { %v3903_v13 = vpop.f32.mrb[123].mxu0 }
0x1d70   :  { %v3978_v10 = vpack.c.bf16 %v3903_v13, %v3900_v60 }
0x1d72   :  { %6429 = vmatmul.mubr.msk.bf16.vlgmr.msra.gmra.mrb[124].mxu0 %vm844_vm4, %v3978_v10 }
0x1d73   :  { %6455 = vmatpush3.bf16.xpose.msra.mxu0 %v4140_v2  ;;  %6432 = vmatprep.mubr.msk.bf16.mxu0 %vm7220_vm1, %v7219_v9 }
0x1d74   :  { %6611 = vmatprep.subr.msk.bf16.mxu0 %vm844_vm4, %v4132_v15 }
0x1d7b   :  { %6457 = vmatpush3.bf16.xpose.msra.mxu0 %v4143_v6 }
0x1d8e   :  { %v6424_v12 = vpop.f32.mrb[124].mxu1 }
0x1d8f   :  { %v3964_v39 = vpop.f32.mrb[125].mxu1 }
0x1d90   :  { %v3979_v42 = vpack.c.bf16 %v3964_v39, %v6416_v44  ;;  %v6425_v62 = vpop.f32.mrb[126].mxu1 }
0x1d91   :  { %v3967_v45 = vpop.f32.mrb[127].mxu1 }
0x1d92   :  { %v3980_v57 = vpack.c.bf16 %v6424_v12, %v3967_v45  ;;  %6433 = vmatmul.mubr.msk.bf16.gmra.mrb[128].mxu0 %vm844_vm4, %v3979_v42 }
0x1d93   :  { %6436 = vmatprep.mubr.msk.bf16.mxu0 %vm7220_vm1, %v7219_v9 }
0x1d96   :  { %v4102_v29 = vpop.f32.mrb[128].mxu1 }
0x1d97   :  { %v6444_v40 = vpop.f32.mrb[129].mxu1 }
0x1d98   :  { %v4105_v4 = vpop.f32.mrb[130].mxu1 }
0x1d99   :  { %v6445_v58 = vpop.f32.mrb[131].mxu1 }
0x1d9a   :  { %6437 = vmatmul.mubr.msk.bf16.gmra.mrb[132].mxu0 %vm844_vm4, %v3980_v57 }
0x1d9b   :  { %6458 = vmatprep.mubr.msk.bf16.mxu0 %vm844_vm4, %v4126_v59 }
0x1d9e   :  { %v4110_v25 = vpop.f32.mrb[132].mxu1 }
0x1d9f   :  { %v6448_v23 = vpop.f32.mrb[133].mxu1 }
0x1da0   :  { %v4113_v43 = vpop.f32.mrb[134].mxu1 }
0x1da1   :  { %v6449_v52 = vpop.f32.mrb[135].mxu1 }
0x1da2   :  { %6459 = vmatmul.mubr.msk.bf16.vlgmr.msra.gmra.mrb[136].mxu0 %vm844_vm4, %v4128_v34 }
0x1da6   :  { %v4118_v32 = vpop.f32.mrb[136].mxu1 }
0x1da7   :  { %v6452_v56 = vpop.f32.mrb[137].mxu1 }
0x1da8   :  { %v4121_v61 = vpop.f32.mrb[138].mxu1 }
0x1da9   :  { %v6453_v7 = vpop.f32.mrb[139].mxu1 }
0x1dae   :  { %v6468_v55 = vpop.f32.mrb[140].mxu1 }
0x1daf   :  { %v4247_v28 = vpop.f32.mrb[141].mxu1  ;;  %v4266_v56 = vmul.f32 0.25, %v6468_v55 }
0x1db0   :  { %v6469_v19 = vpop.f32.mrb[142].mxu1  ;;  %v4264_v58 = vmul.f32 0.25, %v4247_v28 }
0x1db1   :  { %v4250_v47 = vpop.f32.mrb[143].mxu1  ;;  %v4272_v19 = vsel %vm7699_vm9, %v4266_v56, -1e+30 }
0x1db2   :  { %v4265_v57 = vmul.f32 0.25, %v4250_v47  ;;  %v4288_v47 = vsel %vm986_vm7, %v4272_v19, -inf }
0x1db4   :  { %v4271_v52 = vsel %vm7692_vm8, %v4265_v57, -1e+30 }
0x1db5   :  { %v4285_v7 = vsel %vm986_vm7, %v4271_v52, -inf }
0x1e45   :  { %v4030_v5 = vpop.f32.mrb[124].mxu0 }
0x1e46   :  { %v8626_v46 = vadd.f32 %v4102_v29, %v4030_v5  ;;  %v6430_v15 = vpop.f32.mrb[125].mxu0 }
0x1e47   :  { %v4033_v50 = vpop.f32.mrb[126].mxu0 }
0x1e48   :  { %v8628_v51 = vadd.f32 %v4105_v4, %v4033_v50  ;;  %v6431_v59 = vpop.f32.mrb[127].mxu0 }
0x1e65   :  { %v4038_v31 = vpop.f32.mrb[128].mxu0 }
0x1e66   :  { %v8630_v38 = vadd.f32 %v4110_v25, %v4038_v31  ;;  %v6434_v3 = vpop.f32.mrb[129].mxu0 }
0x1e67   :  { %v4041_v34 = vpop.f32.mrb[130].mxu0 }
0x1e68   :  { %v8632_v26 = vadd.f32 %v4113_v43, %v4041_v34  ;;  %v6435_v22 = vpop.f32.mrb[131].mxu0 }
0x1e6d   :  { %v4046_v44 = vpop.f32.mrb[132].mxu0 }
0x1e6e   :  { %v8634_v60 = vadd.f32 %v4118_v32, %v4046_v44  ;;  %v6438_v53 = vpop.f32.mrb[133].mxu0 }
0x1e6f   :  { %v4049_v13 = vpop.f32.mrb[134].mxu0 }
0x1e70   :  { %v8636_v10 = vadd.f32 %v4121_v61, %v4049_v13  ;;  %v6439_v2 = vpop.f32.mrb[135].mxu0  ;;  %v4270_v61 = vsel %vm7687_vm6, %v4264_v58, -1e+30 }
0x1e71   :  { %v4282_v28 = vsel %vm986_vm7, %v4270_v61, -inf }
0x1e75   :  { %v6460_v6 = vpop.f32.mrb[136].mxu0 }
0x1e76   :  { %v4179_v12 = vpop.f32.mrb[137].mxu0  ;;  %v4263_v39 = vmul.f32 0.25, %v6460_v6 }
0x1e77   :  { %v4261_v42 = vmul.f32 0.25, %v4179_v12  ;;  %v6461_v62 = vpop.f32.mrb[138].mxu0 }
0x1e78   :  { %v4182_v45 = vpop.f32.mrb[139].mxu0  ;;  %v4269_v25 = vsel %vm7699_vm9, %v4263_v39, -1e+30 }
0x1e79   :  { %v4267_v29 = vsel %vm7687_vm6, %v4261_v42, -1e+30  ;;  %v4262_v40 = vmul.f32 0.25, %v4182_v45  ;;  %v4279_v32 = vsel %vm986_vm7, %v4269_v25, -inf }
0x1e7a   :  { %v4273_v4 = vsel %vm986_vm7, %v4267_v29, -inf }
0x1e7b   :  { %v4268_v23 = vsel %vm7692_vm8, %v4262_v40, -1e+30  ;;  %4274 = vmax.xlane.f32.xlu0 %v4273_v4 }
0x1e7c   :  { %v4276_v43 = vsel %vm986_vm7, %v4268_v23, -inf }
0x1e7d   :  { %4277 = vmax.xlane.f32.xlu1 %v4276_v43 }
0x1e7f   :  { %4280 = vmax.xlane.f32.xlu0 %v4279_v32 }
0x1e81   :  { %4286 = vmax.xlane.f32.xlu1 %v4285_v7 }
0x1e83   :  { %4283 = vmax.xlane.f32.xlu0 %v4282_v28 }
0x1e87   :  { %4289 = vmax.xlane.f32.xlu0 %v4288_v47 }
0x1f08   :  { %v4275_v5 = vpop.xlane.xlu0 %4274 }
0x1f0a   :  { %v4278_v15 = vpop.xlane.xlu1 %4277 }
0x1f0b   :  { %v4292_v22 = vsub.f32 %v4268_v23, %v4278_v15  ;;  %v4291_v23 = vsub.f32 %v4267_v29, %v4275_v5 }
0x1f0c   :  { %v4281_v50 = vpop.xlane.xlu0 %4280 }
0x1f0d   :  { %v4299_v2 = vmul.f32 1.442695, %v4292_v22  ;;  %v4293_v58 = vsub.f32 %v4269_v25, %v4281_v50 }
0x1f0e   :  { %v4287_v55 = vpop.xlane.xlu1 %4286 }
0x1f0f   :  { %v4295_v59 = vsub.f32 %v4271_v52, %v4287_v55  ;;  %v4301_v43 = vmul.f32 1.442695, %v4293_v58  ;;  %v4297_v52 = vmul.f32 1.442695, %v4291_v23 }
0x1f10   :  { %v4284_v31 = vpop.xlane.xlu0 %4283 }
0x1f11   :  { %v4305_v3 = vmul.f32 1.442695, %v4295_v59  ;;  %v4294_v34 = vsub.f32 %v4270_v61, %v4284_v31 }
0x1f13   :  { %6954 = vpow2.f32 %v4305_v3  ;;  %v4303_v44 = vmul.f32 1.442695, %v4294_v34 }
0x1f14   :  { %v4290_v53 = vpop.xlane.xlu0 %4289 }
0x1f15   :  { %6956 = vpow2.f32 %v4303_v44  ;;  %v4296_v13 = vsub.f32 %v4272_v19, %v4290_v53 }
0x1f17   :  { %v4307_v6 = vmul.f32 1.442695, %v4296_v13 }
0x1f19   :  { %6958 = vpow2.f32 %v4307_v6 }
0x1f1a   :  { %6960 = vpow2.f32 %v4299_v2 }
0x1f1b   :  { %6962 = vpow2.f32 %v4301_v43 }
0x1f1c   :  { %6964 = vpow2.f32 %v4297_v52 }
0x1f1d   :  { %v6955_v12 = vpop.eup %6954 }
0x1f1e   :  { %v4321_v39 = vsel %vm986_vm7, %v6955_v12, 0.0 }
0x1f1f   :  { %v6957_v42 = vpop.eup %6956  ;;  %4322 = vadd.xlane.f32.xlu1 %v4321_v39 }
0x1f20   :  { %v4318_v62 = vsel %vm986_vm7, %v6957_v42, 0.0 }
0x1f21   :  { %4319 = vadd.xlane.f32.xlu0 %v4318_v62 }
0x1f23   :  { %v6959_v45 = vpop.eup %6958 }
0x1f24   :  { %v4324_v57 = vsel %vm986_vm7, %v6959_v45, 0.0  ;;  %v8659_v40 = vpop.eup %6960 }
0x1f25   :  { %4325 = vadd.xlane.f32.xlu0 %v4324_v57  ;;  %v4312_v4 = vsel %vm986_vm7, %v8659_v40, 0.0  ;;  %v6963_v25 = vpop.eup %6962 }
0x1f26   :  { %v4315_v32 = vsel %vm986_vm7, %v6963_v25, 0.0  ;;  %v6965_v29 = vpop.eup %6964 }
0x1f27   :  { %v4309_v56 = vsel %vm986_vm7, %v6965_v29, 0.0 }
0x1f29   :  { %4313 = vadd.xlane.f32.xlu0 %v4312_v4 }
0x1f30   :  { %4343 = vrot.lane.b32.xlu1 %v8312_v24, %s7224_s29 }
0x1f3f   :  { %4345 = vrot.lane.b32.xlu0 %v8412_v54, %s7224_s29 }
0x1f43   :  { %4552 = vrot.lane.b32.xlu0 %v8373_v21, %s7210_s2 }
0x1f47   :  { %4620 = vrot.lane.b32.xlu0 %v8393_v33, %s7210_s2 }
0x1f4b   :  { %4550 = vrot.lane.b32.xlu0 %v8408_v20, %s7225_s12 }
0x1f4f   :  { %4616 = vrot.lane.b32.xlu0 %v8363_v1, %s7225_s12 }
0x1f54   :  { %4316 = vadd.xlane.f32.xlu1 %v4315_v32 }
0x1f58   :  { %4310 = vadd.xlane.f32.xlu1 %v4309_v56 }
0x1f69   :  { %4405 = vrot.lane.b32.xlu1 %v8335_v63, %s7224_s29 }
0x1f6d   :  { %4407 = vrot.lane.b32.xlu1 %v8432_v35, %s7224_s29 }
0x1f71   :  { %4554 = vrot.lane.b32.xlu1 %v8383_v16, %s7210_s2 }
0x1f75   :  { %4548 = vrot.lane.b32.xlu1 %v8347_v37, %s7225_s12 }
0x1f79   :  { %4622 = vrot.lane.b32.xlu1 %v8395_v27, %s7210_s2 }
0x1f7d   :  { %4618 = vrot.lane.b32.xlu1 %v8428_v8, %s7225_s12 }
0x1fac   :  { %v4323_v1 = vpop.xlane.xlu1 %4322 }
0x1fad   :  { %6966 = vrcp.f32 %v4323_v1 }
0x1fae   :  { %v4320_v21 = vpop.xlane.xlu0 %4319 }
0x1faf   :  { %6968 = vrcp.f32 %v4320_v21 }
0x1fb0   :  { %v4344_v33 = vpop.permute.xlu1 %4343 }
0x1fb1   :  { %6470 = vmatprep.subr.bf16.mxu0 %v4344_v33 }
0x1fb2   :  { %v4326_v20 = vpop.xlane.xlu0 %4325  ;;  %6471 = vmatpush3.bf16.msra.mxu0 %v4344_v33 }
0x1fb3   :  { %6970 = vrcp.f32 %v4326_v20 }
0x1fb6   :  { %v4314_v61 = vpop.xlane.xlu0 %4313 }
0x1fb7   :  { %v6967_v7 = vpop.eup %6966 }
0x1fb8   :  { %v4337_v37 = vmul.f32 %v6967_v7, %v6955_v12 }
0x1fb9   :  { %v6969_v16 = vpop.eup %6968 }
0x1fba   :  { %v4346_v28 = vpop.permute.xlu0 %4345  ;;  %v4336_v19 = vmul.f32 %v6969_v16, %v6957_v42  ;;  %v6716_v42 = vld [vmem:[%s8984_s7 + $0x30] sm:$0xff]  }
0x1fbb   :  { %v4355_v47 = vsel %vm1063_vm5, %v4346_v28, 0  ;;  %6614 = vmatprep.subr.msk.bf16.mxu0 %vm1063_vm5, %v4346_v28 }
0x1fbc   :  { %6473 = vmatpush3.bf16.msra.mxu0 %v4355_v47  ;;  %v4341_v27 = vpack.c.bf16 %v4337_v37, %v4336_v19 }
0x1fbd   :  { %6486 = vmatprep.subr.bf16.mxu0 %v7219_v9  ;;  %v6971_v15 = vpop.eup %6970 }
0x1fbe   :  { %6482 = vmatprep.mubr.msk.bf16.mxu1 %vm986_vm7, %v4341_v27  ;;  %v4338_v55 = vmul.f32 %v6971_v15, %v6959_v45  ;;  %v4553_v22 = vpop.permute.xlu0 %4552 }
0x1fbf   :  { %v4563_v57 = vsel %vm844_vm4, %v4553_v22, 0 }
0x1fc0   :  { %v4342_v13 = vpack.c.bf16 %v4338_v55, %v4338_v55 }
0x1fc2   :  { %v4621_v4 = vpop.permute.xlu0 %4620 }
0x1fc6   :  { %v4551_v58 = vpop.permute.xlu0 %4550 }
0x1fe1   :  { %v4317_v8 = vpop.xlane.xlu1 %4316 }
0x1fe2   :  { %6972 = vrcp.f32 %v4317_v8 }
0x1fe3   :  { %6974 = vrcp.f32 %v4314_v61  ;;  %v4631_v61 = vsel %vm844_vm4, %v4621_v4, 0 }
0x1fe5   :  { %v4311_v5 = vpop.xlane.xlu1 %4310 }
0x1fe6   :  { %6976 = vrcp.f32 %v4311_v5 }
0x1fe9   :  { %v4406_v50 = vpop.permute.xlu1 %4405 }
0x1fea   :  { %6478 = vmatprep.subr.bf16.mxu1 %v4406_v50 }
0x1feb   :  { %6479 = vmatpush3.bf16.msra.mxu1 %v4406_v50  ;;  %v4617_v50 = vpop.permute.xlu0 %4616 }
0x1fec   :  { %v6973_v59 = vpop.eup %6972 }
0x1fed   :  { %v4408_v31 = vpop.permute.xlu1 %4407  ;;  %v6975_v3 = vpop.eup %6974  ;;  %v4335_v53 = vmul.f32 %v6973_v59, %v6963_v25 }
0x1fee   :  { %v4417_v34 = vsel %vm1063_vm5, %v4408_v31, 0  ;;  %6615 = vmatprep.subr.msk.bf16.mxu1 %vm1063_vm5, %v4408_v31  ;;  %v4334_v12 = vmul.f32 %v6975_v3, %v8659_v40 }
0x1fef   :  { %6481 = vmatpush3.bf16.msra.mxu1 %v4417_v34  ;;  %v4340_v62 = vpack.c.bf16 %v4335_v53, %v4335_v53 }
0x1ff0   :  { %v6977_v44 = vpop.eup %6976  ;;  %6616 = vmatprep.subr.msk.bf16.mxu1 %vm844_vm4, %v4553_v22 }
0x1ff1   :  { %v4555_v2 = vpop.permute.xlu1 %4554  ;;  %v4333_v6 = vmul.f32 %v6977_v44, %v6965_v29 }
0x1ff2   :  { %6483 = vmatmul.mubr.msk.bf16.vlgmr.msra.gmra.mrb[144].mxu1 %vm986_vm7, %v4342_v13  ;;  %v4566_v40 = vsel %vm844_vm4, %v4555_v2, 0 }
0x1ff3   :  { %v4339_v39 = vpack.c.bf16 %v4334_v12, %v4333_v6 }
0x1ff5   :  { %6474 = vmatprep.mubr.msk.bf16.mxu0 %vm986_vm7, %v4339_v39  ;;  %v4549_v45 = vpop.permute.xlu1 %4548 }
0x1ff6   :  { %6475 = vmatmul.mubr.msk.bf16.vlgmr.msra.gmra.mrb[140].mxu0 %vm986_vm7, %v4340_v62  ;;  %6504 = vmatprep.mubr.msk.bf16.mxu1 %vm844_vm4, %v4549_v45 }
0x1ff7   :  { %6487 = vmatpush3.bf16.msra.mxu0 %v6716_v42  ;;  %6488 = vmatprep.mubr.msk.bf16.mxu0 %vm7220_vm1, %v7219_v9 }
0x1ff8   :  { %6618 = vmatprep.subr.msk.bf16.mxu0 %vm844_vm4, %v4621_v4  ;;  %6501 = vmatpush3.bf16.xpose.msra.mxu1 %v4563_v57 }
0x1ff9   :  { %6617 = vmatprep.subr.msk.bf16.mxu1 %vm844_vm4, %v4555_v2  ;;  %v4623_v7 = vpop.permute.xlu1 %4622 }
0x1ffa   :  { %v4634_v16 = vsel %vm844_vm4, %v4623_v7, 0 }
0x1ffd   :  { %v4619_v22 = vpop.permute.xlu1 %4618 }
0x2000   :  { %6503 = vmatpush3.bf16.xpose.msra.mxu1 %v4566_v40 }
0x2007   :  { %6505 = vmatmul.mubr.msk.bf16.vlgmr.msra.gmra.mrb[148].mxu1 %vm844_vm4, %v4551_v58 }
0x20c5   :  { %v6484_v23 = vpop.f32.mrb[144].mxu1 }
0x20c6   :  { %v4453_v43 = vpop.f32.mrb[145].mxu1 }
0x20c7   :  { %v6485_v52 = vpop.f32.mrb[146].mxu1 }
0x20c8   :  { %v4456_v25 = vpop.f32.mrb[147].mxu1 }
0x20c9   :  { %v4469_v32 = vpack.c.bf16 %v6484_v23, %v4456_v25  ;;  %v6476_v29 = vpop.f32.mrb[140].mxu0 }
0x20ca   :  { %v4468_v56 = vpack.c.bf16 %v4453_v43, %v6476_v29  ;;  %v4391_v1 = vpop.f32.mrb[141].mxu0 }
0x20cb   :  { %v6477_v21 = vpop.f32.mrb[142].mxu0 }
0x20cc   :  { %v4394_v33 = vpop.f32.mrb[143].mxu0 }
0x20cd   :  { %v4467_v20 = vpack.c.bf16 %v4394_v33, %v4391_v1 }
0x20cf   :  { %6489 = vmatmul.mubr.msk.bf16.vlgmr.msra.gmra.mrb[144].mxu0 %vm844_vm4, %v4467_v20 }
0x20d0   :  { %6509 = vmatpush3.bf16.xpose.msra.mxu0 %v4631_v61  ;;  %6492 = vmatprep.mubr.msk.bf16.mxu0 %vm7220_vm1, %v7219_v9 }
0x20d1   :  { %6619 = vmatprep.subr.msk.bf16.mxu0 %vm844_vm4, %v4623_v7 }
0x20d7   :  { %6493 = vmatmul.mubr.msk.bf16.gmra.mrb[148].mxu0 %vm844_vm4, %v4468_v56 }
0x20d8   :  { %6511 = vmatpush3.bf16.xpose.msra.mxu0 %v4634_v16  ;;  %6496 = vmatprep.mubr.msk.bf16.mxu0 %vm7220_vm1, %v7219_v9 }
0x20d9   :  { %6532 = vmatprep.subr.bf16.mxu0 %v7219_v9 }
0x20da   :  { %v6506_v28 = vpop.f32.mrb[148].mxu1 }
0x20db   :  { %v4602_v19 = vpop.f32.mrb[149].mxu1  ;;  %v4686_v37 = vmul.f32 0.25, %v6506_v28 }
0x20dc   :  { %v4684_v47 = vmul.f32 0.25, %v4602_v19  ;;  %v6507_v27 = vpop.f32.mrb[150].mxu1 }
0x20dd   :  { %v4605_v8 = vpop.f32.mrb[151].mxu1  ;;  %v4692_v59 = vsel %vm7699_vm9, %v4686_v37, -1e+30 }
0x20de   :  { %v4690_v5 = vsel %vm7687_vm6, %v4684_v47, -1e+30  ;;  %v4685_v15 = vmul.f32 0.25, %v4605_v8  ;;  %v4702_v34 = vsel %vm986_vm7, %v4692_v59, -inf }
0x20df   :  { %6497 = vmatmul.mubr.msk.bf16.gmra.mrb[152].mxu0 %vm844_vm4, %v4469_v32  ;;  %v4696_v55 = vsel %vm986_vm7, %v4690_v5, -inf }
0x20e0   :  { %v4691_v31 = vsel %vm7692_vm8, %v4685_v15, -1e+30  ;;  %6512 = vmatprep.mubr.msk.bf16.mxu0 %vm844_vm4, %v4617_v50  ;;  %4697 = vmax.xlane.f32.xlu0 %v4696_v55 }
0x20e1   :  { %v4699_v3 = vsel %vm986_vm7, %v4691_v31, -inf }
0x20e2   :  { %4700 = vmax.xlane.f32.xlu1 %v4699_v3 }
0x20e4   :  { %4703 = vmax.xlane.f32.xlu0 %v4702_v34 }
0x20e7   :  { %6513 = vmatmul.mubr.msk.bf16.vlgmr.msra.gmra.mrb[156].mxu0 %vm844_vm4, %v4619_v22 }
0x20e8   :  { %6534 = vmatprep.mubr.msk.bf16.mxu0 %vm7220_vm1, %v7219_v9 }
0x216d   :  { %v4698_v42 = vpop.xlane.xlu0 %4697 }
0x216f   :  { %v4701_v58 = vpop.xlane.xlu1 %4700 }
0x2170   :  { %v4715_v43 = vsub.f32 %v4691_v31, %v4701_v58 }
0x2171   :  { %v4704_v23 = vpop.xlane.xlu0 %4703 }
0x2172   :  { %v4716_v29 = vsub.f32 %v4692_v59, %v4704_v23  ;;  %v4722_v21 = vmul.f32 1.442695, %v4715_v43 }
0x21a2   :  { %v4519_v44 = vpop.f32.mrb[144].mxu0 }
0x21a3   :  { %v8736_v53 = vadd.f32 %v4519_v44, %v8626_v46  ;;  %v6490_v13 = vpop.f32.mrb[145].mxu0  ;;  %v4714_v46 = vsub.f32 %v4690_v5, %v4698_v42 }
0x21a4   :  { %v4522_v2 = vpop.f32.mrb[146].mxu0 }
0x21a5   :  { %v8739_v6 = vadd.f32 %v4522_v2, %v8628_v51  ;;  %v6491_v12 = vpop.f32.mrb[147].mxu0  ;;  %v4720_v32 = vmul.f32 1.442695, %v4714_v46 }
0x21a7   :  { %6978 = vpow2.f32 %v4720_v32 }
0x21a8   :  { %6980 = vpow2.f32 %v4722_v21 }
0x21aa   :  { %v4527_v39 = vpop.f32.mrb[148].mxu0 }
0x21ab   :  { %v8742_v62 = vadd.f32 %v4527_v39, %v8630_v38  ;;  %v6494_v45 = vpop.f32.mrb[149].mxu0 }
0x21ac   :  { %v4530_v57 = vpop.f32.mrb[150].mxu0 }
0x21ad   :  { %v8745_v4 = vadd.f32 %v4530_v57, %v8632_v26  ;;  %v6495_v40 = vpop.f32.mrb[151].mxu0  ;;  %v4724_v26 = vmul.f32 1.442695, %v4716_v29 }
0x21af   :  { %6982 = vpow2.f32 %v4724_v26 }
0x21b1   :  { %v6979_v8 = vpop.eup %6978 }
0x21b2   :  { %v4535_v52 = vpop.f32.mrb[152].mxu0  ;;  %v6981_v15 = vpop.eup %6980  ;;  %v4732_v41 = vsel %vm986_vm7, %v6979_v8, 0.0 }
0x21b3   :  { %v8748_v51 = vadd.f32 %v4535_v52, %v8634_v60  ;;  %v6498_v25 = vpop.f32.mrb[153].mxu0  ;;  %v4735_v55 = vsel %vm986_vm7, %v6981_v15, 0.0 }
0x21b4   :  { %v4538_v56 = vpop.f32.mrb[154].mxu0 }
0x21b5   :  { %v8751_v38 = vadd.f32 %v4538_v56, %v8636_v10  ;;  %v6499_v1 = vpop.f32.mrb[155].mxu0 }
0x21b9   :  { %v6983_v50 = vpop.eup %6982 }
0x21ba   :  { %v6514_v33 = vpop.f32.mrb[156].mxu0  ;;  %v4738_v49 = vsel %vm986_vm7, %v6983_v50, 0.0 }
0x21bb   :  { %v4670_v20 = vpop.f32.mrb[157].mxu0  ;;  %v4689_v61 = vmul.f32 0.25, %v6514_v33 }
0x21bc   :  { %v4687_v7 = vmul.f32 0.25, %v4670_v20  ;;  %v6515_v16 = vpop.f32.mrb[158].mxu0 }
0x21bd   :  { %v4673_v60 = vpop.f32.mrb[159].mxu0  ;;  %v4695_v10 = vsel %vm7699_vm9, %v4689_v61, -1e+30 }
0x21be   :  { %v4693_v28 = vsel %vm7687_vm6, %v4687_v7, -1e+30  ;;  %v4688_v19 = vmul.f32 0.25, %v4673_v60  ;;  %v4711_v5 = vsel %vm986_vm7, %v4695_v10, -inf }
0x21bf   :  { %v4705_v37 = vsel %vm986_vm7, %v4693_v28, -inf }
0x21c0   :  { %v4694_v47 = vsel %vm7692_vm8, %v4688_v19, -1e+30  ;;  %4706 = vmax.xlane.f32.xlu0 %v4705_v37 }
0x21c1   :  { %v4708_v27 = vsel %vm986_vm7, %v4694_v47, -inf }
0x21c2   :  { %4709 = vmax.xlane.f32.xlu1 %v4708_v27 }
0x21c4   :  { %4712 = vmax.xlane.f32.xlu0 %v4711_v5 }
0x21c6   :  { %4733 = vadd.xlane.f32.xlu1 %v4732_v41 }
0x21c8   :  { %4736 = vadd.xlane.f32.xlu0 %v4735_v55 }
0x21ca   :  { %4739 = vadd.xlane.f32.xlu1 %v4738_v49 }
0x21db   :  { %4766 = vrot.lane.b32.xlu1 %v8312_v24, %s7225_s12 }
0x21df   :  { %4828 = vrot.lane.b32.xlu1 %v8335_v63, %s7225_s12 }
0x224d   :  { %v4707_v18 = vpop.xlane.xlu0 %4706 }
0x224e   :  { %v4717_v31 = vsub.f32 %v4693_v28, %v4707_v18 }
0x224f   :  { %v4710_v59 = vpop.xlane.xlu1 %4709 }
0x2250   :  { %v4718_v3 = vsub.f32 %v4694_v47, %v4710_v59  ;;  %v4726_v2 = vmul.f32 1.442695, %v4717_v31 }
0x2251   :  { %v4713_v34 = vpop.xlane.xlu0 %4712 }
0x2252   :  { %v4728_v22 = vmul.f32 1.442695, %v4718_v3  ;;  %v4719_v44 = vsub.f32 %v4695_v10, %v4713_v34 }
0x2253   :  { %v4734_v13 = vpop.xlane.xlu1 %4733 }
0x2254   :  { %6984 = vpow2.f32 %v4728_v22  ;;  %v4730_v12 = vmul.f32 1.442695, %v4719_v44 }
0x2255   :  { %6986 = vrcp.f32 %v4734_v13  ;;  %v4737_v39 = vpop.xlane.xlu0 %4736 }
0x2256   :  { %6988 = vpow2.f32 %v4730_v12 }
0x2257   :  { %6990 = vrcp.f32 %v4737_v39  ;;  %v4740_v42 = vpop.xlane.xlu1 %4739 }
0x2258   :  { %6992 = vpow2.f32 %v4726_v2 }
0x2259   :  { %6994 = vrcp.f32 %v4740_v42 }
0x225b   :  { %v4767_v24 = vpop.permute.xlu1 %4766 }
0x225c   :  { %6516 = vmatprep.subr.bf16.mxu1 %v4767_v24 }
0x225d   :  { %6517 = vmatpush3.bf16.msra.mxu1 %v4767_v24 }
0x225e   :  { %v6985_v63 = vpop.eup %6984 }
0x225f   :  { %v6987_v45 = vpop.eup %6986  ;;  %v4744_v57 = vsel %vm986_vm7, %v6985_v63, 0.0  ;;  %v4829_v29 = vpop.permute.xlu1 %4828 }
0x2260   :  { %v6989_v40 = vpop.eup %6988  ;;  %4745 = vadd.xlane.f32.xlu1 %v4744_v57  ;;  %v4756_v43 = vmul.f32 %v6987_v45, %v6979_v8  ;;  %v6717_v8 = vld [vmem:[%s8984_s7 + $0x38] sm:$0xff]  }
0x2261   :  { %v6991_v58 = vpop.eup %6990  ;;  %v4747_v46 = vsel %vm986_vm7, %v6989_v40, 0.0  ;;  %6533 = vmatpush3.bf16.msra.mxu0 %v6717_v8 }
0x2262   :  { %v6993_v23 = vpop.eup %6992  ;;  %4748 = vadd.xlane.f32.xlu0 %v4747_v46  ;;  %v4757_v52 = vmul.f32 %v6991_v58, %v6981_v15  ;;  %6546 = vmatprep.subr.bf16.mxu0 %v7219_v9 }
0x2263   :  { %v4741_v32 = vsel %vm986_vm7, %v6993_v23, 0.0  ;;  %v6995_v21 = vpop.eup %6994 }
0x2264   :  { %v4762_v25 = vpack.c.bf16 %v4757_v52, %v4756_v43  ;;  %v4758_v33 = vmul.f32 %v6995_v21, %v6983_v50 }
0x2266   :  { %6520 = vmatprep.mubr.msk.bf16.mxu1 %vm986_vm7, %v4762_v25  ;;  %4742 = vadd.xlane.f32.xlu0 %v4741_v32 }
0x2271   :  { %4830 = vrot.lane.b32.xlu1 %v8432_v35, %s7225_s12  ;;  %v4763_v35 = vpack.c.bf16 %v4758_v33, %v4758_v33 }
0x227c   :  { %4768 = vrot.lane.b32.xlu0 %v8412_v54, %s7225_s12 }
0x22ed   :  { %v4746_v56 = vpop.xlane.xlu1 %4745 }
0x22ef   :  { %v4749_v1 = vpop.xlane.xlu0 %4748 }
0x22f0   :  { %6996 = vrcp.f32 %v4749_v1 }
0x22f1   :  { %6998 = vrcp.f32 %v4746_v56  ;;  %v4831_v16 = vpop.permute.xlu1 %4830 }
0x22f2   :  { %v4840_v10 = vsel %vm1063_vm5, %v4831_v16, 0 }
0x22f3   :  { %v4743_v26 = vpop.xlane.xlu0 %4742 }
0x22f4   :  { %7000 = vrcp.f32 %v4743_v26 }
0x22f7   :  { %v4769_v20 = vpop.permute.xlu0 %4768 }
0x22f8   :  { %v4778_v61 = vsel %vm1063_vm5, %v4769_v20, 0  ;;  %6620 = vmatprep.subr.msk.bf16.mxu1 %vm1063_vm5, %v4769_v20 }
0x22f9   :  { %6519 = vmatpush3.bf16.msra.mxu1 %v4778_v61  ;;  %v6723_v61 = vld [vmem:[%s8986_s9 + $0x54] ss:$8 sps:$4 sm:$0xff]  }
0x22fa   :  { %6524 = vmatprep.subr.bf16.mxu1 %v4829_v29  ;;  %v6997_v7 = vpop.eup %6996 }
0x22fb   :  { %v6999_v54 = vpop.eup %6998  ;;  %v4761_v28 = vmul.f32 %v6997_v7, %v6989_v40  ;;  %v6726_v7 = vld [vmem:[%s8986_s9 + $0x64] ss:$8 sps:$4 sm:$0xff]  }
0x22fc   :  { %6521 = vmatmul.mubr.msk.bf16.vlgmr.msra.gmra.mrb[152].mxu1 %vm986_vm7, %v4763_v35  ;;  %v4760_v37 = vmul.f32 %v6999_v54, %v6985_v63  ;;  %v6721_v35 = vld [vmem:[%s8986_s9 + $0x50] ss:$8 sps:$4 sm:$0xff]   ;;  %v6724_v54 = vld [vmem:[%s8986_s9 + $0x60] ss:$8 sps:$4 sm:$0xff]  }
0x22fd   :  { %6525 = vmatpush3.bf16.msra.mxu1 %v4829_v29  ;;  %v4765_v27 = vpack.c.bf16 %v4761_v28, %v4761_v28 }
0x22fe   :  { %v7001_v60 = vpop.eup %7000  ;;  %6621 = vmatprep.subr.msk.bf16.mxu1 %vm1063_vm5, %v4831_v16  ;;  %v6729_v16 = vld [vmem:[%s8986_s9 + $0x74] ss:$8 sps:$4 sm:$0xff]  }
0x22ff   :  { %v4759_v19 = vmul.f32 %v7001_v60, %v6993_v23  ;;  %v6727_v60 = vld [vmem:[%s8986_s9 + $0x70] ss:$8 sps:$4 sm:$0xff]  }
0x2301   :  { %6527 = vmatpush3.bf16.msra.mxu1 %v4840_v10  ;;  %v4764_v47 = vpack.c.bf16 %v4760_v37, %v4759_v19 }
0x2303   :  { %6528 = vmatprep.mubr.msk.bf16.mxu1 %vm986_vm7, %v4764_v47 }
0x2304   :  { %6529 = vmatmul.mubr.msk.bf16.vlgmr.msra.gmra.mrb[156].mxu1 %vm986_vm7, %v4765_v27 }
0x2305   :  { %5132 = vmatprep.mubr.bf16.mxu1 %v7217_v0 }
0x23cf   :  { %v6522_v5 = vpop.f32.mrb[152].mxu1 }
0x23d0   :  { %v4814_v15 = vpop.f32.mrb[153].mxu1 }
0x23d1   :  { %v6523_v41 = vpop.f32.mrb[154].mxu1 }
0x23d2   :  { %v4817_v50 = vpop.f32.mrb[155].mxu1 }
0x23d3   :  { %v4890_v55 = vpack.c.bf16 %v4817_v50, %v4814_v15 }
0x23d5   :  { %6535 = vmatmul.mubr.msk.bf16.vlgmr.msra.gmra.mrb[160].mxu0 %vm844_vm4, %v4890_v55 }
0x23d6   :  { %6538 = vmatprep.mubr.msk.bf16.mxu0 %vm7220_vm1, %v7219_v9 }
0x23d7   :  { %v6530_v49 = vpop.f32.mrb[156].mxu1 }
0x23d8   :  { %v4876_v18 = vpop.f32.mrb[157].mxu1 }
0x23d9   :  { %v4891_v59 = vpack.c.bf16 %v4876_v18, %v6522_v5  ;;  %v6531_v31 = vpop.f32.mrb[158].mxu1 }
0x23da   :  { %v4879_v3 = vpop.f32.mrb[159].mxu1 }
0x23db   :  { %v4892_v34 = vpack.c.bf16 %v6530_v49, %v4879_v3 }
0x23dd   :  { %6539 = vmatmul.mubr.msk.bf16.gmra.mrb[164].mxu0 %vm844_vm4, %v4891_v59 }
0x23de   :  { %6542 = vmatprep.mubr.msk.bf16.mxu0 %vm7220_vm1, %v7219_v9 }
0x23e5   :  { %6543 = vmatmul.mubr.msk.bf16.gmra.mrb[168].mxu0 %vm844_vm4, %v4892_v34  ;;  %v5764_v34 = vld [vmem:[%s8985_s8 + $0x1] ss:$0 sm:$0xff] }
0x23e6   :  { %6562 = vmatprep.mubr.msk.bf16.mxu0 %vm7220_vm1, %v7219_v9 }
0x24a8   :  { %v4942_v22 = vpop.f32.mrb[160].mxu0 }
0x24a9   :  { %v4965_v44 = vadd.f32 %v4942_v22, %v8736_v53  ;;  %v6536_v13 = vpop.f32.mrb[161].mxu0 }
0x24aa   :  { %v4945_v2 = vpop.f32.mrb[162].mxu0 }
0x24ab   :  { %v8800_v12 = vadd.f32 %v4965_v44, %v8226_v17  ;;  %v4966_v39 = vadd.f32 %v4945_v2, %v8739_v6  ;;  %v6537_v42 = vpop.f32.mrb[163].mxu0 }
0x24ad   :  { %v8804_v24 = vadd.f32 %v4966_v39, %v8229_v14  ;;  %v4979_v63 = vmul.f32 %v8800_v12, %v8800_v12 }
0x24af   :  { %v4985_v45 = vsel %vm387_vm0, %v4979_v63, 0.0  ;;  %v4980_v57 = vmul.f32 %v8804_v24, %v8804_v24 }
0x24b0   :  { %4986 = vadd.xlane.f32.xlu0 %v4985_v45  ;;  %v4950_v53 = vpop.f32.mrb[164].mxu0 }
0x24b1   :  { %v4967_v40 = vadd.f32 %v4950_v53, %v8742_v62  ;;  %v6540_v17 = vpop.f32.mrb[165].mxu0  ;;  %v4988_v58 = vsel %vm387_vm0, %v4980_v57, 0.0 }
0x24b2   :  { %4989 = vadd.xlane.f32.xlu1 %v4988_v58  ;;  %v4953_v6 = vpop.f32.mrb[166].mxu0 }
0x24b3   :  { %v8814_v14 = vadd.f32 %v4967_v40, %v8263_v11  ;;  %v4968_v46 = vadd.f32 %v4953_v6, %v8745_v4  ;;  %v6541_v23 = vpop.f32.mrb[167].mxu0 }
0x24b5   :  { %v8818_v43 = vadd.f32 %v4968_v46, %v8266_v36  ;;  %v4981_v52 = vmul.f32 %v8814_v14, %v8814_v14 }
0x24b7   :  { %v4991_v25 = vsel %vm387_vm0, %v4981_v52, 0.0  ;;  %v4982_v62 = vmul.f32 %v8818_v43, %v8818_v43 }
0x24b8   :  { %4992 = vadd.xlane.f32.xlu0 %v4991_v25  ;;  %v4958_v32 = vpop.f32.mrb[168].mxu0 }
0x24b9   :  { %v4969_v29 = vadd.f32 %v4958_v32, %v8748_v51  ;;  %v6544_v11 = vpop.f32.mrb[169].mxu0  ;;  %v4994_v21 = vsel %vm387_vm0, %v4982_v62, 0.0 }
0x24ba   :  { %v4961_v56 = vpop.f32.mrb[170].mxu0 }
0x24bb   :  { %v8827_v4 = vadd.f32 %v4969_v29, %v8276_v48  ;;  %v4970_v36 = vadd.f32 %v4961_v56, %v8751_v38  ;;  %v6545_v1 = vpop.f32.mrb[171].mxu0  ;;  %v6720_v38 = vld [vmem:[%s8986_s9 + $0x44] ss:$8 sps:$4 sm:$0xff]  }
0x24bc   :  { %4995 = vadd.xlane.f32.xlu0 %v4994_v21  ;;  %5100 = vmatprep.subr.bf16.mxu1 %v6720_v38  ;;  %v6730_v56 = vld [vmem:[%s8987_s10 + $0x40] sm:$0xff]   ;;  %v6732_v1 = vld [vmem:[%s8987_s10 + $0x50] sm:$0xff]   ;;  %v6733_v21 = vld [vmem:[%s8987_s10 + $0x58] sm:$0xff]  }
0x24bd   :  { %v8832_v26 = vadd.f32 %v4970_v36, %v8280_v30  ;;  %v4983_v33 = vmul.f32 %v8827_v4, %v8827_v4  ;;  %v6718_v30 = vld [vmem:[%s8986_s9 + $0x40] ss:$8 sps:$4 sm:$0xff]   ;;  %6547 = vmatpush3.bf16.msra.mxu0 %v6730_v56 }
0x24be   :  { %5101 = vmatpush1.bf16.msra.mxu1 %v6718_v30  ;;  %6548 = vmatprep.subr.bf16.mxu0 %v7219_v9  ;;  %v6731_v36 = vld [vmem:[%s8987_s10 + $0x48] sm:$0xff]  }
0x24bf   :  { %v4997_v20 = vsel %vm387_vm0, %v4983_v33, 0.0  ;;  %v4984_v51 = vmul.f32 %v8832_v26, %v8832_v26  ;;  %5102 = vmatprep.subr.bf16.mxu1 %v6723_v61  ;;  %v6734_v33 = vld [vmem:[%s8987_s10 + $0x60] sm:$0xff]  }
0x24c0   :  { %4998 = vadd.xlane.f32.xlu1 %v4997_v20  ;;  %v6735_v20 = vld [vmem:[%s8987_s10 + $0x68] sm:$0xff]  }
0x24c1   :  { %v5000_v48 = vsel %vm387_vm0, %v4984_v51, 0.0  ;;  %6549 = vmatpush3.bf16.msra.mxu0 %v6731_v36  ;;  %v6736_v51 = vld [vmem:[%s8987_s10 + $0x70] sm:$0xff]  }
0x24c2   :  { %5001 = vadd.xlane.f32.xlu0 %v5000_v48  ;;  %5103 = vmatpush1.bf16.msra.mxu1 %v6721_v35  ;;  %v6737_v48 = vld [vmem:[%s8987_s10 + $0x78] sm:$0xff]  }
0x24c3   :  { %5104 = vmatprep.subr.bf16.mxu1 %v6726_v7  ;;  %6550 = vmatprep.subr.bf16.mxu0 %v7219_v9 }
0x24c5   :  { %6551 = vmatpush3.bf16.msra.mxu0 %v6732_v1 }
0x24c6   :  { %5105 = vmatpush1.bf16.msra.mxu1 %v6724_v54  ;;  %6552 = vmatprep.subr.bf16.mxu0 %v7219_v9 }
0x24c7   :  { %5106 = vmatprep.subr.bf16.mxu1 %v6729_v16 }
0x24c9   :  { %6553 = vmatpush3.bf16.msra.mxu0 %v6733_v21 }
0x24ca   :  { %5107 = vmatpush1.bf16.msra.mxu1 %v6727_v60  ;;  %6554 = vmatprep.subr.bf16.mxu0 %v7219_v9 }
0x24cd   :  { %6555 = vmatpush3.bf16.msra.mxu0 %v6734_v33 }
0x24ce   :  { %6556 = vmatprep.subr.bf16.mxu0 %v7219_v9 }
0x24d1   :  { %6557 = vmatpush3.bf16.msra.mxu0 %v6735_v20 }
0x24d2   :  { %6558 = vmatprep.subr.bf16.mxu0 %v7219_v9 }
0x24d5   :  { %6559 = vmatpush3.bf16.msra.mxu0 %v6736_v51 }
0x24d6   :  { %6560 = vmatprep.subr.bf16.mxu0 %v7219_v9 }
0x24d9   :  { %6561 = vmatpush3.bf16.msra.mxu0 %v6737_v48 }
0x253d   :  { %v4987_v28 = vpop.xlane.xlu0 %4986 }
0x253e   :  { %v5003_v19 = vmul.f32 0.015625, %v4987_v28 }
0x253f   :  { %v4990_v37 = vpop.xlane.xlu1 %4989 }
0x2540   :  { %v5009_v10 = vadd.f32 1e-06, %v5003_v19  ;;  %v5004_v47 = vmul.f32 0.015625, %v4990_v37 }
0x2542   :  { %7002 = vrsqrt.f32 %v5009_v10  ;;  %v5010_v27 = vadd.f32 1e-06, %v5004_v47 }
0x2544   :  { %7004 = vrsqrt.f32 %v5010_v27 }
0x2545   :  { %v4993_v8 = vpop.xlane.xlu0 %4992 }
0x2546   :  { %v5005_v5 = vmul.f32 0.015625, %v4993_v8 }
0x2548   :  { %v5011_v15 = vadd.f32 1e-06, %v5005_v5 }
0x2549   :  { %v4996_v41 = vpop.xlane.xlu0 %4995 }
0x254a   :  { %7006 = vrsqrt.f32 %v5011_v15  ;;  %v5006_v50 = vmul.f32 0.015625, %v4996_v41 }
0x254c   :  { %v7003_v55 = vpop.eup %7002  ;;  %v5012_v49 = vadd.f32 1e-06, %v5006_v50 }
0x254d   :  { %v5021_v18 = vmul.f32 %v7003_v55, %v8800_v12  ;;  %v4999_v59 = vpop.xlane.xlu1 %4998 }
0x254e   :  { %v7005_v31 = vpop.eup %7004  ;;  %7008 = vrsqrt.f32 %v5012_v49  ;;  %v5007_v3 = vmul.f32 0.015625, %v4999_v59 }
0x254f   :  { %v5022_v22 = vmul.f32 %v7005_v31, %v8804_v24  ;;  %v5002_v44 = vpop.xlane.xlu0 %5001  ;;  %v5033_v39 = vmul.f32 %v5764_v34, %v5021_v18 }
0x2550   :  { %v5013_v13 = vadd.f32 1e-06, %v5007_v3  ;;  %v5008_v2 = vmul.f32 0.015625, %v5002_v44 }
0x2551   :  { %v5034_v42 = vmul.f32 %v5764_v34, %v5022_v22 }
0x2552   :  { %7010 = vrsqrt.f32 %v5013_v13  ;;  %v5014_v63 = vadd.f32 1e-06, %v5008_v2 }
0x2553   :  { %v5039_v45 = vpack.c.bf16 %v5034_v42, %v5033_v39 }
0x2554   :  { %v7007_v57 = vpop.eup %7006  ;;  %7012 = vrsqrt.f32 %v5014_v63 }
0x2555   :  { %5781 = vmatmul.mubr.msk.bf16.vlgmr.msra.gmra.mrb[160].mxu1 %vm387_vm0, %v5039_v45  ;;  %v5023_v53 = vmul.f32 %v7007_v57, %v8814_v14 }
0x2556   :  { %5142 = vmatprep.mubr.bf16.mxu1 %v7217_v0 }
0x2557   :  { %v5035_v58 = vmul.f32 %v5764_v34, %v5023_v53 }
0x2558   :  { %v7009_v40 = vpop.eup %7008 }
0x2559   :  { %v5024_v17 = vmul.f32 %v7009_v40, %v8818_v43 }
0x255b   :  { %v5036_v6 = vmul.f32 %v5764_v34, %v5024_v17 }
0x255c   :  { %v7011_v46 = vpop.eup %7010 }
0x255d   :  { %v5040_v23 = vpack.c.bf16 %v5036_v6, %v5035_v58  ;;  %v5025_v25 = vmul.f32 %v7011_v46, %v8827_v4 }
0x255e   :  { %v7013_v52 = vpop.eup %7012 }
0x255f   :  { %5782 = vmatmul.mubr.msk.bf16.gmra.mrb[164].mxu1 %vm387_vm0, %v5040_v23  ;;  %v5026_v62 = vmul.f32 %v7013_v52, %v8832_v26  ;;  %v5037_v29 = vmul.f32 %v5764_v34, %v5025_v25 }
0x2560   :  { %5152 = vmatprep.mubr.bf16.mxu1 %v7217_v0 }
0x2561   :  { %v5038_v32 = vmul.f32 %v5764_v34, %v5026_v62 }
0x2563   :  { %v5041_v11 = vpack.c.bf16 %v5038_v32, %v5037_v29 }
0x2567   :  { %5783 = vmatmul.mubr.msk.bf16.gmra.mrb[168].mxu1 %vm387_vm0, %v5041_v11 }
0x2568   :  { %5495 = vmatprep.mubr.bf16.mxu1 %v7217_v0 }
0x2628   :  { %v5134_v38 = vpop.f32.mrb[160].mxu1 }
0x2629   :  { %v5784_v30 = vmul.f32 -1.442695, %v5134_v38  ;;  %v5136_v61 = vpop.f32.mrb[161].mxu1 }
0x262a   :  { %v5138_v35 = vpop.f32.mrb[162].mxu1 }
0x262b   :  { %7014 = vpow2.f32 %v5784_v30  ;;  %v5785_v7 = vmul.f32 -1.442695, %v5138_v35  ;;  %v5140_v54 = vpop.f32.mrb[163].mxu1 }
0x262d   :  { %7016 = vpow2.f32 %v5785_v7 }
0x2632   :  { %v5144_v16 = vpop.f32.mrb[164].mxu1 }
0x2633   :  { %v5786_v60 = vmul.f32 -1.442695, %v5144_v16  ;;  %v5146_v28 = vpop.f32.mrb[165].mxu1 }
0x2634   :  { %v5148_v19 = vpop.f32.mrb[166].mxu1 }
0x2635   :  { %v7015_v37 = vpop.eup %7014  ;;  %7018 = vpow2.f32 %v5786_v60  ;;  %v5787_v10 = vmul.f32 -1.442695, %v5148_v19  ;;  %v5150_v47 = vpop.f32.mrb[167].mxu1 }
0x2636   :  { %v5181_v27 = vadd.f32 1.0, %v7015_v37 }
0x2637   :  { %v7017_v8 = vpop.eup %7016  ;;  %7020 = vpow2.f32 %v5787_v10 }
0x2638   :  { %7022 = vrcp.f32 %v5181_v27  ;;  %v5182_v5 = vadd.f32 1.0, %v7017_v8 }
0x263a   :  { %7024 = vrcp.f32 %v5182_v5  ;;  %v5154_v15 = vpop.f32.mrb[168].mxu1 }
0x263b   :  { %v5788_v41 = vmul.f32 -1.442695, %v5154_v15  ;;  %v5156_v50 = vpop.f32.mrb[169].mxu1 }
0x263c   :  { %v5158_v55 = vpop.f32.mrb[170].mxu1 }
0x263d   :  { %7026 = vpow2.f32 %v5788_v41  ;;  %v5789_v49 = vmul.f32 -1.442695, %v5158_v55  ;;  %v5160_v18 = vpop.f32.mrb[171].mxu1 }
0x263f   :  { %v7019_v59 = vpop.eup %7018  ;;  %7028 = vpow2.f32 %v5789_v49  ;;  %v6738_v49 = vld [vmem:[#allocation10] ss:$8 sps:$4 sm:$0xff]  }
0x2640   :  { %v5183_v31 = vadd.f32 1.0, %v7019_v59  ;;  %v6741_v59 = vld [vmem:[#allocation10 + $0x10] ss:$8 sps:$4 sm:$0xff]  }
0x2641   :  { %v7021_v3 = vpop.eup %7020 }
0x2642   :  { %v7023_v34 = vpop.eup %7022  ;;  %7030 = vrcp.f32 %v5183_v31  ;;  %v5184_v22 = vadd.f32 1.0, %v7021_v3  ;;  %v6744_v31 = vld [vmem:[#allocation10 + $0x20] ss:$8 sps:$4 sm:$0xff]   ;;  %v6749_v3 = vld [vmem:[#allocation10 + $0x34] ss:$8 sps:$4 sm:$0xff]  }
0x2643   :  { %v5199_v44 = vmul.f32 %v7023_v34, %v5134_v38  ;;  %v6747_v34 = vld [vmem:[#allocation10 + $0x30] ss:$8 sps:$4 sm:$0xff]  }
0x2644   :  { %v7025_v13 = vpop.eup %7024  ;;  %7032 = vrcp.f32 %v5184_v22 }
0x2645   :  { %v5205_v2 = vmul.f32 %v5199_v44, %v5136_v61  ;;  %v5200_v39 = vmul.f32 %v7025_v13, %v5138_v35 }
0x2647   :  { %v7027_v42 = vpop.eup %7026  ;;  %v5206_v63 = vmul.f32 %v5200_v39, %v5140_v54 }
0x2648   :  { %v5185_v45 = vadd.f32 1.0, %v7027_v42 }
0x2649   :  { %v7029_v57 = vpop.eup %7028  ;;  %v5211_v53 = vpack.c.bf16 %v5206_v63, %v5205_v2 }
0x264a   :  { %7034 = vrcp.f32 %v5185_v45  ;;  %v5186_v40 = vadd.f32 1.0, %v7029_v57 }
0x264b   :  { %6563 = vmatmul.mubr.bf16.vlgmr.msra.gmra.mrb[172].mxu0 %v5211_v53 }
0x264c   :  { %v7031_v17 = vpop.eup %7030  ;;  %7036 = vrcp.f32 %v5186_v40  ;;  %6566 = vmatprep.mubr.msk.bf16.mxu0 %vm7220_vm1, %v7219_v9 }
0x264d   :  { %v5201_v58 = vmul.f32 %v7031_v17, %v5144_v16 }
0x264e   :  { %v7033_v6 = vpop.eup %7032 }
0x264f   :  { %v5207_v46 = vmul.f32 %v5201_v58, %v5146_v28  ;;  %v5202_v23 = vmul.f32 %v7033_v6, %v5148_v19 }
0x2651   :  { %v5208_v52 = vmul.f32 %v5202_v23, %v5150_v47  ;;  %v5814_v23 = vld [vmem:[%s8988_s11] ss:$0 sm:$0xff]  ;;  %s7226_s11 = smov [#allocation11]  }
0x2652   :  { %s5543_s23 = sshll.u32 %s7226_s11, 4  ;;  %s5544_s23 = int_to_ptr.vmem [resolvable:$true] %s5543_s23 }
0x2653   :  { %v5212_v25 = vpack.c.bf16 %v5208_v52, %v5207_v46  ;;  %s7176_s25 = scalar_lea.vmem %s5544_s23, 1536  ;;  %p7181_p13 = scmp.lt.s32.totalorder %s5544_s23, %s5544_s23 }
0x2654   :  { %v7035_v62 = vpop.eup %7034  ;;  %p7177_p12 = scmp.ne.s32.totalorder %s5544_s23, %s7176_s25  ;;  %p7182_p0 = scmp.lt.s32.totalorder %s7176_s25, %s7176_s25 }
0x2655   :  { %v5203_v32 = vmul.f32 %v7035_v62, %v5154_v15  ;;  %6567 = vmatmul.mubr.bf16.gmra.mrb[176].mxu0 %v5212_v25 }
0x2656   :  { %v7037_v29 = vpop.eup %7036  ;;  %6570 = vmatprep.mubr.msk.bf16.mxu0 %vm7220_vm1, %v7219_v9  ;;  %p7183_p1 = por %p7182_p0, %p7181_p13 }
0x2657   :  { %v5209_v11 = vmul.f32 %v5203_v32, %v5156_v50  ;;  %v5204_v56 = vmul.f32 %v7037_v29, %v5158_v55 }
0x2658   :  { %p7184_p2 = pnand %p7183_p1, %p7177_p12 }
0x2659   :  { %v5210_v36 = vmul.f32 %v5204_v56, %v5160_v18  ;;  %v6743_v18 = vld [vmem:[#allocation10 + $0x14] ss:$8 sps:$4 sm:$0xff]  }
0x265b   :  { %v5213_v1 = vpack.c.bf16 %v5210_v36, %v5209_v11 }
0x265d   :  { %6571 = vmatmul.mubr.bf16.gmra.mrb[180].mxu0 %v5213_v1 }
0x271e   :  { %v5313_v21 = vpop.f32.mrb[172].mxu0 }
0x271f   :  { %v8915_v33 = vadd.f32 %v5313_v21, %v8800_v12  ;;  %v6564_v20 = vpop.f32.mrb[173].mxu0 }
0x2720   :  { %v5316_v51 = vpop.f32.mrb[174].mxu0 }
0x2721   :  { %v5343_v48 = vmul.f32 %v8915_v33, %v8915_v33  ;;  %v8920_v38 = vadd.f32 %v5316_v51, %v8804_v24  ;;  %v6565_v30 = vpop.f32.mrb[175].mxu0 }
0x2723   :  { %v5344_v9 = vmul.f32 %v8920_v38, %v8920_v38  ;;  %v5349_v61 = vsel %vm387_vm0, %v5343_v48, 0.0 }
0x2724   :  { %5350 = vadd.xlane.f32.xlu1 %v5349_v61 }
0x2725   :  { %v5352_v35 = vsel %vm387_vm0, %v5344_v9, 0.0 }
0x2726   :  { %5353 = vadd.xlane.f32.xlu0 %v5352_v35 }
0x2728   :  { %v5321_v12 = vpop.f32.mrb[176].mxu0 }
0x2729   :  { %v8927_v7 = vadd.f32 %v5321_v12, %v8814_v14  ;;  %v6568_v54 = vpop.f32.mrb[177].mxu0 }
0x272a   :  { %v5324_v16 = vpop.f32.mrb[178].mxu0 }
0x272b   :  { %v5345_v24 = vmul.f32 %v8927_v7, %v8927_v7  ;;  %v8932_v60 = vadd.f32 %v5324_v16, %v8818_v43  ;;  %v6569_v28 = vpop.f32.mrb[179].mxu0 }
0x272d   :  { %v5346_v19 = vmul.f32 %v8932_v60, %v8932_v60  ;;  %v5355_v37 = vsel %vm387_vm0, %v5345_v24, 0.0 }
0x272e   :  { %5356 = vadd.xlane.f32.xlu1 %v5355_v37 }
0x272f   :  { %v5358_v10 = vsel %vm387_vm0, %v5346_v19, 0.0 }
0x2730   :  { %5359 = vadd.xlane.f32.xlu0 %v5358_v10  ;;  %v5329_v14 = vpop.f32.mrb[180].mxu0 }
0x2731   :  { %v8939_v47 = vadd.f32 %v5329_v14, %v8827_v4  ;;  %v6572_v27 = vpop.f32.mrb[181].mxu0  ;;  %v6740_v4 = vld [vmem:[#allocation10 + $0x4] ss:$8 sps:$4 sm:$0xff]  }
0x2732   :  { %v5332_v8 = vpop.f32.mrb[182].mxu0  ;;  %5463 = vmatprep.subr.bf16.mxu1 %v6740_v4 }
0x2733   :  { %v5347_v43 = vmul.f32 %v8939_v47, %v8939_v47  ;;  %v8944_v5 = vadd.f32 %v5332_v8, %v8832_v26  ;;  %v6573_v15 = vpop.f32.mrb[183].mxu0  ;;  %5464 = vmatpush1.bf16.msra.mxu1 %v6738_v49  ;;  %v6746_v26 = vld [vmem:[#allocation10 + $0x24] ss:$8 sps:$4 sm:$0xff]  }
0x2734   :  { %5465 = vmatprep.subr.bf16.mxu1 %v6743_v18 }
0x2735   :  { %v5348_v41 = vmul.f32 %v8944_v5, %v8944_v5  ;;  %v5361_v50 = vsel %vm387_vm0, %v5347_v43, 0.0 }
0x2736   :  { %5362 = vadd.xlane.f32.xlu1 %v5361_v50 }
0x2737   :  { %v5364_v55 = vsel %vm387_vm0, %v5348_v41, 0.0  ;;  %5466 = vmatpush1.bf16.msra.mxu1 %v6741_v59 }
0x2738   :  { %5365 = vadd.xlane.f32.xlu0 %v5364_v55  ;;  %5467 = vmatprep.subr.bf16.mxu1 %v6746_v26 }
0x273b   :  { %5468 = vmatpush1.bf16.msra.mxu1 %v6744_v31 }
0x273c   :  { %5469 = vmatprep.subr.bf16.mxu1 %v6749_v3 }
0x273f   :  { %5470 = vmatpush1.bf16.msra.mxu1 %v6747_v34 }
0x27b1   :  { %v5351_v22 = vpop.xlane.xlu1 %5350 }
0x27b2   :  { %v5367_v44 = vmul.f32 0.015625, %v5351_v22 }
0x27b3   :  { %v5354_v13 = vpop.xlane.xlu0 %5353 }
0x27b4   :  { %v5373_v2 = vadd.f32 1e-06, %v5367_v44  ;;  %v5368_v39 = vmul.f32 0.015625, %v5354_v13 }
0x27b6   :  { %7038 = vrsqrt.f32 %v5373_v2  ;;  %v5374_v42 = vadd.f32 1e-06, %v5368_v39 }
0x27b8   :  { %7040 = vrsqrt.f32 %v5374_v42 }
0x27bb   :  { %v5357_v63 = vpop.xlane.xlu1 %5356 }
0x27bc   :  { %v5369_v45 = vmul.f32 0.015625, %v5357_v63 }
0x27bd   :  { %v5360_v57 = vpop.xlane.xlu0 %5359 }
0x27be   :  { %v5375_v53 = vadd.f32 1e-06, %v5369_v45  ;;  %v5370_v40 = vmul.f32 0.015625, %v5360_v57 }
0x27c0   :  { %v7039_v17 = vpop.eup %7038  ;;  %7042 = vrsqrt.f32 %v5375_v53  ;;  %v5376_v58 = vadd.f32 1e-06, %v5370_v40 }
0x27c1   :  { %v5385_v6 = vmul.f32 %v7039_v17, %v8915_v33 }
0x27c2   :  { %v7041_v46 = vpop.eup %7040  ;;  %7044 = vrsqrt.f32 %v5376_v58 }
0x27c3   :  { %v5386_v52 = vmul.f32 %v7041_v46, %v8920_v38  ;;  %v5363_v25 = vpop.xlane.xlu1 %5362  ;;  %v5397_v32 = vmul.f32 %v5814_v23, %v5385_v6 }
0x27c4   :  { %v5371_v62 = vmul.f32 0.015625, %v5363_v25 }
0x27c5   :  { %v5398_v29 = vmul.f32 %v5814_v23, %v5386_v52  ;;  %v5366_v11 = vpop.xlane.xlu0 %5365 }
0x27c6   :  { %v5377_v56 = vadd.f32 1e-06, %v5371_v62  ;;  %v5372_v36 = vmul.f32 0.015625, %v5366_v11 }
0x27c7   :  { %v5403_v1 = vpack.c.bf16 %v5398_v29, %v5397_v32 }
0x27c8   :  { %7046 = vrsqrt.f32 %v5377_v56  ;;  %v5378_v21 = vadd.f32 1e-06, %v5372_v36 }
0x27c9   :  { %5823 = vmatmul.mubr.msk.bf16.vlgmr.msra.gmra.mrb[172].mxu1 %vm387_vm0, %v5403_v1 }
0x27ca   :  { %v7043_v33 = vpop.eup %7042  ;;  %7048 = vrsqrt.f32 %v5378_v21  ;;  %5505 = vmatprep.mubr.bf16.mxu1 %v7217_v0 }
0x27cb   :  { %v5387_v20 = vmul.f32 %v7043_v33, %v8927_v7 }
0x27cc   :  { %v7045_v51 = vpop.eup %7044 }
0x27cd   :  { %v5388_v48 = vmul.f32 %v7045_v51, %v8932_v60  ;;  %v5399_v38 = vmul.f32 %v5814_v23, %v5387_v20 }
0x27cf   :  { %v5400_v30 = vmul.f32 %v5814_v23, %v5388_v48 }
0x27d1   :  { %v5404_v9 = vpack.c.bf16 %v5400_v30, %v5399_v38 }
0x27d2   :  { %v7047_v61 = vpop.eup %7046 }
0x27d3   :  { %5824 = vmatmul.mubr.msk.bf16.gmra.mrb[176].mxu1 %vm387_vm0, %v5404_v9  ;;  %v5389_v35 = vmul.f32 %v7047_v61, %v8939_v47 }
0x27d4   :  { %v7049_v12 = vpop.eup %7048  ;;  %5515 = vmatprep.mubr.bf16.mxu1 %v7217_v0 }
0x27d5   :  { %v5390_v54 = vmul.f32 %v7049_v12, %v8944_v5  ;;  %v5401_v16 = vmul.f32 %v5814_v23, %v5389_v35 }
0x27d7   :  { %v5402_v24 = vmul.f32 %v5814_v23, %v5390_v54 }
0x27d9   :  { %v5405_v28 = vpack.c.bf16 %v5402_v24, %v5401_v16 }
0x27db   :  { %5825 = vmatmul.mubr.msk.bf16.gmra.mrb[180].mxu1 %vm387_vm0, %v5405_v28 }
0x289c   :  { %v5497_v7 = vpop.f32.mrb[172].mxu1 }
0x289d   :  { %5526 = vst [vmem:[#allocation11] sm:$0xff] %v5497_v7  ;;  %v5499_v60 = vpop.f32.mrb[173].mxu1 }
0x289e   :  { %5527 = vst [vmem:[#allocation11 + $0x8] sm:$0xff] %v5499_v60  ;;  %v5501_v19 = vpop.f32.mrb[174].mxu1 }
0x289f   :  { %5528 = vst [vmem:[#allocation11 + $0x10] sm:$0xff] %v5501_v19  ;;  %v5503_v37 = vpop.f32.mrb[175].mxu1 }
0x28a0   :  { %5529 = vst [vmem:[#allocation11 + $0x18] sm:$0xff] %v5503_v37 }
0x28a6   :  { %v5507_v10 = vpop.f32.mrb[176].mxu1 }
0x28a7   :  { %5530 = vst [vmem:[#allocation11 + $0x20] sm:$0xff] %v5507_v10  ;;  %v5509_v14 = vpop.f32.mrb[177].mxu1 }
0x28a8   :  { %5531 = vst [vmem:[#allocation11 + $0x28] sm:$0xff] %v5509_v14  ;;  %v5511_v0 = vpop.f32.mrb[178].mxu1 }
0x28a9   :  { %5532 = vst [vmem:[#allocation11 + $0x30] sm:$0xff] %v5511_v0  ;;  %v5513_v47 = vpop.f32.mrb[179].mxu1 }
0x28aa   :  { %5533 = vst [vmem:[#allocation11 + $0x38] sm:$0xff] %v5513_v47 }
0x28ae   :  { %v5517_v27 = vpop.f32.mrb[180].mxu1 }
0x28af   :  { %5534 = vst [vmem:[#allocation11 + $0x40] sm:$0xff] %v5517_v27  ;;  %v5519_v8 = vpop.f32.mrb[181].mxu1 }
0x28b0   :  { %5535 = vst [vmem:[#allocation11 + $0x48] sm:$0xff] %v5519_v8  ;;  %v5521_v43 = vpop.f32.mrb[182].mxu1 }
0x28b1   :  { %5536 = vst [vmem:[#allocation11 + $0x50] sm:$0xff] %v5521_v43  ;;  %v5523_v5 = vpop.f32.mrb[183].mxu1 }
0x28b2   :  { %5537 = vst [vmem:[#allocation11 + $0x58] sm:$0xff] %v5523_v5 }
0x28b3   :  { %7187 = shalt.err (!%p7184_p2)
}
0x28b4   :  { %s7188_s4 = scalar_lea.hbm %s8990_s13, 1536 }
0x28b5   :  { %p7189_p3 = scmp.ne.s32.totalorder %s8990_s13, %s7188_s4  ;;  %p7192_p4 = scmp.lt.u32.totalorder %s7188_s4, %s8990_s13 }
0x28b7   :  { %p7194_p5 = pnand %p7192_p4, %p7189_p3 }
0x28b9   :  { %7197 = shalt.err (!%p7194_p5)
}
0x28ba   :  { %s7227_s21 = smov 256  }
0x28bb   :  { %5549 = dma.vmem_to_hbm [thread:$0]  %s5544_s23, 1536, %s8990_s13, [#allocation4], %s7227_s21, %s7227_s21, %s7210_s2  }
0x28bc   :  { %7204 = dma.done.wait [#allocation4], 1536  }
0x28bd   :  { %7205 = vsyncadd [#allocation4], 4294965760 }
0x28be   :  { %5553 = vsyncpa [#allocation3], 1 }
0x28bf   :  { %5554 = vsyncpa [#allocation6], 1 }
0x28c0   :  { %5555 = vsyncpa [#allocation9], 1 }
0x28c1   :  { %5556 = vsyncpa [#allocation4], 1 }

</bundles_post_ra>
